<compile_context>
chip_gen: v6e
topology: v6e:2x2x1
jax: 0.10.0
libtpu: 0.0.40
codegen_flags: <defaults>
</compile_context>

<pallas_src>
import functools

import jax
import jax.numpy as jnp
from jax.experimental import pallas as pl
from jax.experimental.pallas import tpu as pltpu


def _round_up(x, m):
    return ((x + m - 1) // m) * m


def _fused_mlp_kernel(x_ref, *refs):
    """Fused MLP: h = x; per layer: h = relu?((h @ W) + shift), activations carried bf16.

    refs = (w0, s0, w1, s1, ..., w4, s4, o_ref)
      x_ref : (tb, in_pad)   VMEM, bf16 (flattened, zero-padded input)
      w_i   : (in_i, out_i)  VMEM, bf16 (BN scale pre-folded, dims padded to 128)
      s_i   : (1, out_i)     VMEM, f32  (BN shift + linear bias, padded with 0)
      o_ref : (tb, out_pad)  VMEM, f32
    """
    o_ref = refs[-1]
    param_refs = refs[:-1]
    n_layers = len(param_refs) // 2

    h = x_ref[...]  # bf16
    for i in range(n_layers):
        w_ref = param_refs[2 * i]
        s_ref = param_refs[2 * i + 1]
        # bf16 x bf16 -> f32 accumulate on the MXU.
        y = jnp.dot(h, w_ref[...], preferred_element_type=jnp.float32) + s_ref[...]
        if i < n_layers - 1:                       # hidden layers: ReLU, carry bf16
            h = jnp.maximum(y, 0.0).astype(jnp.bfloat16)
        else:                                      # last LinearBlock: activation=None
            o_ref[...] = y.astype(o_ref.dtype)


def init_params(key, in_features, num_classes, dtype=jnp.bfloat16):
    """Parameters matching LinearModel layer shapes, BN(eval) folded, dims padded to 128.

    Weight i has shape (in_pad_i, out_pad_i) where padded rows/cols are zero (so padded
    lanes stay exactly zero through ReLU and feed zeros into later matmuls).
    """
    eps = 1e-5
    dims = [in_features, 1024, 512, 400, 256, num_classes]
    params = []
    prev_pad = _round_up(in_features, 128)   # layer-0 K dim padded to 128 as well
    for i in range(5):
        fin, fout = dims[i], dims[i + 1]
        fout_pad = _round_up(fout, 128)
        key, kw, kb = jax.random.split(key, 3)
        # PyTorch nn.Linear default init: U(-1/sqrt(fin), 1/sqrt(fin))
        bound = 1.0 / jnp.sqrt(jnp.float32(fin))
        w = jax.random.uniform(kw, (fin, fout), jnp.float32, -bound, bound)
        b = jax.random.uniform(kb, (fout,), jnp.float32, -bound, bound)

        has_bn = i < 4  # last LinearBlock has no batch_norm
        if has_bn:
            gamma = jnp.ones((fout,), jnp.float32)
            beta = jnp.zeros((fout,), jnp.float32)
            running_mean = jnp.zeros((fout,), jnp.float32)
            running_var = jnp.ones((fout,), jnp.float32)
            s = gamma / jnp.sqrt(running_var + eps)
            w = w * s[None, :]                       # fold BN scale into weight columns
            shift = beta + (b - running_mean) * s    # fold BN shift + linear bias
        else:
            shift = b

        w_pad = jnp.zeros((prev_pad, fout_pad), jnp.float32).at[:fin, :fout].set(w)
        shift_pad = jnp.zeros((fout_pad,), jnp.float32).at[:fout].set(shift)
        params.append(dict(w=w_pad.astype(dtype),
                           shift=shift_pad.reshape(1, fout_pad)))   # shift stays f32
        prev_pad = fout_pad
    return params


def _choose_tile_b(b_pad, tile_b):
    """Batch tile: multiple of 8 that divides b_pad and is <= tile_b (avoids a wrapper
    jnp.pad copy of the whole activation). Prefers >=2 grid steps when the batch allows
    it so v7x megacore has work for both TensorCores."""
    tb = max(8, (min(tile_b, b_pad) // 8) * 8)
    while b_pad % tb:
        tb -= 8
    if b_pad // tb == 1 and b_pad >= 16 and (b_pad // 2) % 8 == 0:
        tb = b_pad // 2
    return tb


@functools.partial(jax.jit,
                   static_argnames=("num_classes", "tile_b", "single_buffer_weights"))
def _forward_impl(x, params, *, num_classes, tile_b, single_buffer_weights):
    B = x.shape[0]
    h = x.reshape(B, -1).astype(jnp.bfloat16)    # nn.Flatten + bf16 streaming
    in_f = h.shape[1]
    in_pad = params[0]["w"].shape[0]
    out_pad = params[-1]["w"].shape[1]

    Bp = _round_up(B, 8)                          # only 8-align rows (tiny pad, if any)
    tb = _choose_tile_b(Bp, tile_b)

    pad_rows = Bp - B
    pad_cols = in_pad - in_f
    if pad_rows or pad_cols:
        h = jnp.pad(h, ((0, pad_rows), (0, pad_cols)))

    flat = []
    for p in params:
        flat.extend((p["w"], p["shift"]))

    # Weights/shifts are grid-invariant: constant index_map keeps them resident; single
    # buffering (when supported) avoids allocating a useless second copy in VMEM.
    resident = {}
    if single_buffer_weights and hasattr(pl, "Buffered"):
        resident = dict(pipeline_mode=pl.Buffered(1))

    x_spec = pl.BlockSpec((tb, in_pad), lambda i: (i, 0))
    param_specs = []
    for p in params:
        param_specs.append(pl.BlockSpec(p["w"].shape, lambda i: (0, 0), **resident))
        param_specs.append(pl.BlockSpec(p["shift"].shape, lambda i: (0, 0), **resident))
    out_spec = pl.BlockSpec((tb, out_pad), lambda i: (i, 0))

    flops = 2 * Bp * sum(int(p["w"].shape[0]) * int(p["w"].shape[1]) for p in params)
    bytes_accessed = (
        h.size * h.dtype.itemsize
        + sum(int(p["w"].size) * p["w"].dtype.itemsize
              + int(p["shift"].size) * p["shift"].dtype.itemsize for p in params)
        + Bp * out_pad * 4)

    out = pl.pallas_call(
        _fused_mlp_kernel,
        out_shape=jax.ShapeDtypeStruct((Bp, out_pad), jnp.float32),
        grid=(Bp // tb,),
        in_specs=[x_spec] + param_specs,
        out_specs=out_spec,
        compiler_params=pltpu.CompilerParams(
            dimension_semantics=("parallel",),
            vmem_limit_bytes=32 * 1024 * 1024,
        ),
        cost_estimate=pl.CostEstimate(
            flops=flops, transcendentals=0, bytes_accessed=bytes_accessed),
    )(h, *flat)
    return out[:B, :num_classes]


def linear_model_forward(x, params, *, num_classes, tile_b=256):
    """Fused LinearModel forward. tile_b=256 is a portable default; 512 is a good choice
    on v6e/v7x for large batches (vmem_limit_bytes is already raised accordingly)."""
    try:
        return _forward_impl(x, params, num_classes=num_classes, tile_b=tile_b,
                             single_buffer_weights=True)
    except Exception:  # older JAX/Mosaic without BlockSpec pipeline_mode support
        return _forward_impl(x, params, num_classes=num_classes, tile_b=tile_b,
                             single_buffer_weights=False)


def reference_forward(x, params, num_classes):
    """Pure-JAX reference using the same folded/padded bf16 params and bf16 activations."""
    h = x.reshape(x.shape[0], -1).astype(jnp.bfloat16)
    in_pad = params[0]["w"].shape[0]
    if h.shape[1] < in_pad:
        h = jnp.pad(h, ((0, 0), (0, in_pad - h.shape[1])))
    for i, p in enumerate(params):
        y = jnp.dot(h, p["w"], preferred_element_type=jnp.float32) + p["shift"]
        if i < len(params) - 1:
            h = jnp.maximum(y, 0.0).astype(jnp.bfloat16)
        else:
            h = y
    return h[:, :num_classes]


if __name__ == "__main__":
    # Small shapes implied by the module: x is (B, frame_len, keypoints_len, dim_no)
    batch = 8
    frame_len = 8
    keypoints_len = 4
    dim_no = 3
    num_classes = 10
    in_features = frame_len * keypoints_len * dim_no  # 96

    key = jax.random.PRNGKey(0)
    kx, kp = jax.random.split(key)
    x = jax.random.normal(kx, (batch, frame_len, keypoints_len, dim_no), jnp.float32)
    params = init_params(kp, in_features, num_classes)

    out = linear_model_forward(x, params, num_classes=num_classes)
    out = jax.block_until_ready(out)

    ref = reference_forward(x, params, num_classes)
    assert out.shape == (batch, num_classes), out.shape
    assert jnp.allclose(out, ref, atol=1e-2, rtol=1e-2), float(jnp.abs(out - ref).max())

    print("KERNEL_OK")
</pallas_src>

<mosaic_0001>
module attributes {stable_mosaic.version = 11 : i64} {
  func.func @_fused_mlp_kernel(%arg0: i32, %arg1: memref<8x128xbf16, #tpu.memory_space<vmem>>, %arg2: memref<128x1024xbf16, #tpu.memory_space<vmem>>, %arg3: memref<1x1024xf32, #tpu.memory_space<vmem>>, %arg4: memref<1024x512xbf16, #tpu.memory_space<vmem>>, %arg5: memref<1x512xf32, #tpu.memory_space<vmem>>, %arg6: memref<512x512xbf16, #tpu.memory_space<vmem>>, %arg7: memref<1x512xf32, #tpu.memory_space<vmem>>, %arg8: memref<512x256xbf16, #tpu.memory_space<vmem>>, %arg9: memref<1x256xf32, #tpu.memory_space<vmem>>, %arg10: memref<256x128xbf16, #tpu.memory_space<vmem>>, %arg11: memref<1x128xf32, #tpu.memory_space<vmem>>, %arg12: memref<8x128xf32, #tpu.memory_space<vmem>>) attributes {dimension_semantics = [#tpu.dimension_semantics<parallel>], iteration_bounds = array<i64: 1>, scalar_prefetch = 0 : i64, scratch_operands = 0 : i64, tpu.core_type = #tpu.core_type<tc>, window_params = [{transform_indices = @transform_0, window_bounds = array<i64: 8, 128>}, {pipeline_mode = #tpu.pipeline_mode<synchronous>, transform_indices = @transform_1, window_bounds = array<i64: 128, 1024>}, {pipeline_mode = #tpu.pipeline_mode<synchronous>, transform_indices = @transform_2, window_bounds = array<i64: 1, 1024>}, {pipeline_mode = #tpu.pipeline_mode<synchronous>, transform_indices = @transform_3, window_bounds = array<i64: 1024, 512>}, {pipeline_mode = #tpu.pipeline_mode<synchronous>, transform_indices = @transform_4, window_bounds = array<i64: 1, 512>}, {pipeline_mode = #tpu.pipeline_mode<synchronous>, transform_indices = @transform_5, window_bounds = array<i64: 512, 512>}, {pipeline_mode = #tpu.pipeline_mode<synchronous>, transform_indices = @transform_6, window_bounds = array<i64: 1, 512>}, {pipeline_mode = #tpu.pipeline_mode<synchronous>, transform_indices = @transform_7, window_bounds = array<i64: 512, 256>}, {pipeline_mode = #tpu.pipeline_mode<synchronous>, transform_indices = @transform_8, window_bounds = array<i64: 1, 256>}, {pipeline_mode = #tpu.pipeline_mode<synchronous>, transform_indices = @transform_9, window_bounds = array<i64: 256, 128>}, {pipeline_mode = #tpu.pipeline_mode<synchronous>, transform_indices = @transform_10, window_bounds = array<i64: 1, 128>}, {transform_indices = @transform_11, window_bounds = array<i64: 8, 128>}]} {
    %c0 = arith.constant 0 : index
    %c0_0 = arith.constant 0 : index
    %0 = vector.load %arg1[%c0, %c0_0] : memref<8x128xbf16, #tpu.memory_space<vmem>>, vector<8x128xbf16>
    %c0_1 = arith.constant 0 : index
    %c0_2 = arith.constant 0 : index
    %1 = vector.load %arg2[%c0_1, %c0_2] : memref<128x1024xbf16, #tpu.memory_space<vmem>>, vector<128x1024xbf16>
    %cst = arith.constant dense<0.000000e+00> : vector<8x1024xf32>
    %2 = tpu.matmul %0, %1, %cst {dimension_numbers = #tpu.dot_dimension_numbers<[1], [0], [0], [1], [0, 0, 1, 1], [], []>} : vector<8x128xbf16>, vector<128x1024xbf16>, vector<8x1024xf32> -> vector<8x1024xf32>
    %c0_3 = arith.constant 0 : index
    %c0_4 = arith.constant 0 : index
    %3 = vector.load %arg3[%c0_3, %c0_4] : memref<1x1024xf32, #tpu.memory_space<vmem>>, vector<1x1024xf32>
    %4 = vector.broadcast %3 : vector<1x1024xf32> to vector<8x1024xf32>
    %5 = arith.addf %2, %4 : vector<8x1024xf32>
    %cst_5 = arith.constant 0.000000e+00 : f32
    %6 = vector.broadcast %cst_5 : f32 to vector<8x1024xf32>
    %7 = arith.maximumf %5, %6 : vector<8x1024xf32>
    %8 = arith.truncf %7 : vector<8x1024xf32> to vector<8x1024xbf16>
    %c0_6 = arith.constant 0 : index
    %c0_7 = arith.constant 0 : index
    %9 = vector.load %arg4[%c0_6, %c0_7] : memref<1024x512xbf16, #tpu.memory_space<vmem>>, vector<1024x512xbf16>
    %cst_8 = arith.constant dense<0.000000e+00> : vector<8x512xf32>
    %10 = tpu.matmul %8, %9, %cst_8 {dimension_numbers = #tpu.dot_dimension_numbers<[1], [0], [0], [1], [0, 0, 1, 1], [], []>} : vector<8x1024xbf16>, vector<1024x512xbf16>, vector<8x512xf32> -> vector<8x512xf32>
    %c0_9 = arith.constant 0 : index
    %c0_10 = arith.constant 0 : index
    %11 = vector.load %arg5[%c0_9, %c0_10] : memref<1x512xf32, #tpu.memory_space<vmem>>, vector<1x512xf32>
    %12 = vector.broadcast %11 : vector<1x512xf32> to vector<8x512xf32>
    %13 = arith.addf %10, %12 : vector<8x512xf32>
    %cst_11 = arith.constant 0.000000e+00 : f32
    %14 = vector.broadcast %cst_11 : f32 to vector<8x512xf32>
    %15 = arith.maximumf %13, %14 : vector<8x512xf32>
    %16 = arith.truncf %15 : vector<8x512xf32> to vector<8x512xbf16>
    %c0_12 = arith.constant 0 : index
    %c0_13 = arith.constant 0 : index
    %17 = vector.load %arg6[%c0_12, %c0_13] : memref<512x512xbf16, #tpu.memory_space<vmem>>, vector<512x512xbf16>
    %cst_14 = arith.constant dense<0.000000e+00> : vector<8x512xf32>
    %18 = tpu.matmul %16, %17, %cst_14 {dimension_numbers = #tpu.dot_dimension_numbers<[1], [0], [0], [1], [0, 0, 1, 1], [], []>} : vector<8x512xbf16>, vector<512x512xbf16>, vector<8x512xf32> -> vector<8x512xf32>
    %c0_15 = arith.constant 0 : index
    %c0_16 = arith.constant 0 : index
    %19 = vector.load %arg7[%c0_15, %c0_16] : memref<1x512xf32, #tpu.memory_space<vmem>>, vector<1x512xf32>
    %20 = vector.broadcast %19 : vector<1x512xf32> to vector<8x512xf32>
    %21 = arith.addf %18, %20 : vector<8x512xf32>
    %cst_17 = arith.constant 0.000000e+00 : f32
    %22 = vector.broadcast %cst_17 : f32 to vector<8x512xf32>
    %23 = arith.maximumf %21, %22 : vector<8x512xf32>
    %24 = arith.truncf %23 : vector<8x512xf32> to vector<8x512xbf16>
    %c0_18 = arith.constant 0 : index
    %c0_19 = arith.constant 0 : index
    %25 = vector.load %arg8[%c0_18, %c0_19] : memref<512x256xbf16, #tpu.memory_space<vmem>>, vector<512x256xbf16>
    %cst_20 = arith.constant dense<0.000000e+00> : vector<8x256xf32>
    %26 = tpu.matmul %24, %25, %cst_20 {dimension_numbers = #tpu.dot_dimension_numbers<[1], [0], [0], [1], [0, 0, 1, 1], [], []>} : vector<8x512xbf16>, vector<512x256xbf16>, vector<8x256xf32> -> vector<8x256xf32>
    %c0_21 = arith.constant 0 : index
    %c0_22 = arith.constant 0 : index
    %27 = vector.load %arg9[%c0_21, %c0_22] : memref<1x256xf32, #tpu.memory_space<vmem>>, vector<1x256xf32>
    %28 = vector.broadcast %27 : vector<1x256xf32> to vector<8x256xf32>
    %29 = arith.addf %26, %28 : vector<8x256xf32>
    %cst_23 = arith.constant 0.000000e+00 : f32
    %30 = vector.broadcast %cst_23 : f32 to vector<8x256xf32>
    %31 = arith.maximumf %29, %30 : vector<8x256xf32>
    %32 = arith.truncf %31 : vector<8x256xf32> to vector<8x256xbf16>
    %c0_24 = arith.constant 0 : index
    %c0_25 = arith.constant 0 : index
    %33 = vector.load %arg10[%c0_24, %c0_25] : memref<256x128xbf16, #tpu.memory_space<vmem>>, vector<256x128xbf16>
    %cst_26 = arith.constant dense<0.000000e+00> : vector<8x128xf32>
    %34 = tpu.matmul %32, %33, %cst_26 {dimension_numbers = #tpu.dot_dimension_numbers<[1], [0], [0], [1], [0, 0, 1, 1], [], []>} : vector<8x256xbf16>, vector<256x128xbf16>, vector<8x128xf32> -> vector<8x128xf32>
    %c0_27 = arith.constant 0 : index
    %c0_28 = arith.constant 0 : index
    %35 = vector.load %arg11[%c0_27, %c0_28] : memref<1x128xf32, #tpu.memory_space<vmem>>, vector<1x128xf32>
    %36 = vector.broadcast %35 : vector<1x128xf32> to vector<8x128xf32>
    %37 = arith.addf %34, %36 : vector<8x128xf32>
    %c0_29 = arith.constant 0 : index
    %c0_30 = arith.constant 0 : index
    %38 = vector.load %arg12[%c0_29, %c0_30] : memref<8x128xf32, #tpu.memory_space<vmem>>, vector<8x128xf32>
    tpu.vector_store %arg12[%c0_29, %c0_30], %37 {strides = array<i32>} : memref<8x128xf32, #tpu.memory_space<vmem>>, vector<8x128xf32>,
    return
  }
  func.func @transform_0(%arg0: i32) -> (i32, i32) {
    %c0_i32 = arith.constant 0 : i32
    %c0_i32_0 = arith.constant 0 : i32
    return %arg0, %c0_i32 : i32, i32
  }
  func.func @transform_1(%arg0: i32) -> (i32, i32) {
    %c0_i32 = arith.constant 0 : i32
    %c0_i32_0 = arith.constant 0 : i32
    %c0_i32_1 = arith.constant 0 : i32
    return %c0_i32, %c0_i32_0 : i32, i32
  }
  func.func @transform_2(%arg0: i32) -> (i32, i32) {
    %c0_i32 = arith.constant 0 : i32
    %c0_i32_0 = arith.constant 0 : i32
    %c0_i32_1 = arith.constant 0 : i32
    return %c0_i32, %c0_i32_0 : i32, i32
  }
  func.func @transform_3(%arg0: i32) -> (i32, i32) {
    %c0_i32 = arith.constant 0 : i32
    %c0_i32_0 = arith.constant 0 : i32
    %c0_i32_1 = arith.constant 0 : i32
    return %c0_i32, %c0_i32_0 : i32, i32
  }
  func.func @transform_4(%arg0: i32) -> (i32, i32) {
    %c0_i32 = arith.constant 0 : i32
    %c0_i32_0 = arith.constant 0 : i32
    %c0_i32_1 = arith.constant 0 : i32
    return %c0_i32, %c0_i32_0 : i32, i32
  }
  func.func @transform_5(%arg0: i32) -> (i32, i32) {
    %c0_i32 = arith.constant 0 : i32
    %c0_i32_0 = arith.constant 0 : i32
    %c0_i32_1 = arith.constant 0 : i32
    return %c0_i32, %c0_i32_0 : i32, i32
  }
  func.func @transform_6(%arg0: i32) -> (i32, i32) {
    %c0_i32 = arith.constant 0 : i32
    %c0_i32_0 = arith.constant 0 : i32
    %c0_i32_1 = arith.constant 0 : i32
    return %c0_i32, %c0_i32_0 : i32, i32
  }
  func.func @transform_7(%arg0: i32) -> (i32, i32) {
    %c0_i32 = arith.constant 0 : i32
    %c0_i32_0 = arith.constant 0 : i32
    %c0_i32_1 = arith.constant 0 : i32
    return %c0_i32, %c0_i32_0 : i32, i32
  }
  func.func @transform_8(%arg0: i32) -> (i32, i32) {
    %c0_i32 = arith.constant 0 : i32
    %c0_i32_0 = arith.constant 0 : i32
    %c0_i32_1 = arith.constant 0 : i32
    return %c0_i32, %c0_i32_0 : i32, i32
  }
  func.func @transform_9(%arg0: i32) -> (i32, i32) {
    %c0_i32 = arith.constant 0 : i32
    %c0_i32_0 = arith.constant 0 : i32
    %c0_i32_1 = arith.constant 0 : i32
    return %c0_i32, %c0_i32_0 : i32, i32
  }
  func.func @transform_10(%arg0: i32) -> (i32, i32) {
    %c0_i32 = arith.constant 0 : i32
    %c0_i32_0 = arith.constant 0 : i32
    %c0_i32_1 = arith.constant 0 : i32
    return %c0_i32, %c0_i32_0 : i32, i32
  }
  func.func @transform_11(%arg0: i32) -> (i32, i32) {
    %c0_i32 = arith.constant 0 : i32
    %c0_i32_0 = arith.constant 0 : i32
    return %arg0, %c0_i32 : i32, i32
  }
}

module attributes {stable_mosaic.version = 11 : i64} {
  func.func @_fused_mlp_kernel(%arg0: i32, %arg1: memref<8x128xbf16, #tpu.memory_space<vmem>>, %arg2: memref<128x1024xbf16, #tpu.memory_space<vmem>>, %arg3: memref<1x1024xf32, #tpu.memory_space<vmem>>, %arg4: memref<1024x512xbf16, #tpu.memory_space<vmem>>, %arg5: memref<1x512xf32, #tpu.memory_space<vmem>>, %arg6: memref<512x512xbf16, #tpu.memory_space<vmem>>, %arg7: memref<1x512xf32, #tpu.memory_space<vmem>>, %arg8: memref<512x256xbf16, #tpu.memory_space<vmem>>, %arg9: memref<1x256xf32, #tpu.memory_space<vmem>>, %arg10: memref<256x128xbf16, #tpu.memory_space<vmem>>, %arg11: memref<1x128xf32, #tpu.memory_space<vmem>>, %arg12: memref<8x128xf32, #tpu.memory_space<vmem>>) attributes {dimension_semantics = [#tpu.dimension_semantics<parallel>], iteration_bounds = array<i64: 1>, scalar_prefetch = 0 : i64, scratch_operands = 0 : i64, tpu.core_type = #tpu.core_type<tc>, window_params = [{transform_indices = @transform_0, window_bounds = array<i64: 8, 128>}, {pipeline_mode = #tpu.pipeline_mode<synchronous>, transform_indices = @transform_1, window_bounds = array<i64: 128, 1024>}, {pipeline_mode = #tpu.pipeline_mode<synchronous>, transform_indices = @transform_2, window_bounds = array<i64: 1, 1024>}, {pipeline_mode = #tpu.pipeline_mode<synchronous>, transform_indices = @transform_3, window_bounds = array<i64: 1024, 512>}, {pipeline_mode = #tpu.pipeline_mode<synchronous>, transform_indices = @transform_4, window_bounds = array<i64: 1, 512>}, {pipeline_mode = #tpu.pipeline_mode<synchronous>, transform_indices = @transform_5, window_bounds = array<i64: 512, 512>}, {pipeline_mode = #tpu.pipeline_mode<synchronous>, transform_indices = @transform_6, window_bounds = array<i64: 1, 512>}, {pipeline_mode = #tpu.pipeline_mode<synchronous>, transform_indices = @transform_7, window_bounds = array<i64: 512, 256>}, {pipeline_mode = #tpu.pipeline_mode<synchronous>, transform_indices = @transform_8, window_bounds = array<i64: 1, 256>}, {pipeline_mode = #tpu.pipeline_mode<synchronous>, transform_indices = @transform_9, window_bounds = array<i64: 256, 128>}, {pipeline_mode = #tpu.pipeline_mode<synchronous>, transform_indices = @transform_10, window_bounds = array<i64: 1, 128>}, {transform_indices = @transform_11, window_bounds = array<i64: 8, 128>}]} {
    %c0 = arith.constant 0 : index
    %c0_0 = arith.constant 0 : index
    %0 = vector.load %arg1[%c0, %c0_0] : memref<8x128xbf16, #tpu.memory_space<vmem>>, vector<8x128xbf16>
    %c0_1 = arith.constant 0 : index
    %c0_2 = arith.constant 0 : index
    %1 = vector.load %arg2[%c0_1, %c0_2] : memref<128x1024xbf16, #tpu.memory_space<vmem>>, vector<128x1024xbf16>
    %cst = arith.constant dense<0.000000e+00> : vector<8x1024xf32>
    %2 = tpu.matmul %0, %1, %cst {dimension_numbers = #tpu.dot_dimension_numbers<[1], [0], [0], [1], [0, 0, 1, 1], [], []>} : vector<8x128xbf16>, vector<128x1024xbf16>, vector<8x1024xf32> -> vector<8x1024xf32>
    %c0_3 = arith.constant 0 : index
    %c0_4 = arith.constant 0 : index
    %3 = vector.load %arg3[%c0_3, %c0_4] : memref<1x1024xf32, #tpu.memory_space<vmem>>, vector<1x1024xf32>
    %4 = vector.broadcast %3 : vector<1x1024xf32> to vector<8x1024xf32>
    %5 = arith.addf %2, %4 : vector<8x1024xf32>
    %cst_5 = arith.constant 0.000000e+00 : f32
    %6 = vector.broadcast %cst_5 : f32 to vector<8x1024xf32>
    %7 = arith.maximumf %5, %6 : vector<8x1024xf32>
    %8 = arith.truncf %7 : vector<8x1024xf32> to vector<8x1024xbf16>
    %c0_6 = arith.constant 0 : index
    %c0_7 = arith.constant 0 : index
    %9 = vector.load %arg4[%c0_6, %c0_7] : memref<1024x512xbf16, #tpu.memory_space<vmem>>, vector<1024x512xbf16>
    %cst_8 = arith.constant dense<0.000000e+00> : vector<8x512xf32>
    %10 = tpu.matmul %8, %9, %cst_8 {dimension_numbers = #tpu.dot_dimension_numbers<[1], [0], [0], [1], [0, 0, 1, 1], [], []>} : vector<8x1024xbf16>, vector<1024x512xbf16>, vector<8x512xf32> -> vector<8x512xf32>
    %c0_9 = arith.constant 0 : index
    %c0_10 = arith.constant 0 : index
    %11 = vector.load %arg5[%c0_9, %c0_10] : memref<1x512xf32, #tpu.memory_space<vmem>>, vector<1x512xf32>
    %12 = vector.broadcast %11 : vector<1x512xf32> to vector<8x512xf32>
    %13 = arith.addf %10, %12 : vector<8x512xf32>
    %cst_11 = arith.constant 0.000000e+00 : f32
    %14 = vector.broadcast %cst_11 : f32 to vector<8x512xf32>
    %15 = arith.maximumf %13, %14 : vector<8x512xf32>
    %16 = arith.truncf %15 : vector<8x512xf32> to vector<8x512xbf16>
    %c0_12 = arith.constant 0 : index
    %c0_13 = arith.constant 0 : index
    %17 = vector.load %arg6[%c0_12, %c0_13] : memref<512x512xbf16, #tpu.memory_space<vmem>>, vector<512x512xbf16>
    %cst_14 = arith.constant dense<0.000000e+00> : vector<8x512xf32>
    %18 = tpu.matmul %16, %17, %cst_14 {dimension_numbers = #tpu.dot_dimension_numbers<[1], [0], [0], [1], [0, 0, 1, 1], [], []>} : vector<8x512xbf16>, vector<512x512xbf16>, vector<8x512xf32> -> vector<8x512xf32>
    %c0_15 = arith.constant 0 : index
    %c0_16 = arith.constant 0 : index
    %19 = vector.load %arg7[%c0_15, %c0_16] : memref<1x512xf32, #tpu.memory_space<vmem>>, vector<1x512xf32>
    %20 = vector.broadcast %19 : vector<1x512xf32> to vector<8x512xf32>
    %21 = arith.addf %18, %20 : vector<8x512xf32>
    %cst_17 = arith.constant 0.000000e+00 : f32
    %22 = vector.broadcast %cst_17 : f32 to vector<8x512xf32>
    %23 = arith.maximumf %21, %22 : vector<8x512xf32>
    %24 = arith.truncf %23 : vector<8x512xf32> to vector<8x512xbf16>
    %c0_18 = arith.constant 0 : index
    %c0_19 = arith.constant 0 : index
    %25 = vector.load %arg8[%c0_18, %c0_19] : memref<512x256xbf16, #tpu.memory_space<vmem>>, vector<512x256xbf16>
    %cst_20 = arith.constant dense<0.000000e+00> : vector<8x256xf32>
    %26 = tpu.matmul %24, %25, %cst_20 {dimension_numbers = #tpu.dot_dimension_numbers<[1], [0], [0], [1], [0, 0, 1, 1], [], []>} : vector<8x512xbf16>, vector<512x256xbf16>, vector<8x256xf32> -> vector<8x256xf32>
    %c0_21 = arith.constant 0 : index
    %c0_22 = arith.constant 0 : index
    %27 = vector.load %arg9[%c0_21, %c0_22] : memref<1x256xf32, #tpu.memory_space<vmem>>, vector<1x256xf32>
    %28 = vector.broadcast %27 : vector<1x256xf32> to vector<8x256xf32>
    %29 = arith.addf %26, %28 : vector<8x256xf32>
    %cst_23 = arith.constant 0.000000e+00 : f32
    %30 = vector.broadcast %cst_23 : f32 to vector<8x256xf32>
    %31 = arith.maximumf %29, %30 : vector<8x256xf32>
    %32 = arith.truncf %31 : vector<8x256xf32> to vector<8x256xbf16>
    %c0_24 = arith.constant 0 : index
    %c0_25 = arith.constant 0 : index
    %33 = vector.load %arg10[%c0_24, %c0_25] : memref<256x128xbf16, #tpu.memory_space<vmem>>, vector<256x128xbf16>
    %cst_26 = arith.constant dense<0.000000e+00> : vector<8x128xf32>
    %34 = tpu.matmul %32, %33, %cst_26 {dimension_numbers = #tpu.dot_dimension_numbers<[1], [0], [0], [1], [0, 0, 1, 1], [], []>} : vector<8x256xbf16>, vector<256x128xbf16>, vector<8x128xf32> -> vector<8x128xf32>
    %c0_27 = arith.constant 0 : index
    %c0_28 = arith.constant 0 : index
    %35 = vector.load %arg11[%c0_27, %c0_28] : memref<1x128xf32, #tpu.memory_space<vmem>>, vector<1x128xf32>
    %36 = vector.broadcast %35 : vector<1x128xf32> to vector<8x128xf32>
    %37 = arith.addf %34, %36 : vector<8x128xf32>
    %c0_29 = arith.constant 0 : index
    %c0_30 = arith.constant 0 : index
    %38 = vector.load %arg12[%c0_29, %c0_30] : memref<8x128xf32, #tpu.memory_space<vmem>>, vector<8x128xf32>
    tpu.vector_store %arg12[%c0_29, %c0_30], %37 {strides = array<i32>} : memref<8x128xf32, #tpu.memory_space<vmem>>, vector<8x128xf32>,
    return
  }
  func.func @transform_0(%arg0: i32) -> (i32, i32) {
    %c0_i32 = arith.constant 0 : i32
    %c0_i32_0 = arith.constant 0 : i32
    return %arg0, %c0_i32 : i32, i32
  }
  func.func @transform_1(%arg0: i32) -> (i32, i32) {
    %c0_i32 = arith.constant 0 : i32
    %c0_i32_0 = arith.constant 0 : i32
    %c0_i32_1 = arith.constant 0 : i32
    return %c0_i32, %c0_i32_0 : i32, i32
  }
  func.func @transform_2(%arg0: i32) -> (i32, i32) {
    %c0_i32 = arith.constant 0 : i32
    %c0_i32_0 = arith.constant 0 : i32
    %c0_i32_1 = arith.constant 0 : i32
    return %c0_i32, %c0_i32_0 : i32, i32
  }
  func.func @transform_3(%arg0: i32) -> (i32, i32) {
    %c0_i32 = arith.constant 0 : i32
    %c0_i32_0 = arith.constant 0 : i32
    %c0_i32_1 = arith.constant 0 : i32
    return %c0_i32, %c0_i32_0 : i32, i32
  }
  func.func @transform_4(%arg0: i32) -> (i32, i32) {
    %c0_i32 = arith.constant 0 : i32
    %c0_i32_0 = arith.constant 0 : i32
    %c0_i32_1 = arith.constant 0 : i32
    return %c0_i32, %c0_i32_0 : i32, i32
  }
  func.func @transform_5(%arg0: i32) -> (i32, i32) {
    %c0_i32 = arith.constant 0 : i32
    %c0_i32_0 = arith.constant 0 : i32
    %c0_i32_1 = arith.constant 0 : i32
    return %c0_i32, %c0_i32_0 : i32, i32
  }
  func.func @transform_6(%arg0: i32) -> (i32, i32) {
    %c0_i32 = arith.constant 0 : i32
    %c0_i32_0 = arith.constant 0 : i32
    %c0_i32_1 = arith.constant 0 : i32
    return %c0_i32, %c0_i32_0 : i32, i32
  }
  func.func @transform_7(%arg0: i32) -> (i32, i32) {
    %c0_i32 = arith.constant 0 : i32
    %c0_i32_0 = arith.constant 0 : i32
    %c0_i32_1 = arith.constant 0 : i32
    return %c0_i32, %c0_i32_0 : i32, i32
  }
  func.func @transform_8(%arg0: i32) -> (i32, i32) {
    %c0_i32 = arith.constant 0 : i32
    %c0_i32_0 = arith.constant 0 : i32
    %c0_i32_1 = arith.constant 0 : i32
    return %c0_i32, %c0_i32_0 : i32, i32
  }
  func.func @transform_9(%arg0: i32) -> (i32, i32) {
    %c0_i32 = arith.constant 0 : i32
    %c0_i32_0 = arith.constant 0 : i32
    %c0_i32_1 = arith.constant 0 : i32
    return %c0_i32, %c0_i32_0 : i32, i32
  }
  func.func @transform_10(%arg0: i32) -> (i32, i32) {
    %c0_i32 = arith.constant 0 : i32
    %c0_i32_0 = arith.constant 0 : i32
    %c0_i32_1 = arith.constant 0 : i32
    return %c0_i32, %c0_i32_0 : i32, i32
  }
  func.func @transform_11(%arg0: i32) -> (i32, i32) {
    %c0_i32 = arith.constant 0 : i32
    %c0_i32_0 = arith.constant 0 : i32
    return %arg0, %c0_i32 : i32, i32
  }
}

</mosaic_0001>

<bundles_post_ra>
// kernel: _forward_impl.1
= control target key start
LH: loop header
LB: loop body
LE: loop exit
PB: predicated region body
PF: predicated region fallthrough
CT: control target
= control target key end

     0   :  { %16 = vsyncpa [#allocation3], 0  ;;  %s5873_s0 = inlined_call_operand.vmem [shape: bf16[8,128], index: 0, kind: input, shape index: {}]   ;;  %s5874_s1 = inlined_call_operand.hbm [shape: bf16[128,1024], index: 1, kind: input, shape index: {}]   ;;  %s5875_s2 = inlined_call_operand.vmem [shape: f32[1,1024], index: 2, kind: input, shape index: {}]   ;;  %s5876_s3 = inlined_call_operand.hbm [shape: bf16[1024,512], index: 3, kind: input, shape index: {}]   ;;  %s5877_s4 = inlined_call_operand.vmem [shape: f32[1,512], index: 4, kind: input, shape index: {}]   ;;  %s5878_s5 = inlined_call_operand.hbm [shape: bf16[512,512], index: 5, kind: input, shape index: {}]   ;;  %s5879_s6 = inlined_call_operand.vmem [shape: f32[1,512], index: 6, kind: input, shape index: {}]   ;;  %s5880_s7 = inlined_call_operand.hbm [shape: bf16[512,256], index: 7, kind: input, shape index: {}]   ;;  %s5881_s8 = inlined_call_operand.vmem [shape: f32[1,256], index: 8, kind: input, shape index: {}]   ;;  %s5882_s9 = inlined_call_operand.vmem [shape: bf16[256,128], index: 9, kind: input, shape index: {}]   ;;  %s5883_s10 = inlined_call_operand.vmem [shape: f32[1,128], index: 10, kind: input, shape index: {}]   ;;  %s5884_s11 = inlined_call_operand.hbm [shape: f32[8,128], index: 11, kind: output, shape index: {}]  }
   0x1   :  { %17 = vsyncpa [#allocation6], 0 }
   0x2   :  { %18 = vsyncpa [#allocation9], 0 }
   0x3   :  { %19 = vsyncpa [#allocation4], 0  ;;  %s5592_s17 = smov [#allocation5]  }
   0x4   :  { %s41_s18 = sshll.u32 %s5592_s17, 4  ;;  %s42_s18 = int_to_ptr.vmem [resolvable:$true] %s41_s18 }
   0x5   :  { %s5492_s19 = scalar_lea.vmem %s42_s18, 32768  ;;  %p5497_p1 = scmp.lt.s32.totalorder %s42_s18, %s42_s18 }
   0x6   :  { %p5493_p0 = scmp.ne.s32.totalorder %s42_s18, %s5492_s19  ;;  %p5498_p2 = scmp.lt.s32.totalorder %s5492_s19, %s5492_s19 }
   0x8   :  { %p5499_p3 = por %p5498_p2, %p5497_p1 }
   0xa   :  { %p5500_p4 = pnand %p5499_p3, %p5493_p0 }
   0xc   :  { %5503 = shalt.err (!%p5500_p4)
}
   0xd   :  { %s5593_s20 = smov 256   ;;  %s5594_s21 = smov 16  }
   0xe   :  { %47 = dma.hbm_to_vmem [thread:$0]  %s5876_s3, 32768, %s42_s18, [#allocation6], %s5593_s20, %s5593_s20, %s5594_s21  }
   0xf   :  { %s5595_s24 = smov [#allocation2]  }
  0x10   :  { %s27_s25 = sshll.u32 %s5595_s24, 4  ;;  %s28_s25 = int_to_ptr.vmem [resolvable:$true] %s27_s25 }
  0x11   :  { %s5512_s26 = scalar_lea.vmem %s28_s25, 8192  ;;  %p5517_p6 = scmp.lt.s32.totalorder %s28_s25, %s28_s25 }
  0x12   :  { %p5513_p5 = scmp.ne.s32.totalorder %s28_s25, %s5512_s26  ;;  %p5518_p7 = scmp.lt.s32.totalorder %s5512_s26, %s5512_s26 }
  0x14   :  { %p5519_p8 = por %p5518_p7, %p5517_p6 }
  0x16   :  { %p5520_p9 = pnand %p5519_p8, %p5513_p5 }
  0x18   :  { %5523 = shalt.err (!%p5520_p9)
}
  0x19   :  { %s5596_s27 = smov 512   ;;  %s5597_s28 = smov 32  }
  0x1a   :  { %33 = dma.hbm_to_vmem [thread:$0]  %s5874_s1, 8192, %s28_s25, [#allocation3], %s5596_s27, %s5596_s27, %s5597_s28  }
  0x1b   :  { %s5598_s12 = smov [#allocation7]   ;;  %s5599_s14 = smov [#allocation8]  }
  0x1c   :  { %s55_s13 = sshll.u32 %s5598_s12, 4  ;;  %s69_s3 = sshll.u32 %s5599_s14, 4  ;;  %s56_s13 = int_to_ptr.vmem [resolvable:$true] %s55_s13  ;;  %s70_s3 = int_to_ptr.vmem [resolvable:$true] %s69_s3 }
  0x1d   :  { %s5532_s15 = scalar_lea.vmem %s56_s13, 16384  ;;  %p5537_p11 = scmp.lt.s32.totalorder %s56_s13, %s56_s13 }
  0x1e   :  { %p5533_p10 = scmp.ne.s32.totalorder %s56_s13, %s5532_s15  ;;  %p5538_p12 = scmp.lt.s32.totalorder %s5532_s15, %s5532_s15 }
  0x20   :  { %p5539_p13 = por %p5538_p12, %p5537_p11 }
  0x22   :  { %p5540_p0 = pnand %p5539_p13, %p5533_p10 }
  0x24   :  { %5543 = shalt.err (!%p5540_p0)
}
  0x25   :  { %61 = dma.hbm_to_vmem [thread:$0]  %s5878_s5, 16384, %s56_s13, [#allocation6], %s5593_s20, %s5593_s20, %s5594_s21  }
  0x26   :  { %s5552_s1 = scalar_lea.vmem %s70_s3, 8192  ;;  %p5557_p2 = scmp.lt.s32.totalorder %s70_s3, %s70_s3 }
  0x27   :  { %p5553_p1 = scmp.ne.s32.totalorder %s70_s3, %s5552_s1  ;;  %p5558_p3 = scmp.lt.s32.totalorder %s5552_s1, %s5552_s1 }
  0x29   :  { %p5559_p4 = por %p5558_p3, %p5557_p2 }
  0x2b   :  { %p5560_p5 = pnand %p5559_p4, %p5553_p1 }
  0x2d   :  { %5563 = shalt.err (!%p5560_p5)
}
  0x2e   :  { %s5600_s18 = smov 128   ;;  %s5601_s19 = smov 8  }
  0x2f   :  { %75 = dma.hbm_to_vmem [thread:$0]  %s5880_s7, 8192, %s70_s3, [#allocation9], %s5600_s18, %s5600_s18, %s5601_s19  }
  0x30   :  { %5584 = dma.done.wait [#allocation3], 8192  }
  0x31   :  { %5585 = vsyncadd [#allocation3], 4294959104 }
  0x32   :  { %5586 = dma.done.wait [#allocation6], 49152  }
  0x33   :  { %5587 = vsyncadd [#allocation6], 4294918144 }
  0x34   :  { %5588 = dma.done.wait [#allocation9], 8192  }
  0x35   :  { %5589 = vsyncadd [#allocation9], 4294959104  ;;  %v5602_v0 = vmov 0   ;;  %v152_v1 = vld [vmem:[#allocation2 + $0x1c0] sm:$0xff]  ;;  %v153_v3 = vld [vmem:[#allocation2 + $0x1c8] sm:$0xff]  ;;  %s5603_s12 = smov [#allocation10]  }
  0x36   :  { %554 = vmatprep.mubr.bf16.mxu0 %v5602_v0  ;;  %595 = vmatprep.mubr.bf16.mxu1 %v5602_v0  ;;  %v156_v2 = vld [vmem:[#allocation2 + $0x1e0] sm:$0xff]  ;;  %v157_v5 = vld [vmem:[#allocation2 + $0x1e8] sm:$0xff]  ;;  %v154_v62 = vld [vmem:[#allocation2 + $0x1d0] sm:$0xff]  ;;  %s4222_s13 = sshll.u32 %s5603_s12, 4  ;;  %s4223_s13 = int_to_ptr.vmem [resolvable:$true] %s4222_s13 }
  0x37   :  { %v4290_v4 = vcombine.high %v152_v1, %v156_v2  ;;  %v4289_v6 = vcombine.low %v152_v1, %v156_v2  ;;  %v144_v7 = vld [vmem:[#allocation2 + $0x180] sm:$0xff]  ;;  %v4292_v9 = vcombine.high %v153_v3, %v157_v5  ;;  %v4291_v10 = vcombine.low %v153_v3, %v157_v5  ;;  %v145_v12 = vld [vmem:[#allocation2 + $0x188] sm:$0xff]  ;;  %v158_v1 = vld [vmem:[#allocation2 + $0x1f0] sm:$0xff]  ;;  %s5564_s14 = scalar_lea.vmem %s4223_s13, 128  ;;  %p5569_p7 = scmp.lt.s32.totalorder %s4223_s13, %s4223_s13 }
  0x38   :  { %v148_v8 = vld [vmem:[#allocation2 + $0x1a0] sm:$0xff]  ;;  %v149_v13 = vld [vmem:[#allocation2 + $0x1a8] sm:$0xff]  ;;  %v155_v2 = vld [vmem:[#allocation2 + $0x1d8] sm:$0xff]  ;;  %p5565_p6 = scmp.ne.s32.totalorder %s4223_s13, %s5564_s14  ;;  %p5570_p8 = scmp.lt.s32.totalorder %s5564_s14, %s5564_s14 }
  0x39   :  { %v4282_v11 = vcombine.high %v144_v7, %v148_v8  ;;  %v136_v14 = vld [vmem:[#allocation2 + $0x140] sm:$0xff]  ;;  %522 = vmatprep.subr.bf16.mxu0 %v4290_v4  ;;  %v4284_v15 = vcombine.high %v145_v12, %v149_v13  ;;  %v137_v17 = vld [vmem:[#allocation2 + $0x148] sm:$0xff]  ;;  %563 = vmatprep.subr.bf16.mxu1 %v4292_v9  ;;  %v4281_v19 = vcombine.low %v144_v7, %v148_v8  ;;  %v159_v3 = vld [vmem:[#allocation2 + $0x1f8] sm:$0xff] }
  0x3a   :  { %v140_v16 = vld [vmem:[#allocation2 + $0x160] sm:$0xff]  ;;  %v141_v18 = vld [vmem:[#allocation2 + $0x168] sm:$0xff]  ;;  %523 = vmatpush1.bf16.msra.mxu0 %v4289_v6  ;;  %564 = vmatpush1.bf16.msra.mxu1 %v4291_v10  ;;  %v4283_v20 = vcombine.low %v145_v12, %v149_v13  ;;  %v4294_v6 = vcombine.high %v154_v62, %v158_v1  ;;  %v146_v7 = vld [vmem:[#allocation2 + $0x190] sm:$0xff]  ;;  %v4296_v8 = vcombine.high %v155_v2, %v159_v3  ;;  %p5571_p9 = por %p5570_p8, %p5569_p7 }
  0x3b   :  { %524 = vmatprep.subr.bf16.mxu0 %v4282_v11  ;;  %v4274_v21 = vcombine.high %v136_v14, %v140_v16  ;;  %565 = vmatprep.subr.bf16.mxu1 %v4284_v15  ;;  %v4276_v22 = vcombine.high %v137_v17, %v141_v18  ;;  %v128_v23 = vld [vmem:[#allocation2 + $0x100] sm:$0xff]  ;;  %v129_v25 = vld [vmem:[#allocation2 + $0x108] sm:$0xff]  ;;  %v4273_v27 = vcombine.low %v136_v14, %v140_v16  ;;  %v150_v9 = vld [vmem:[#allocation2 + $0x1b0] sm:$0xff] }
  0x3c   :  { %v132_v24 = vld [vmem:[#allocation2 + $0x120] sm:$0xff]  ;;  %v133_v26 = vld [vmem:[#allocation2 + $0x128] sm:$0xff]  ;;  %v4275_v28 = vcombine.low %v137_v17, %v141_v18  ;;  %v147_v10 = vld [vmem:[#allocation2 + $0x198] sm:$0xff]  ;;  %v4293_v13 = vcombine.low %v154_v62, %v158_v1  ;;  %v4295_v14 = vcombine.low %v155_v2, %v159_v3  ;;  %v4286_v15 = vcombine.high %v146_v7, %v150_v9  ;;  %p5572_p10 = pnand %p5571_p9, %p5565_p6 }
  0x3d   :  { %v4266_v29 = vcombine.high %v128_v23, %v132_v24  ;;  %v4268_v30 = vcombine.high %v129_v25, %v133_v26  ;;  %v120_v31 = vld [vmem:[#allocation2 + $0xc0] sm:$0xff]  ;;  %v121_v33 = vld [vmem:[#allocation2 + $0xc8] sm:$0xff]  ;;  %v4265_v35 = vcombine.low %v128_v23, %v132_v24  ;;  %v4267_v36 = vcombine.low %v129_v25, %v133_v26  ;;  %v151_v11 = vld [vmem:[#allocation2 + $0x1b8] sm:$0xff] }
  0x3e   :  { %525 = vmatpush1.bf16.msra.mxu0 %v4281_v19  ;;  %566 = vmatpush1.bf16.msra.mxu1 %v4283_v20  ;;  %v124_v32 = vld [vmem:[#allocation2 + $0xe0] sm:$0xff]  ;;  %v125_v34 = vld [vmem:[#allocation2 + $0xe8] sm:$0xff]  ;;  %v138_v16 = vld [vmem:[#allocation2 + $0x150] sm:$0xff]  ;;  %v4288_v17 = vcombine.high %v147_v10, %v151_v11 }
  0x3f   :  { %526 = vmatprep.subr.bf16.mxu0 %v4274_v21  ;;  %567 = vmatprep.subr.bf16.mxu1 %v4276_v22  ;;  %v4258_v37 = vcombine.high %v120_v31, %v124_v32  ;;  %v4260_v38 = vcombine.high %v121_v33, %v125_v34  ;;  %v112_v39 = vld [vmem:[#allocation2 + $0x80] sm:$0xff]  ;;  %v113_v41 = vld [vmem:[#allocation2 + $0x88] sm:$0xff]  ;;  %v4257_v43 = vcombine.low %v120_v31, %v124_v32  ;;  %v142_v18 = vld [vmem:[#allocation2 + $0x170] sm:$0xff] }
  0x40   :  { %v116_v40 = vld [vmem:[#allocation2 + $0xa0] sm:$0xff]  ;;  %v117_v42 = vld [vmem:[#allocation2 + $0xa8] sm:$0xff]  ;;  %v4259_v44 = vcombine.low %v121_v33, %v125_v34  ;;  %v139_v19 = vld [vmem:[#allocation2 + $0x158] sm:$0xff]  ;;  %v4285_v21 = vcombine.low %v146_v7, %v150_v9  ;;  %v4287_v22 = vcombine.low %v147_v10, %v151_v11  ;;  %v4278_v23 = vcombine.high %v138_v16, %v142_v18 }
  0x41   :  { %v4250_v45 = vcombine.high %v112_v39, %v116_v40  ;;  %v4252_v46 = vcombine.high %v113_v41, %v117_v42  ;;  %v104_v47 = vld [vmem:[#allocation2 + $0x40] sm:$0xff]  ;;  %v105_v49 = vld [vmem:[#allocation2 + $0x48] sm:$0xff]  ;;  %v4249_v51 = vcombine.low %v112_v39, %v116_v40  ;;  %v4251_v52 = vcombine.low %v113_v41, %v117_v42  ;;  %v143_v20 = vld [vmem:[#allocation2 + $0x178] sm:$0xff] }
  0x42   :  { %527 = vmatpush1.bf16.msra.mxu0 %v4273_v27  ;;  %568 = vmatpush1.bf16.msra.mxu1 %v4275_v28  ;;  %v108_v48 = vld [vmem:[#allocation2 + $0x60] sm:$0xff]  ;;  %v109_v50 = vld [vmem:[#allocation2 + $0x68] sm:$0xff]  ;;  %v130_v24 = vld [vmem:[#allocation2 + $0x110] sm:$0xff]  ;;  %v4280_v25 = vcombine.high %v139_v19, %v143_v20 }
  0x43   :  { %528 = vmatprep.subr.bf16.mxu0 %v4266_v29  ;;  %569 = vmatprep.subr.bf16.mxu1 %v4268_v30  ;;  %v4242_v53 = vcombine.high %v104_v47, %v108_v48  ;;  %v96_v54 = vld [vmem:[#allocation2] sm:$0xff]  ;;  %v4244_v55 = vcombine.high %v105_v49, %v109_v50  ;;  %v97_v57 = vld [vmem:[#allocation2 + $0x8] sm:$0xff]  ;;  %v4241_v59 = vcombine.low %v104_v47, %v108_v48  ;;  %v134_v26 = vld [vmem:[#allocation2 + $0x130] sm:$0xff] }
  0x44   :  { %v100_v56 = vld [vmem:[#allocation2 + $0x20] sm:$0xff]  ;;  %v101_v58 = vld [vmem:[#allocation2 + $0x28] sm:$0xff]  ;;  %v4243_v60 = vcombine.low %v105_v49, %v109_v50  ;;  %v131_v27 = vld [vmem:[#allocation2 + $0x118] sm:$0xff]  ;;  %v4277_v29 = vcombine.low %v138_v16, %v142_v18  ;;  %v4279_v30 = vcombine.low %v139_v19, %v143_v20  ;;  %v4270_v31 = vcombine.high %v130_v24, %v134_v26 }
  0x45   :  { %v4234_v61 = vcombine.high %v96_v54, %v100_v56  ;;  %v4236_v63 = vcombine.high %v97_v57, %v101_v58  ;;  %v4233_v4 = vcombine.low %v96_v54, %v100_v56  ;;  %v4235_v5 = vcombine.low %v97_v57, %v101_v58  ;;  %v5687_v12 = vld [vmem:[%s5873_s0] sm:$0xf]  ;;  %v135_v28 = vld [vmem:[#allocation2 + $0x138] sm:$0xff]  ;;  %v122_v32 = vld [vmem:[#allocation2 + $0xd0] sm:$0xff] }
  0x46   :  { %529 = vmatpush1.bf16.msra.mxu0 %v4265_v35  ;;  %570 = vmatpush1.bf16.msra.mxu1 %v4267_v36  ;;  %v4272_v33 = vcombine.high %v131_v27, %v135_v28  ;;  %v126_v34 = vld [vmem:[#allocation2 + $0xf0] sm:$0xff]  ;;  %v123_v35 = vld [vmem:[#allocation2 + $0xd8] sm:$0xff] }
  0x47   :  { %530 = vmatprep.subr.bf16.mxu0 %v4258_v37  ;;  %571 = vmatprep.subr.bf16.mxu1 %v4260_v38  ;;  %v127_v36 = vld [vmem:[#allocation2 + $0xf8] sm:$0xff]  ;;  %v4269_v37 = vcombine.low %v130_v24, %v134_v26  ;;  %v4271_v38 = vcombine.low %v131_v27, %v135_v28  ;;  %v4262_v39 = vcombine.high %v122_v32, %v126_v34  ;;  %v114_v40 = vld [vmem:[#allocation2 + $0x90] sm:$0xff] }
  0x48   :  { %v118_v41 = vld [vmem:[#allocation2 + $0xb0] sm:$0xff]  ;;  %v115_v42 = vld [vmem:[#allocation2 + $0x98] sm:$0xff] }
  0x49   :  { %v106_v47 = vld [vmem:[#allocation2 + $0x50] sm:$0xff]  ;;  %v107_v50 = vld [vmem:[#allocation2 + $0x58] sm:$0xff] }
  0x4a   :  { %531 = vmatpush1.bf16.msra.mxu0 %v4257_v43  ;;  %572 = vmatpush1.bf16.msra.mxu1 %v4259_v44  ;;  %v119_v43 = vld [vmem:[#allocation2 + $0xb8] sm:$0xff]  ;;  %v4261_v44 = vcombine.low %v122_v32, %v126_v34  ;;  %v110_v49 = vld [vmem:[#allocation2 + $0x70] sm:$0xff] }
  0x4b   :  { %532 = vmatprep.subr.bf16.mxu0 %v4250_v45  ;;  %573 = vmatprep.subr.bf16.mxu1 %v4252_v46  ;;  %v4263_v45 = vcombine.low %v123_v35, %v127_v36  ;;  %v4254_v46 = vcombine.high %v114_v40, %v118_v41  ;;  %v4256_v48 = vcombine.high %v115_v42, %v119_v43  ;;  %v102_v57 = vld [vmem:[#allocation2 + $0x30] sm:$0xff]  ;;  %v99_v58 = vld [vmem:[#allocation2 + $0x18] sm:$0xff] }
  0x4c   :  { %v4246_v54 = vcombine.high %v106_v47, %v110_v49  ;;  %v4798_v1 = vld [vmem:[#allocation5 + $0xe4] ss:$16 sps:$4 sm:$0xff]   ;;  %v4802_v9 = vld [vmem:[#allocation5 + $0xc0] ss:$16 sps:$4 sm:$0xff]  }
  0x4d   :  { %v4801_v3 = vld [vmem:[#allocation5 + $0x2e4] ss:$16 sps:$4 sm:$0xff]   ;;  %v4805_v10 = vld [vmem:[#allocation5 + $0x2c0] ss:$16 sps:$4 sm:$0xff]  }
  0x4e   :  { %533 = vmatpush1.bf16.msra.mxu0 %v4249_v51  ;;  %574 = vmatpush1.bf16.msra.mxu1 %v4251_v52  ;;  %v111_v51 = vld [vmem:[#allocation2 + $0x78] sm:$0xff]  ;;  %v4253_v52 = vcombine.low %v114_v40, %v118_v41  ;;  %v4804_v7 = vld [vmem:[#allocation5 + $0xc4] ss:$16 sps:$4 sm:$0xff]   ;;  %v4814_v18 = vld [vmem:[#allocation5 + $0x80] ss:$16 sps:$4 sm:$0xff]  }
  0x4f   :  { %534 = vmatprep.subr.bf16.mxu0 %v4242_v53  ;;  %575 = vmatprep.subr.bf16.mxu1 %v4244_v55  ;;  %v4255_v53 = vcombine.low %v115_v42, %v119_v43  ;;  %v98_v55 = vld [vmem:[#allocation2 + $0x10] sm:$0xff]  ;;  %v4248_v56 = vcombine.high %v107_v50, %v111_v51 }
  0x50   :  { %v4238_v62 = vcombine.high %v98_v55, %v102_v57  ;;  %v4237_v2 = vcombine.low %v98_v55, %v102_v57  ;;  %v4810_v11 = vld [vmem:[#allocation5 + $0xa4] ss:$16 sps:$4 sm:$0xff]   ;;  %v4817_v19 = vld [vmem:[#allocation5 + $0x280] ss:$16 sps:$4 sm:$0xff]  }
  0x51   :  { %v4816_v16 = vld [vmem:[#allocation5 + $0x84] ss:$16 sps:$4 sm:$0xff]   ;;  %v4829_v26 = vld [vmem:[#allocation5 + $0x240] ss:$16 sps:$4 sm:$0xff]  }
  0x52   :  { %535 = vmatpush1.bf16.msra.mxu0 %v4241_v59  ;;  %576 = vmatpush1.bf16.msra.mxu1 %v4243_v60  ;;  %v103_v59 = vld [vmem:[#allocation2 + $0x38] sm:$0xff]  ;;  %v4245_v60 = vcombine.low %v106_v47, %v110_v49  ;;  %v4822_v20 = vld [vmem:[#allocation5 + $0x64] ss:$16 sps:$4 sm:$0xff]   ;;  %v4841_v34 = vld [vmem:[#allocation5 + $0x200] ss:$16 sps:$4 sm:$0xff]  }
  0x53   :  { %536 = vmatprep.subr.bf16.mxu0 %v4234_v61  ;;  %577 = vmatprep.subr.bf16.mxu1 %v4236_v63  ;;  %v4247_v61 = vcombine.low %v107_v50, %v111_v51  ;;  %v4240_v63 = vcombine.high %v99_v58, %v103_v59  ;;  %v4831_v24 = vld [vmem:[#allocation5 + $0x244] ss:$16 sps:$4 sm:$0xff]   ;;  %v4853_v41 = vld [vmem:[#allocation5 + $0x3c0] ss:$16 sps:$4 sm:$0xff]  }
  0x54   :  { %v4834_v27 = vld [vmem:[#allocation5 + $0x24] ss:$16 sps:$4 sm:$0xff]   ;;  %v4865_v49 = vld [vmem:[#allocation5 + $0x380] ss:$16 sps:$4 sm:$0xff]  }
  0x55   :  { %v4837_v28 = vld [vmem:[#allocation5 + $0x224] ss:$16 sps:$4 sm:$0xff]   ;;  %v4877_v57 = vld [vmem:[#allocation5 + $0x340] ss:$16 sps:$4 sm:$0xff]  }
  0x56   :  { %537 = vmatpush1.bf16.msra.mxu0 %v4233_v4  ;;  %578 = vmatpush1.bf16.msra.mxu1 %v4235_v5  ;;  %v4239_v4 = vcombine.low %v99_v58, %v103_v59  ;;  %v4796_v5 = vld [vmem:[#allocation5 + $0xe0] ss:$16 sps:$4 sm:$0xff]   ;;  %v4843_v32 = vld [vmem:[#allocation5 + $0x204] ss:$16 sps:$4 sm:$0xff]  }
  0x57   :  { %604 = vmatprep.subr.bf16.mxu0 %v4294_v6  ;;  %645 = vmatprep.subr.bf16.mxu1 %v4296_v8  ;;  %v4799_v6 = vld [vmem:[#allocation5 + $0x2e0] ss:$16 sps:$4 sm:$0xff]   ;;  %v4807_v8 = vld [vmem:[#allocation5 + $0x2c4] ss:$16 sps:$4 sm:$0xff]  }
  0x58   :  { %v4855_v40 = vld [vmem:[#allocation5 + $0x3c4] ss:$16 sps:$4 sm:$0xff]  }
  0x59   :  { %555 = vmatmul.mubr.bf16.vlgmr.msra.gmra.mxu0 %v5687_v12  ;;  %596 = vmatmul.mubr.bf16.vlgmr.msra.gmra.mxu1 %v5687_v12  ;;  %v4858_v42 = vld [vmem:[#allocation5 + $0x1a4] ss:$16 sps:$4 sm:$0xff]  }
  0x5a   :  { %605 = vmatpush1.bf16.msra.mxu0 %v4293_v13  ;;  %646 = vmatpush1.bf16.msra.mxu1 %v4295_v14  ;;  %v4813_v13 = vld [vmem:[#allocation5 + $0x2a4] ss:$16 sps:$4 sm:$0xff]   ;;  %v4808_v14 = vld [vmem:[#allocation5 + $0xa0] ss:$16 sps:$4 sm:$0xff]  }
  0x5b   :  { %606 = vmatprep.subr.bf16.mxu0 %v4286_v15  ;;  %647 = vmatprep.subr.bf16.mxu1 %v4288_v17  ;;  %v4811_v15 = vld [vmem:[#allocation5 + $0x2a0] ss:$16 sps:$4 sm:$0xff]   ;;  %v4819_v17 = vld [vmem:[#allocation5 + $0x284] ss:$16 sps:$4 sm:$0xff]  }
  0x5c   :  { %636 = vmatprep.mubr.bf16.mxu0 %v5602_v0  ;;  %677 = vmatprep.mubr.bf16.mxu1 %v5602_v0  ;;  %v4264_v0 = vcombine.high %v123_v35, %v127_v36  ;;  %v4846_v35 = vld [vmem:[#allocation5 + $0x1e4] ss:$16 sps:$4 sm:$0xff]  }
  0x5d   :  { %v4849_v36 = vld [vmem:[#allocation5 + $0x3e4] ss:$16 sps:$4 sm:$0xff]  }
  0x5e   :  { %607 = vmatpush1.bf16.msra.mxu0 %v4285_v21  ;;  %648 = vmatpush1.bf16.msra.mxu1 %v4287_v22  ;;  %v4825_v21 = vld [vmem:[#allocation5 + $0x264] ss:$16 sps:$4 sm:$0xff]   ;;  %v4823_v22 = vld [vmem:[#allocation5 + $0x260] ss:$16 sps:$4 sm:$0xff]  }
  0x5f   :  { %608 = vmatprep.subr.bf16.mxu0 %v4278_v23  ;;  %649 = vmatprep.subr.bf16.mxu1 %v4280_v25  ;;  %v4828_v23 = vld [vmem:[#allocation5 + $0x44] ss:$16 sps:$4 sm:$0xff]   ;;  %v4826_v25 = vld [vmem:[#allocation5 + $0x40] ss:$16 sps:$4 sm:$0xff]  }
  0x60   :  { %v4861_v43 = vld [vmem:[#allocation5 + $0x3a4] ss:$16 sps:$4 sm:$0xff]  }
  0x61   :  { %v4867_v47 = vld [vmem:[#allocation5 + $0x384] ss:$16 sps:$4 sm:$0xff]  }
  0x62   :  { %609 = vmatpush1.bf16.msra.mxu0 %v4277_v29  ;;  %650 = vmatpush1.bf16.msra.mxu1 %v4279_v30  ;;  %v4832_v29 = vld [vmem:[#allocation5 + $0x20] ss:$16 sps:$4 sm:$0xff]   ;;  %v4870_v50 = vld [vmem:[#allocation5 + $0x164] ss:$16 sps:$4 sm:$0xff]  }
  0x63   :  { %610 = vmatprep.subr.bf16.mxu0 %v4270_v31  ;;  %651 = vmatprep.subr.bf16.mxu1 %v4272_v33  ;;  %v4835_v30 = vld [vmem:[#allocation5 + $0x220] ss:$16 sps:$4 sm:$0xff]   ;;  %v4840_v31 = vld [vmem:[#allocation5 + $0x4] ss:$16 sps:$4 sm:$0xff]  }
  0x64   :  { %v4838_v33 = vld [vmem:[#allocation5] ss:$16 sps:$4 sm:$0xff]   ;;  %v4873_v51 = vld [vmem:[#allocation5 + $0x364] ss:$16 sps:$4 sm:$0xff]  }
  0x65   :  { %v4879_v55 = vld [vmem:[#allocation5 + $0x344] ss:$16 sps:$4 sm:$0xff]  }
  0x66   :  { %611 = vmatpush1.bf16.msra.mxu0 %v4269_v37  ;;  %652 = vmatpush1.bf16.msra.mxu1 %v4271_v38  ;;  %v4844_v37 = vld [vmem:[#allocation5 + $0x1e0] ss:$16 sps:$4 sm:$0xff]   ;;  %v4882_v58 = vld [vmem:[#allocation5 + $0x124] ss:$16 sps:$4 sm:$0xff]  }
  0x67   :  { %612 = vmatprep.subr.bf16.mxu0 %v4262_v39  ;;  %653 = vmatprep.subr.bf16.mxu1 %v4264_v0  ;;  %v4847_v38 = vld [vmem:[#allocation5 + $0x3e0] ss:$16 sps:$4 sm:$0xff]   ;;  %v4852_v39 = vld [vmem:[#allocation5 + $0x1c4] ss:$16 sps:$4 sm:$0xff]  }
  0x68   :  { %v4850_v0 = vld [vmem:[#allocation5 + $0x1c0] ss:$16 sps:$4 sm:$0xff]   ;;  %v4885_v59 = vld [vmem:[#allocation5 + $0x324] ss:$16 sps:$4 sm:$0xff]  }
  0x6a   :  { %613 = vmatpush1.bf16.msra.mxu0 %v4261_v44  ;;  %654 = vmatpush1.bf16.msra.mxu1 %v4263_v45  ;;  %v4856_v44 = vld [vmem:[#allocation5 + $0x1a0] ss:$16 sps:$4 sm:$0xff]  }
  0x6b   :  { %614 = vmatprep.subr.bf16.mxu0 %v4254_v46  ;;  %655 = vmatprep.subr.bf16.mxu1 %v4256_v48  ;;  %v4859_v45 = vld [vmem:[#allocation5 + $0x3a0] ss:$16 sps:$4 sm:$0xff]   ;;  %v4864_v46 = vld [vmem:[#allocation5 + $0x184] ss:$16 sps:$4 sm:$0xff]  }
  0x6c   :  { %v4862_v48 = vld [vmem:[#allocation5 + $0x180] ss:$16 sps:$4 sm:$0xff]  }
  0x6e   :  { %615 = vmatpush1.bf16.msra.mxu0 %v4253_v52  ;;  %656 = vmatpush1.bf16.msra.mxu1 %v4255_v53  ;;  %v4868_v52 = vld [vmem:[#allocation5 + $0x160] ss:$16 sps:$4 sm:$0xff]  }
  0x6f   :  { %616 = vmatprep.subr.bf16.mxu0 %v4246_v54  ;;  %657 = vmatprep.subr.bf16.mxu1 %v4248_v56  ;;  %v4871_v53 = vld [vmem:[#allocation5 + $0x360] ss:$16 sps:$4 sm:$0xff]   ;;  %v4876_v54 = vld [vmem:[#allocation5 + $0x144] ss:$16 sps:$4 sm:$0xff]  }
  0x70   :  { %v4874_v56 = vld [vmem:[#allocation5 + $0x140] ss:$16 sps:$4 sm:$0xff]  }
  0x72   :  { %617 = vmatpush1.bf16.msra.mxu0 %v4245_v60  ;;  %658 = vmatpush1.bf16.msra.mxu1 %v4247_v61  ;;  %v4880_v60 = vld [vmem:[#allocation5 + $0x120] ss:$16 sps:$4 sm:$0xff]  }
  0x73   :  { %618 = vmatprep.subr.bf16.mxu0 %v4238_v62  ;;  %659 = vmatprep.subr.bf16.mxu1 %v4240_v63  ;;  %v4883_v61 = vld [vmem:[#allocation5 + $0x320] ss:$16 sps:$4 sm:$0xff]   ;;  %v4888_v62 = vld [vmem:[#allocation5 + $0x104] ss:$16 sps:$4 sm:$0xff]  }
  0x74   :  { %v4891_v63 = vld [vmem:[#allocation5 + $0x304] ss:$16 sps:$4 sm:$0xff]  }
  0x76   :  { %619 = vmatpush1.bf16.msra.mxu0 %v4237_v2  ;;  %660 = vmatpush1.bf16.msra.mxu1 %v4239_v4  ;;  %v4889_v2 = vld [vmem:[#allocation5 + $0x300] ss:$16 sps:$4 sm:$0xff]   ;;  %v4897_v4 = vld [vmem:[#allocation5 + $0x6e4] ss:$16 sps:$4 sm:$0xff]  }
  0x77   :  { %2260 = vmatprep.subr.bf16.mxu0 %v4798_v1  ;;  %2301 = vmatprep.subr.bf16.mxu1 %v4801_v3  ;;  %v4886_v1 = vld [vmem:[#allocation5 + $0x100] ss:$16 sps:$4 sm:$0xff]   ;;  %v4894_v3 = vld [vmem:[#allocation5 + $0x4e4] ss:$16 sps:$4 sm:$0xff]  }
  0x79   :  { %637 = vmatmul.mubr.bf16.vlgmr.msra.gmra.mxu0 %v5687_v12  ;;  %678 = vmatmul.mubr.bf16.vlgmr.msra.gmra.mxu1 %v5687_v12  ;;  %v4820_v12 = vld [vmem:[#allocation5 + $0x60] ss:$16 sps:$4 sm:$0xff]  }
  0x7a   :  { %2261 = vmatpush1.bf16.msra.mxu0 %v4796_v5  ;;  %2302 = vmatpush1.bf16.msra.mxu1 %v4799_v6  ;;  %v162_v5 = vlaneseq }
  0x7b   :  { %2262 = vmatprep.subr.bf16.mxu0 %v4804_v7  ;;  %2303 = vmatprep.subr.bf16.mxu1 %v4807_v8  ;;  %v5700_v7 = vld [vmem:[%s5875_s2] sm:$0xff] }
  0x7c   :  { %v5695_v6 = vshrl.u32 %v162_v5, 7 }
  0x7e   :  { %2263 = vmatpush1.bf16.msra.mxu0 %v4802_v9  ;;  %2304 = vmatpush1.bf16.msra.mxu1 %v4805_v10  ;;  %v5703_v8 = vsub.s32 0, %v5695_v6  ;;  %v5706_v9 = vsub.s32 2, %v5695_v6  ;;  %v5709_v10 = vsub.s32 1, %v5695_v6 }
  0x7f   :  { %2264 = vmatprep.subr.bf16.mxu0 %v4810_v11  ;;  %2305 = vmatprep.subr.bf16.mxu1 %v4813_v13  ;;  %v5712_v11 = vsub.s32 3, %v5695_v6 }
  0x80   :  { %v165_v13 = vrot.slane %v5700_v7, %v5703_v8 }
  0x82   :  { %2265 = vmatpush1.bf16.msra.mxu0 %v4808_v14  ;;  %2306 = vmatpush1.bf16.msra.mxu1 %v4811_v15  ;;  %v173_v14 = vrot.slane %v5700_v7, %v5706_v9  ;;  %v169_v15 = vrot.slane %v5700_v7, %v5709_v10 }
  0x83   :  { %2266 = vmatprep.subr.bf16.mxu0 %v4816_v16  ;;  %2307 = vmatprep.subr.bf16.mxu1 %v4819_v17  ;;  %v177_v17 = vrot.slane %v5700_v7, %v5712_v11 }
  0x86   :  { %2267 = vmatpush1.bf16.msra.mxu0 %v4814_v18  ;;  %2308 = vmatpush1.bf16.msra.mxu1 %v4817_v19 }
  0x87   :  { %2268 = vmatprep.subr.bf16.mxu0 %v4822_v20  ;;  %2309 = vmatprep.subr.bf16.mxu1 %v4825_v21 }
  0x8a   :  { %2269 = vmatpush1.bf16.msra.mxu0 %v4820_v12  ;;  %2310 = vmatpush1.bf16.msra.mxu1 %v4823_v22 }
  0x8b   :  { %2270 = vmatprep.subr.bf16.mxu0 %v4828_v23  ;;  %2311 = vmatprep.subr.bf16.mxu1 %v4831_v24 }
  0x8e   :  { %2271 = vmatpush1.bf16.msra.mxu0 %v4826_v25  ;;  %2312 = vmatpush1.bf16.msra.mxu1 %v4829_v26 }
  0x8f   :  { %2272 = vmatprep.subr.bf16.mxu0 %v4834_v27  ;;  %2313 = vmatprep.subr.bf16.mxu1 %v4837_v28 }
  0x92   :  { %2273 = vmatpush1.bf16.msra.mxu0 %v4832_v29  ;;  %2314 = vmatpush1.bf16.msra.mxu1 %v4835_v30  ;;  %v4892_v29 = vld [vmem:[#allocation5 + $0x4e0] ss:$16 sps:$4 sm:$0xff]  }
  0x93   :  { %2274 = vmatprep.subr.bf16.mxu0 %v4840_v31  ;;  %2315 = vmatprep.subr.bf16.mxu1 %v4843_v32  ;;  %v4895_v32 = vld [vmem:[#allocation5 + $0x6e0] ss:$16 sps:$4 sm:$0xff]  }
  0x96   :  { %2275 = vmatpush1.bf16.msra.mxu0 %v4838_v33  ;;  %2316 = vmatpush1.bf16.msra.mxu1 %v4841_v34  ;;  %v4900_v33 = vld [vmem:[#allocation5 + $0x4c4] ss:$16 sps:$4 sm:$0xff]  }
  0x97   :  { %2276 = vmatprep.subr.bf16.mxu0 %v4846_v35  ;;  %2317 = vmatprep.subr.bf16.mxu1 %v4849_v36 }
  0x9a   :  { %2277 = vmatpush2.bf16.msra.mxu0 %v4844_v37  ;;  %2318 = vmatpush2.bf16.msra.mxu1 %v4847_v38  ;;  %v4903_v37 = vld [vmem:[#allocation5 + $0x6c4] ss:$16 sps:$4 sm:$0xff]  }
  0x9b   :  { %2278 = vmatprep.subr.bf16.mxu0 %v4852_v39  ;;  %2319 = vmatprep.subr.bf16.mxu1 %v4855_v40  ;;  %v4898_v40 = vld [vmem:[#allocation5 + $0x4c0] ss:$16 sps:$4 sm:$0xff]  }
  0x9e   :  { %2279 = vmatpush2.bf16.msra.mxu0 %v4850_v0  ;;  %2320 = vmatpush2.bf16.msra.mxu1 %v4853_v41  ;;  %v4901_v0 = vld [vmem:[#allocation5 + $0x6c0] ss:$16 sps:$4 sm:$0xff]   ;;  %v4906_v41 = vld [vmem:[#allocation5 + $0x4a4] ss:$16 sps:$4 sm:$0xff]  }
  0x9f   :  { %2280 = vmatprep.subr.bf16.mxu0 %v4858_v42  ;;  %2321 = vmatprep.subr.bf16.mxu1 %v4861_v43  ;;  %v4909_v42 = vld [vmem:[#allocation5 + $0x6a4] ss:$16 sps:$4 sm:$0xff]   ;;  %v4904_v43 = vld [vmem:[#allocation5 + $0x4a0] ss:$16 sps:$4 sm:$0xff]  }
  0xa2   :  { %2281 = vmatpush2.bf16.msra.mxu0 %v4856_v44  ;;  %2322 = vmatpush2.bf16.msra.mxu1 %v4859_v45  ;;  %v4907_v44 = vld [vmem:[#allocation5 + $0x6a0] ss:$16 sps:$4 sm:$0xff]   ;;  %v4912_v45 = vld [vmem:[#allocation5 + $0x484] ss:$16 sps:$4 sm:$0xff]  }
  0xa3   :  { %2282 = vmatprep.subr.bf16.mxu0 %v4864_v46  ;;  %2323 = vmatprep.subr.bf16.mxu1 %v4867_v47  ;;  %v4910_v46 = vld [vmem:[#allocation5 + $0x480] ss:$16 sps:$4 sm:$0xff]   ;;  %v4915_v47 = vld [vmem:[#allocation5 + $0x684] ss:$16 sps:$4 sm:$0xff]  }
  0xa6   :  { %2283 = vmatpush2.bf16.msra.mxu0 %v4862_v48  ;;  %2324 = vmatpush2.bf16.msra.mxu1 %v4865_v49  ;;  %v4913_v48 = vld [vmem:[#allocation5 + $0x680] ss:$16 sps:$4 sm:$0xff]   ;;  %v4918_v49 = vld [vmem:[#allocation5 + $0x464] ss:$16 sps:$4 sm:$0xff]  }
  0xa7   :  { %2284 = vmatprep.subr.bf16.mxu0 %v4870_v50  ;;  %2325 = vmatprep.subr.bf16.mxu1 %v4873_v51  ;;  %v4916_v50 = vld [vmem:[#allocation5 + $0x460] ss:$16 sps:$4 sm:$0xff]   ;;  %v4921_v51 = vld [vmem:[#allocation5 + $0x664] ss:$16 sps:$4 sm:$0xff]  }
  0xaa   :  { %2285 = vmatpush2.bf16.msra.mxu0 %v4868_v52  ;;  %2326 = vmatpush2.bf16.msra.mxu1 %v4871_v53  ;;  %v4919_v52 = vld [vmem:[#allocation5 + $0x660] ss:$16 sps:$4 sm:$0xff]   ;;  %v4924_v53 = vld [vmem:[#allocation5 + $0x444] ss:$16 sps:$4 sm:$0xff]  }
  0xab   :  { %2286 = vmatprep.subr.bf16.mxu0 %v4876_v54  ;;  %2327 = vmatprep.subr.bf16.mxu1 %v4879_v55  ;;  %v4927_v54 = vld [vmem:[#allocation5 + $0x644] ss:$16 sps:$4 sm:$0xff]   ;;  %v4922_v55 = vld [vmem:[#allocation5 + $0x440] ss:$16 sps:$4 sm:$0xff]  }
  0xae   :  { %2287 = vmatpush2.bf16.msra.mxu0 %v4874_v56  ;;  %2328 = vmatpush2.bf16.msra.mxu1 %v4877_v57  ;;  %v184_v56 = vsub.s32 5, %v5695_v6  ;;  %v4925_v57 = vld [vmem:[#allocation5 + $0x640] ss:$16 sps:$4 sm:$0xff]  }
  0xaf   :  { %2288 = vmatprep.subr.bf16.mxu0 %v4882_v58  ;;  %2329 = vmatprep.subr.bf16.mxu1 %v4885_v59  ;;  %v4930_v58 = vld [vmem:[#allocation5 + $0x424] ss:$16 sps:$4 sm:$0xff]   ;;  %v192_v59 = vsub.s32 7, %v5695_v6 }
  0xb2   :  { %2289 = vmatpush2.bf16.msra.mxu0 %v4880_v60  ;;  %2330 = vmatpush2.bf16.msra.mxu1 %v4883_v61  ;;  %v4933_v60 = vld [vmem:[#allocation5 + $0x624] ss:$16 sps:$4 sm:$0xff]   ;;  %v4928_v61 = vld [vmem:[#allocation5 + $0x420] ss:$16 sps:$4 sm:$0xff]  }
  0xb3   :  { %2290 = vmatprep.subr.bf16.mxu0 %v4888_v62  ;;  %2331 = vmatprep.subr.bf16.mxu1 %v4891_v63  ;;  %v185_v62 = vrot.slane %v5700_v7, %v184_v56  ;;  %v4931_v63 = vld [vmem:[#allocation5 + $0x620] ss:$16 sps:$4 sm:$0xff]  }
  0xb4   :  { %v4973_v56 = vld [vmem:[#allocation5 + $0x740] ss:$16 sps:$4 sm:$0xff]  }
  0xb6   :  { %2291 = vmatpush2.bf16.msra.mxu0 %v4886_v1  ;;  %2332 = vmatpush2.bf16.msra.mxu1 %v4889_v2  ;;  %v4936_v1 = vld [vmem:[#allocation5 + $0x404] ss:$16 sps:$4 sm:$0xff]  }
  0xb7   :  { %2342 = vmatprep.subr.bf16.mxu0 %v4894_v3  ;;  %2383 = vmatprep.subr.bf16.mxu1 %v4897_v4  ;;  %v193_v3 = vrot.slane %v5700_v7, %v192_v59  ;;  %v4939_v4 = vld [vmem:[#allocation5 + $0x604] ss:$16 sps:$4 sm:$0xff]  }
 0x119   :  { %v556_v16 = vpop.f32.mrf.mxu0  ;;  %v597_v19 = vpop.f32.mrf.mxu1 }
 0x11a   :  { %v557_v18 = vadd.f32 %v556_v16, %v165_v13  ;;  %v598_v20 = vadd.f32 %v597_v19, %v173_v14  ;;  %v4934_v14 = vld [vmem:[#allocation5 + $0x400] ss:$16 sps:$4 sm:$0xff]  }
 0x11b   :  { %v558_v21 = vpop.f32.mrf.mxu0  ;;  %v599_v22 = vpop.f32.mrf.mxu1 }
 0x11c   :  { %v559_v12 = vadd.f32 %v558_v21, %v169_v15  ;;  %v686_v23 = vmax.f32 %v557_v18, 0.0  ;;  %v688_v24 = vmax.f32 %v598_v20, 0.0  ;;  %v600_v25 = vadd.f32 %v599_v22, %v177_v17  ;;  %v4937_v17 = vld [vmem:[#allocation5 + $0x600] ss:$16 sps:$4 sm:$0xff]   ;;  %v4942_v18 = vld [vmem:[#allocation5 + $0x5e4] ss:$16 sps:$4 sm:$0xff]  }
 0x11d   :  { %v560_v26 = vpop.f32.mrf.mxu0  ;;  %v601_v28 = vpop.f32.mrf.mxu1  ;;  %v4945_v21 = vld [vmem:[#allocation5 + $0x7e4] ss:$16 sps:$4 sm:$0xff]  }
 0x11e   :  { %v687_v27 = vmax.f32 %v559_v12, 0.0  ;;  %v689_v30 = vmax.f32 %v600_v25, 0.0  ;;  %v5722_v34 = vpack.c.bf16 %v688_v24, %v688_v24  ;;  %v5726_v38 = vpack.c.bf16 %v686_v23, %v686_v23  ;;  %v4940_v25 = vld [vmem:[#allocation5 + $0x5e0] ss:$16 sps:$4 sm:$0xff]  }
 0x11f   :  { %v561_v31 = vpop.f32.mrf.mxu0  ;;  %v602_v36 = vpop.f32.mrf.mxu1  ;;  %v4943_v28 = vld [vmem:[#allocation5 + $0x7e0] ss:$16 sps:$4 sm:$0xff]  }
 0x120   :  { %v5724_v35 = vpack.c.bf16 %v687_v27, %v687_v27  ;;  %v5728_v39 = vpack.c.bf16 %v689_v30, %v689_v30  ;;  %v4951_v31 = vld [vmem:[#allocation5 + $0x7c4] ss:$16 sps:$4 sm:$0xff]  }
 0x121   :  { %v4954_v36 = vld [vmem:[#allocation5 + $0x5a4] ss:$16 sps:$4 sm:$0xff]  }
 0x122   :  { %2292 = vmatprep.mubr.bf16.mxu0 %v5724_v35  ;;  %2333 = vmatprep.mubr.bf16.mxu1 %v5728_v39 }
 0x123   :  { %2293 = vmatmul.mubr.bf16.vlgmr.msra.gmra.mxu0 %v5726_v38  ;;  %2334 = vmatmul.mubr.bf16.vlgmr.msra.gmra.mxu1 %v5722_v34 }
 0x124   :  { %2343 = vmatpush1.bf16.msra.mxu0 %v4892_v29  ;;  %2384 = vmatpush1.bf16.msra.mxu1 %v4895_v32  ;;  %v4948_v29 = vld [vmem:[#allocation5 + $0x5c4] ss:$16 sps:$4 sm:$0xff]   ;;  %v4946_v32 = vld [vmem:[#allocation5 + $0x5c0] ss:$16 sps:$4 sm:$0xff]  }
 0x125   :  { %2344 = vmatprep.subr.bf16.mxu0 %v4900_v33  ;;  %2385 = vmatprep.subr.bf16.mxu1 %v4903_v37  ;;  %v4949_v33 = vld [vmem:[#allocation5 + $0x7c0] ss:$16 sps:$4 sm:$0xff]   ;;  %v4957_v37 = vld [vmem:[#allocation5 + $0x7a4] ss:$16 sps:$4 sm:$0xff]  }
 0x128   :  { %2345 = vmatpush1.bf16.msra.mxu0 %v4898_v40  ;;  %2386 = vmatpush1.bf16.msra.mxu1 %v4901_v0  ;;  %v4952_v40 = vld [vmem:[#allocation5 + $0x5a0] ss:$16 sps:$4 sm:$0xff]  }
 0x129   :  { %2346 = vmatprep.subr.bf16.mxu0 %v4906_v41  ;;  %2387 = vmatprep.subr.bf16.mxu1 %v4909_v42  ;;  %v4955_v0 = vld [vmem:[#allocation5 + $0x7a0] ss:$16 sps:$4 sm:$0xff]   ;;  %v4960_v41 = vld [vmem:[#allocation5 + $0x584] ss:$16 sps:$4 sm:$0xff]  }
 0x12a   :  { %v4963_v42 = vld [vmem:[#allocation5 + $0x784] ss:$16 sps:$4 sm:$0xff]  }
 0x12c   :  { %2347 = vmatpush1.bf16.msra.mxu0 %v4904_v43  ;;  %2388 = vmatpush1.bf16.msra.mxu1 %v4907_v44  ;;  %v4958_v43 = vld [vmem:[#allocation5 + $0x580] ss:$16 sps:$4 sm:$0xff]  }
 0x12d   :  { %2348 = vmatprep.subr.bf16.mxu0 %v4912_v45  ;;  %2389 = vmatprep.subr.bf16.mxu1 %v4915_v47  ;;  %v4961_v44 = vld [vmem:[#allocation5 + $0x780] ss:$16 sps:$4 sm:$0xff]   ;;  %v4966_v45 = vld [vmem:[#allocation5 + $0x564] ss:$16 sps:$4 sm:$0xff]  }
 0x12e   :  { %v4964_v47 = vld [vmem:[#allocation5 + $0x560] ss:$16 sps:$4 sm:$0xff]  }
 0x130   :  { %2349 = vmatpush1.bf16.msra.mxu0 %v4910_v46  ;;  %2390 = vmatpush1.bf16.msra.mxu1 %v4913_v48  ;;  %v4969_v46 = vld [vmem:[#allocation5 + $0x764] ss:$16 sps:$4 sm:$0xff]   ;;  %v188_v48 = vsub.s32 6, %v5695_v6 }
 0x131   :  { %2350 = vmatprep.subr.bf16.mxu0 %v4918_v49  ;;  %2391 = vmatprep.subr.bf16.mxu1 %v4921_v51  ;;  %v4967_v49 = vld [vmem:[#allocation5 + $0x760] ss:$16 sps:$4 sm:$0xff]   ;;  %v4972_v51 = vld [vmem:[#allocation5 + $0x544] ss:$16 sps:$4 sm:$0xff]  }
 0x134   :  { %2351 = vmatpush1.bf16.msra.mxu0 %v4916_v50  ;;  %2392 = vmatpush1.bf16.msra.mxu1 %v4919_v52  ;;  %v180_v50 = vsub.s32 4, %v5695_v6  ;;  %v4975_v52 = vld [vmem:[#allocation5 + $0x744] ss:$16 sps:$4 sm:$0xff]  }
 0x135   :  { %2352 = vmatprep.subr.bf16.mxu0 %v4924_v53  ;;  %2393 = vmatprep.subr.bf16.mxu1 %v4927_v54  ;;  %v189_v53 = vrot.slane %v5700_v7, %v188_v48  ;;  %v4970_v54 = vld [vmem:[#allocation5 + $0x540] ss:$16 sps:$4 sm:$0xff]   ;;  %v5041_v48 = vld [vmem:[#allocation5 + $0x3ec] ss:$16 sps:$4 sm:$0xff]  }
 0x138   :  { %2353 = vmatpush1.bf16.msra.mxu0 %v4922_v55  ;;  %2394 = vmatpush1.bf16.msra.mxu1 %v4925_v57  ;;  %v181_v55 = vrot.slane %v5700_v7, %v180_v50  ;;  %v4978_v57 = vld [vmem:[#allocation5 + $0x524] ss:$16 sps:$4 sm:$0xff]   ;;  %v4982_v7 = vld [vmem:[#allocation5 + $0x500] ss:$16 sps:$4 sm:$0xff]   ;;  %v5039_v50 = vld [vmem:[#allocation5 + $0x3e8] ss:$16 sps:$4 sm:$0xff]  }
 0x139   :  { %2354 = vmatprep.subr.bf16.mxu0 %v4930_v58  ;;  %v5737_v2 = vpop.f32.mrf.mxu0  ;;  %2395 = vmatprep.subr.bf16.mxu1 %v4933_v60  ;;  %v5740_v5 = vpop.f32.mrf.mxu1  ;;  %v4981_v58 = vld [vmem:[#allocation5 + $0x724] ss:$16 sps:$4 sm:$0xff]   ;;  %v4976_v60 = vld [vmem:[#allocation5 + $0x520] ss:$16 sps:$4 sm:$0xff]  }
 0x13a   :  { %v680_v59 = vadd.f32 %v5740_v5, %v189_v53  ;;  %v639_v6 = vadd.f32 %v5737_v2, %v181_v55  ;;  %v4993_v5 = vld [vmem:[#allocation5 + $0x2ec] ss:$16 sps:$4 sm:$0xff]   ;;  %v4988_v2 = vld [vmem:[#allocation5 + $0xe8] ss:$16 sps:$4 sm:$0xff]  }
 0x13b   :  { %v640_v13 = vpop.f32.mrf.mxu0  ;;  %v681_v16 = vpop.f32.mrf.mxu1  ;;  %v5042_v53 = vld [vmem:[#allocation5 + $0x1c8] ss:$16 sps:$4 sm:$0xff]   ;;  %v5050_v55 = vld [vmem:[#allocation5 + $0x1ac] ss:$16 sps:$4 sm:$0xff]  }
 0x13c   :  { %2355 = vmatpush1.bf16.msra.mxu0 %v4928_v61  ;;  %v641_v15 = vadd.f32 %v640_v13, %v185_v62  ;;  %2396 = vmatpush1.bf16.msra.mxu1 %v4931_v63  ;;  %v682_v20 = vadd.f32 %v681_v16, %v193_v3  ;;  %v4979_v61 = vld [vmem:[#allocation5 + $0x720] ss:$16 sps:$4 sm:$0xff]   ;;  %v4984_v62 = vld [vmem:[#allocation5 + $0x504] ss:$16 sps:$4 sm:$0xff]   ;;  %v690_v3 = vmax.f32 %v639_v6, 0.0 }
 0x13d   :  { %2356 = vmatprep.subr.bf16.mxu0 %v4936_v1  ;;  %v642_v19 = vpop.f32.mrf.mxu0  ;;  %2397 = vmatprep.subr.bf16.mxu1 %v4939_v4  ;;  %v683_v22 = vpop.f32.mrf.mxu1  ;;  %v4987_v63 = vld [vmem:[#allocation5 + $0x704] ss:$16 sps:$4 sm:$0xff]   ;;  %v692_v1 = vmax.f32 %v680_v59, 0.0  ;;  %v4985_v4 = vld [vmem:[#allocation5 + $0x700] ss:$16 sps:$4 sm:$0xff]  }
 0x13e   :  { %v691_v12 = vmax.f32 %v641_v15, 0.0  ;;  %v693_v23 = vmax.f32 %v682_v20, 0.0  ;;  %v4990_v13 = vld [vmem:[#allocation5 + $0xec] ss:$16 sps:$4 sm:$0xff]   ;;  %v5756_v15 = vpack.c.bf16 %v690_v3, %v690_v3  ;;  %v4991_v16 = vld [vmem:[#allocation5 + $0x2e8] ss:$16 sps:$4 sm:$0xff]  }
 0x13f   :  { %v643_v24 = vpop.f32.mrf.mxu0  ;;  %v684_v27 = vpop.f32.mrf.mxu1  ;;  %v4994_v19 = vld [vmem:[#allocation5 + $0xc8] ss:$16 sps:$4 sm:$0xff]   ;;  %v5056_v59 = vld [vmem:[#allocation5 + $0x18c] ss:$16 sps:$4 sm:$0xff]  }
 0x140   :  { %2357 = vmatpush1.bf16.msra.mxu0 %v4934_v14  ;;  %v5742_v26 = vpack.c.bf16 %v691_v12, %v691_v12  ;;  %2398 = vmatpush1.bf16.msra.mxu1 %v4937_v17  ;;  %v5744_v30 = vpack.c.bf16 %v693_v23, %v693_v23  ;;  %v5754_v14 = vpack.c.bf16 %v692_v1, %v692_v1  ;;  %v4996_v17 = vld [vmem:[#allocation5 + $0xcc] ss:$16 sps:$4 sm:$0xff]   ;;  %v4997_v20 = vld [vmem:[#allocation5 + $0x2c8] ss:$16 sps:$4 sm:$0xff]  }
 0x141   :  { %2358 = vmatprep.subr.bf16.mxu0 %v4942_v18  ;;  %2399 = vmatprep.subr.bf16.mxu1 %v4945_v21  ;;  %v4999_v18 = vld [vmem:[#allocation5 + $0x2cc] ss:$16 sps:$4 sm:$0xff]   ;;  %v5000_v22 = vld [vmem:[#allocation5 + $0xa8] ss:$16 sps:$4 sm:$0xff]  }
 0x142   :  { %2374 = vmatprep.mubr.bf16.mxu0 %v5742_v26  ;;  %2415 = vmatprep.mubr.bf16.mxu1 %v5744_v30  ;;  %v5002_v21 = vld [vmem:[#allocation5 + $0xac] ss:$16 sps:$4 sm:$0xff]   ;;  %v5003_v23 = vld [vmem:[#allocation5 + $0x2a8] ss:$16 sps:$4 sm:$0xff]  }
 0x143   :  { %v5005_v12 = vld [vmem:[#allocation5 + $0x2ac] ss:$16 sps:$4 sm:$0xff]   ;;  %v5006_v27 = vld [vmem:[#allocation5 + $0x88] ss:$16 sps:$4 sm:$0xff]  }
 0x144   :  { %2359 = vmatpush2.bf16.msra.mxu0 %v4940_v25  ;;  %2400 = vmatpush2.bf16.msra.mxu1 %v4943_v28  ;;  %v5008_v24 = vld [vmem:[#allocation5 + $0x8c] ss:$16 sps:$4 sm:$0xff]   ;;  %v5054_v6 = vld [vmem:[#allocation5 + $0x188] ss:$16 sps:$4 sm:$0xff]  }
 0x145   :  { %2360 = vmatprep.subr.bf16.mxu0 %v4948_v29  ;;  %2401 = vmatprep.subr.bf16.mxu1 %v4951_v31  ;;  %v5011_v25 = vld [vmem:[#allocation5 + $0x28c] ss:$16 sps:$4 sm:$0xff]   ;;  %v5015_v31 = vld [vmem:[#allocation5 + $0x268] ss:$16 sps:$4 sm:$0xff]  }
 0x146   :  { %v5014_v28 = vld [vmem:[#allocation5 + $0x6c] ss:$16 sps:$4 sm:$0xff]   ;;  %v5060_v1 = vld [vmem:[#allocation5 + $0x168] ss:$16 sps:$4 sm:$0xff]  }
 0x147   :  { %v5017_v29 = vld [vmem:[#allocation5 + $0x26c] ss:$16 sps:$4 sm:$0xff]  }
 0x148   :  { %2361 = vmatpush2.bf16.msra.mxu0 %v4946_v32  ;;  %2402 = vmatpush2.bf16.msra.mxu1 %v4949_v33  ;;  %v5020_v32 = vld [vmem:[#allocation5 + $0x4c] ss:$16 sps:$4 sm:$0xff]  }
 0x149   :  { %2362 = vmatprep.subr.bf16.mxu0 %v4954_v36  ;;  %2403 = vmatprep.subr.bf16.mxu1 %v4957_v37  ;;  %v5023_v33 = vld [vmem:[#allocation5 + $0x24c] ss:$16 sps:$4 sm:$0xff]   ;;  %v5018_v36 = vld [vmem:[#allocation5 + $0x48] ss:$16 sps:$4 sm:$0xff]  }
 0x14a   :  { %v5021_v37 = vld [vmem:[#allocation5 + $0x248] ss:$16 sps:$4 sm:$0xff]   ;;  %v5068_v3 = vld [vmem:[#allocation5 + $0x14c] ss:$16 sps:$4 sm:$0xff]  }
 0x14c   :  { %2363 = vmatpush2.bf16.msra.mxu0 %v4952_v40  ;;  %2404 = vmatpush2.bf16.msra.mxu1 %v4955_v0  ;;  %v5026_v40 = vld [vmem:[#allocation5 + $0x2c] ss:$16 sps:$4 sm:$0xff]  }
 0x14d   :  { %2364 = vmatprep.subr.bf16.mxu0 %v4960_v41  ;;  %2405 = vmatprep.subr.bf16.mxu1 %v4963_v42  ;;  %v5029_v0 = vld [vmem:[#allocation5 + $0x22c] ss:$16 sps:$4 sm:$0xff]   ;;  %v5024_v41 = vld [vmem:[#allocation5 + $0x28] ss:$16 sps:$4 sm:$0xff]  }
 0x14e   :  { %v5027_v42 = vld [vmem:[#allocation5 + $0x228] ss:$16 sps:$4 sm:$0xff]  }
 0x150   :  { %2365 = vmatpush2.bf16.msra.mxu0 %v4958_v43  ;;  %2406 = vmatpush2.bf16.msra.mxu1 %v4961_v44  ;;  %v5032_v43 = vld [vmem:[#allocation5 + $0xc] ss:$16 sps:$4 sm:$0xff]  }
 0x151   :  { %2366 = vmatprep.subr.bf16.mxu0 %v4966_v45  ;;  %2407 = vmatprep.subr.bf16.mxu1 %v4969_v46  ;;  %v5035_v44 = vld [vmem:[#allocation5 + $0x20c] ss:$16 sps:$4 sm:$0xff]   ;;  %v5030_v45 = vld [vmem:[#allocation5 + $0x8] ss:$16 sps:$4 sm:$0xff]  }
 0x152   :  { %v5033_v46 = vld [vmem:[#allocation5 + $0x208] ss:$16 sps:$4 sm:$0xff]  }
 0x154   :  { %2367 = vmatpush2.bf16.msra.mxu0 %v4964_v47  ;;  %2408 = vmatpush2.bf16.msra.mxu1 %v4967_v49  ;;  %v5038_v47 = vld [vmem:[#allocation5 + $0x1ec] ss:$16 sps:$4 sm:$0xff]   ;;  %v5036_v49 = vld [vmem:[#allocation5 + $0x1e8] ss:$16 sps:$4 sm:$0xff]  }
 0x155   :  { %2368 = vmatprep.subr.bf16.mxu0 %v4972_v51  ;;  %2409 = vmatprep.subr.bf16.mxu1 %v4975_v52  ;;  %v5044_v51 = vld [vmem:[#allocation5 + $0x1cc] ss:$16 sps:$4 sm:$0xff]  }
 0x156   :  { %v5047_v52 = vld [vmem:[#allocation5 + $0x3cc] ss:$16 sps:$4 sm:$0xff]  }
 0x158   :  { %2369 = vmatpush2.bf16.msra.mxu0 %v4970_v54  ;;  %2410 = vmatpush2.bf16.msra.mxu1 %v4973_v56  ;;  %v5045_v54 = vld [vmem:[#allocation5 + $0x3c8] ss:$16 sps:$4 sm:$0xff]   ;;  %v5053_v56 = vld [vmem:[#allocation5 + $0x3ac] ss:$16 sps:$4 sm:$0xff]  }
 0x159   :  { %2370 = vmatprep.subr.bf16.mxu0 %v4978_v57  ;;  %2411 = vmatprep.subr.bf16.mxu1 %v4981_v58  ;;  %v5048_v57 = vld [vmem:[#allocation5 + $0x1a8] ss:$16 sps:$4 sm:$0xff]  }
 0x15a   :  { %v5051_v58 = vld [vmem:[#allocation5 + $0x3a8] ss:$16 sps:$4 sm:$0xff]  }
 0x15c   :  { %2371 = vmatpush2.bf16.msra.mxu0 %v4976_v60  ;;  %2412 = vmatpush2.bf16.msra.mxu1 %v4979_v61  ;;  %v5059_v60 = vld [vmem:[#allocation5 + $0x38c] ss:$16 sps:$4 sm:$0xff]   ;;  %v5057_v61 = vld [vmem:[#allocation5 + $0x388] ss:$16 sps:$4 sm:$0xff]  }
 0x15d   :  { %2372 = vmatprep.subr.bf16.mxu0 %v4984_v62  ;;  %2413 = vmatprep.subr.bf16.mxu1 %v4987_v63  ;;  %v5062_v62 = vld [vmem:[#allocation5 + $0x16c] ss:$16 sps:$4 sm:$0xff]  }
 0x15e   :  { %v5065_v63 = vld [vmem:[#allocation5 + $0x36c] ss:$16 sps:$4 sm:$0xff]  }
 0x160   :  { %2373 = vmatpush2.bf16.msra.mxu0 %v4982_v7  ;;  %2414 = vmatpush2.bf16.msra.mxu1 %v4985_v4  ;;  %v5063_v7 = vld [vmem:[#allocation5 + $0x368] ss:$16 sps:$4 sm:$0xff]   ;;  %v5071_v4 = vld [vmem:[#allocation5 + $0x34c] ss:$16 sps:$4 sm:$0xff]  }
 0x161   :  { %2424 = vmatprep.subr.bf16.mxu0 %v4990_v13  ;;  %2465 = vmatprep.subr.bf16.mxu1 %v4993_v5  ;;  %v5066_v13 = vld [vmem:[#allocation5 + $0x148] ss:$16 sps:$4 sm:$0xff]  }
 0x162   :  { %v5069_v5 = vld [vmem:[#allocation5 + $0x348] ss:$16 sps:$4 sm:$0xff]  }
 0x163   :  { %2375 = vmatmul.mubr.bf16.vlgmr.msra.gmra.mxu0 %v5756_v15  ;;  %2416 = vmatmul.mubr.bf16.vlgmr.msra.gmra.mxu1 %v5754_v14 }
 0x164   :  { %2425 = vmatpush1.bf16.msra.mxu0 %v4988_v2  ;;  %2456 = vmatprep.mubr.bf16.mxu0 %v5724_v35  ;;  %v5009_v35 = vld [vmem:[#allocation5 + $0x288] ss:$16 sps:$4 sm:$0xff]   ;;  %v5074_v2 = vld [vmem:[#allocation5 + $0x12c] ss:$16 sps:$4 sm:$0xff]  }
 0x165   :  { %2466 = vmatpush1.bf16.msra.mxu1 %v4991_v16  ;;  %2497 = vmatprep.mubr.bf16.mxu1 %v5728_v39  ;;  %v5012_v39 = vld [vmem:[#allocation5 + $0x68] ss:$16 sps:$4 sm:$0xff]   ;;  %v5077_v16 = vld [vmem:[#allocation5 + $0x32c] ss:$16 sps:$4 sm:$0xff]  }
 0x166   :  { %2426 = vmatprep.subr.bf16.mxu0 %v4996_v17  ;;  %2467 = vmatprep.subr.bf16.mxu1 %v4999_v18  ;;  %v5072_v17 = vld [vmem:[#allocation5 + $0x128] ss:$16 sps:$4 sm:$0xff]  }
 0x167   :  { %v5075_v18 = vld [vmem:[#allocation5 + $0x328] ss:$16 sps:$4 sm:$0xff]  }
 0x168   :  { %2427 = vmatpush1.bf16.msra.mxu0 %v4994_v19  ;;  %v5080_v19 = vld [vmem:[#allocation5 + $0x10c] ss:$16 sps:$4 sm:$0xff]  }
 0x169   :  { %2468 = vmatpush1.bf16.msra.mxu1 %v4997_v20  ;;  %2428 = vmatprep.subr.bf16.mxu0 %v5002_v21  ;;  %v5083_v20 = vld [vmem:[#allocation5 + $0x30c] ss:$16 sps:$4 sm:$0xff]   ;;  %v5078_v21 = vld [vmem:[#allocation5 + $0x108] ss:$16 sps:$4 sm:$0xff]  }
 0x16a   :  { %2469 = vmatprep.subr.bf16.mxu1 %v5005_v12  ;;  %v5081_v12 = vld [vmem:[#allocation5 + $0x308] ss:$16 sps:$4 sm:$0xff]  }
 0x16c   :  { %2429 = vmatpush1.bf16.msra.mxu0 %v5000_v22  ;;  %v5086_v22 = vld [vmem:[#allocation5 + $0x4ec] ss:$16 sps:$4 sm:$0xff]  }
 0x16d   :  { %2470 = vmatpush1.bf16.msra.mxu1 %v5003_v23  ;;  %2430 = vmatprep.subr.bf16.mxu0 %v5008_v24  ;;  %v5089_v23 = vld [vmem:[#allocation5 + $0x6ec] ss:$16 sps:$4 sm:$0xff]   ;;  %v5084_v24 = vld [vmem:[#allocation5 + $0x4e8] ss:$16 sps:$4 sm:$0xff]  }
 0x16e   :  { %2471 = vmatprep.subr.bf16.mxu1 %v5011_v25  ;;  %v5087_v25 = vld [vmem:[#allocation5 + $0x6e8] ss:$16 sps:$4 sm:$0xff]  }
 0x170   :  { %2431 = vmatpush1.bf16.msra.mxu0 %v5006_v27  ;;  %v5092_v27 = vld [vmem:[#allocation5 + $0x4cc] ss:$16 sps:$4 sm:$0xff]  }
 0x171   :  { %2472 = vmatpush1.bf16.msra.mxu1 %v5009_v35  ;;  %2432 = vmatprep.subr.bf16.mxu0 %v5014_v28  ;;  %v5095_v35 = vld [vmem:[#allocation5 + $0x6cc] ss:$16 sps:$4 sm:$0xff]   ;;  %v5090_v28 = vld [vmem:[#allocation5 + $0x4c8] ss:$16 sps:$4 sm:$0xff]  }
 0x172   :  { %2473 = vmatprep.subr.bf16.mxu1 %v5017_v29  ;;  %v5093_v29 = vld [vmem:[#allocation5 + $0x6c8] ss:$16 sps:$4 sm:$0xff]  }
 0x174   :  { %2433 = vmatpush1.bf16.msra.mxu0 %v5012_v39  ;;  %v5098_v39 = vld [vmem:[#allocation5 + $0x4ac] ss:$16 sps:$4 sm:$0xff]  }
 0x175   :  { %2474 = vmatpush1.bf16.msra.mxu1 %v5015_v31  ;;  %2434 = vmatprep.subr.bf16.mxu0 %v5020_v32  ;;  %v5101_v31 = vld [vmem:[#allocation5 + $0x6ac] ss:$16 sps:$4 sm:$0xff]   ;;  %v5096_v32 = vld [vmem:[#allocation5 + $0x4a8] ss:$16 sps:$4 sm:$0xff]  }
 0x176   :  { %2475 = vmatprep.subr.bf16.mxu1 %v5023_v33  ;;  %v5104_v33 = vld [vmem:[#allocation5 + $0x48c] ss:$16 sps:$4 sm:$0xff]  }
 0x178   :  { %2435 = vmatpush1.bf16.msra.mxu0 %v5018_v36  ;;  %v5102_v36 = vld [vmem:[#allocation5 + $0x488] ss:$16 sps:$4 sm:$0xff]  }
 0x179   :  { %2476 = vmatpush1.bf16.msra.mxu1 %v5021_v37  ;;  %2436 = vmatprep.subr.bf16.mxu0 %v5026_v40  ;;  %v5110_v37 = vld [vmem:[#allocation5 + $0x46c] ss:$16 sps:$4 sm:$0xff]  }
 0x17a   :  { %2477 = vmatprep.subr.bf16.mxu1 %v5029_v0  ;;  %v5113_v40 = vld [vmem:[#allocation5 + $0x66c] ss:$16 sps:$4 sm:$0xff]   ;;  %v5111_v0 = vld [vmem:[#allocation5 + $0x668] ss:$16 sps:$4 sm:$0xff]  }
 0x17c   :  { %2437 = vmatpush1.bf16.msra.mxu0 %v5024_v41  ;;  %v5116_v41 = vld [vmem:[#allocation5 + $0x44c] ss:$16 sps:$4 sm:$0xff]  }
 0x17d   :  { %2478 = vmatpush1.bf16.msra.mxu1 %v5027_v42  ;;  %2438 = vmatprep.subr.bf16.mxu0 %v5032_v43  ;;  %v5119_v42 = vld [vmem:[#allocation5 + $0x64c] ss:$16 sps:$4 sm:$0xff]   ;;  %v5114_v43 = vld [vmem:[#allocation5 + $0x448] ss:$16 sps:$4 sm:$0xff]  }
 0x17e   :  { %2479 = vmatprep.subr.bf16.mxu1 %v5035_v44  ;;  %v5117_v44 = vld [vmem:[#allocation5 + $0x648] ss:$16 sps:$4 sm:$0xff]  }
 0x180   :  { %2439 = vmatpush1.bf16.msra.mxu0 %v5030_v45  ;;  %v5122_v45 = vld [vmem:[#allocation5 + $0x42c] ss:$16 sps:$4 sm:$0xff]  }
 0x181   :  { %2480 = vmatpush1.bf16.msra.mxu1 %v5033_v46  ;;  %2440 = vmatprep.subr.bf16.mxu0 %v5038_v47  ;;  %v5125_v46 = vld [vmem:[#allocation5 + $0x62c] ss:$16 sps:$4 sm:$0xff]   ;;  %v5120_v47 = vld [vmem:[#allocation5 + $0x428] ss:$16 sps:$4 sm:$0xff]  }
 0x182   :  { %2481 = vmatprep.subr.bf16.mxu1 %v5041_v48  ;;  %v5123_v48 = vld [vmem:[#allocation5 + $0x628] ss:$16 sps:$4 sm:$0xff]  }
 0x184   :  { %2441 = vmatpush2.bf16.msra.mxu0 %v5036_v49  ;;  %v5128_v49 = vld [vmem:[#allocation5 + $0x40c] ss:$16 sps:$4 sm:$0xff]  }
 0x185   :  { %2482 = vmatpush2.bf16.msra.mxu1 %v5039_v50  ;;  %2442 = vmatprep.subr.bf16.mxu0 %v5044_v51  ;;  %v5131_v50 = vld [vmem:[#allocation5 + $0x60c] ss:$16 sps:$4 sm:$0xff]   ;;  %v5126_v51 = vld [vmem:[#allocation5 + $0x408] ss:$16 sps:$4 sm:$0xff]  }
 0x186   :  { %2483 = vmatprep.subr.bf16.mxu1 %v5047_v52  ;;  %v5129_v52 = vld [vmem:[#allocation5 + $0x608] ss:$16 sps:$4 sm:$0xff]  }
 0x188   :  { %2443 = vmatpush2.bf16.msra.mxu0 %v5042_v53  ;;  %v5134_v53 = vld [vmem:[#allocation5 + $0x5ec] ss:$16 sps:$4 sm:$0xff]  }
 0x189   :  { %2484 = vmatpush2.bf16.msra.mxu1 %v5045_v54  ;;  %2444 = vmatprep.subr.bf16.mxu0 %v5050_v55  ;;  %v5137_v54 = vld [vmem:[#allocation5 + $0x7ec] ss:$16 sps:$4 sm:$0xff]   ;;  %v5132_v55 = vld [vmem:[#allocation5 + $0x5e8] ss:$16 sps:$4 sm:$0xff]  }
 0x18a   :  { %2485 = vmatprep.subr.bf16.mxu1 %v5053_v56  ;;  %v5135_v56 = vld [vmem:[#allocation5 + $0x7e8] ss:$16 sps:$4 sm:$0xff]  }
 0x18c   :  { %2445 = vmatpush2.bf16.msra.mxu0 %v5048_v57  ;;  %v5140_v57 = vld [vmem:[#allocation5 + $0x5cc] ss:$16 sps:$4 sm:$0xff]  }
 0x18d   :  { %2486 = vmatpush2.bf16.msra.mxu1 %v5051_v58  ;;  %2446 = vmatprep.subr.bf16.mxu0 %v5056_v59  ;;  %v5143_v58 = vld [vmem:[#allocation5 + $0x7cc] ss:$16 sps:$4 sm:$0xff]   ;;  %v5138_v59 = vld [vmem:[#allocation5 + $0x5c8] ss:$16 sps:$4 sm:$0xff]  }
 0x18e   :  { %2487 = vmatprep.subr.bf16.mxu1 %v5059_v60  ;;  %v5141_v60 = vld [vmem:[#allocation5 + $0x7c8] ss:$16 sps:$4 sm:$0xff]  }
 0x190   :  { %2447 = vmatpush2.bf16.msra.mxu0 %v5054_v6  ;;  %v5146_v6 = vld [vmem:[#allocation5 + $0x5ac] ss:$16 sps:$4 sm:$0xff]  }
 0x191   :  { %2488 = vmatpush2.bf16.msra.mxu1 %v5057_v61  ;;  %2448 = vmatprep.subr.bf16.mxu0 %v5062_v62  ;;  %v5149_v61 = vld [vmem:[#allocation5 + $0x7ac] ss:$16 sps:$4 sm:$0xff]   ;;  %v5144_v62 = vld [vmem:[#allocation5 + $0x5a8] ss:$16 sps:$4 sm:$0xff]  }
 0x192   :  { %2489 = vmatprep.subr.bf16.mxu1 %v5065_v63  ;;  %v5147_v63 = vld [vmem:[#allocation5 + $0x7a8] ss:$16 sps:$4 sm:$0xff]  }
 0x194   :  { %2449 = vmatpush2.bf16.msra.mxu0 %v5060_v1  ;;  %v5152_v1 = vld [vmem:[#allocation5 + $0x58c] ss:$16 sps:$4 sm:$0xff]  }
 0x195   :  { %2490 = vmatpush2.bf16.msra.mxu1 %v5063_v7  ;;  %2450 = vmatprep.subr.bf16.mxu0 %v5068_v3  ;;  %v5155_v7 = vld [vmem:[#allocation5 + $0x78c] ss:$16 sps:$4 sm:$0xff]   ;;  %v5150_v3 = vld [vmem:[#allocation5 + $0x588] ss:$16 sps:$4 sm:$0xff]  }
 0x196   :  { %2491 = vmatprep.subr.bf16.mxu1 %v5071_v4  ;;  %v5153_v4 = vld [vmem:[#allocation5 + $0x788] ss:$16 sps:$4 sm:$0xff]  }
 0x198   :  { %2451 = vmatpush2.bf16.msra.mxu0 %v5066_v13  ;;  %v5158_v13 = vld [vmem:[#allocation5 + $0x56c] ss:$16 sps:$4 sm:$0xff]  }
 0x199   :  { %2492 = vmatpush2.bf16.msra.mxu1 %v5069_v5  ;;  %2452 = vmatprep.subr.bf16.mxu0 %v5074_v2  ;;  %v5161_v5 = vld [vmem:[#allocation5 + $0x76c] ss:$16 sps:$4 sm:$0xff]   ;;  %v5156_v2 = vld [vmem:[#allocation5 + $0x568] ss:$16 sps:$4 sm:$0xff]  }
 0x19a   :  { %2493 = vmatprep.subr.bf16.mxu1 %v5077_v16  ;;  %v5159_v16 = vld [vmem:[#allocation5 + $0x768] ss:$16 sps:$4 sm:$0xff]  }
 0x19c   :  { %2453 = vmatpush2.bf16.msra.mxu0 %v5072_v17  ;;  %v5164_v17 = vld [vmem:[#allocation5 + $0x54c] ss:$16 sps:$4 sm:$0xff]  }
 0x19d   :  { %2494 = vmatpush2.bf16.msra.mxu1 %v5075_v18  ;;  %2454 = vmatprep.subr.bf16.mxu0 %v5080_v19  ;;  %v5167_v18 = vld [vmem:[#allocation5 + $0x74c] ss:$16 sps:$4 sm:$0xff]   ;;  %v5162_v19 = vld [vmem:[#allocation5 + $0x548] ss:$16 sps:$4 sm:$0xff]  }
 0x19e   :  { %2495 = vmatprep.subr.bf16.mxu1 %v5083_v20  ;;  %v5165_v20 = vld [vmem:[#allocation5 + $0x748] ss:$16 sps:$4 sm:$0xff]  }
 0x1a0   :  { %2455 = vmatpush2.bf16.msra.mxu0 %v5078_v21  ;;  %v5170_v21 = vld [vmem:[#allocation5 + $0x52c] ss:$16 sps:$4 sm:$0xff]  }
 0x1a1   :  { %2496 = vmatpush2.bf16.msra.mxu1 %v5081_v12  ;;  %2506 = vmatprep.subr.bf16.mxu0 %v5086_v22  ;;  %v5173_v12 = vld [vmem:[#allocation5 + $0x72c] ss:$16 sps:$4 sm:$0xff]   ;;  %v5168_v22 = vld [vmem:[#allocation5 + $0x528] ss:$16 sps:$4 sm:$0xff]  }
 0x1a2   :  { %2547 = vmatprep.subr.bf16.mxu1 %v5089_v23  ;;  %v5171_v23 = vld [vmem:[#allocation5 + $0x728] ss:$16 sps:$4 sm:$0xff]  }
 0x1a3   :  { %2457 = vmatmul.mubr.bf16.vlgmr.msra.gmra.mxu0 %v5726_v38  ;;  %v5099_v38 = vld [vmem:[#allocation5 + $0x6a8] ss:$16 sps:$4 sm:$0xff]  }
 0x1a4   :  { %2498 = vmatmul.mubr.bf16.vlgmr.msra.gmra.mxu1 %v5722_v34  ;;  %2507 = vmatpush1.bf16.msra.mxu0 %v5084_v24  ;;  %v5107_v34 = vld [vmem:[#allocation5 + $0x68c] ss:$16 sps:$4 sm:$0xff]  }
 0x1a5   :  { %2538 = vmatprep.mubr.bf16.mxu0 %v5742_v26  ;;  %2548 = vmatpush1.bf16.msra.mxu1 %v5087_v25  ;;  %v5105_v26 = vld [vmem:[#allocation5 + $0x688] ss:$16 sps:$4 sm:$0xff]   ;;  %v5176_v24 = vld [vmem:[#allocation5 + $0x50c] ss:$16 sps:$4 sm:$0xff]  }
 0x1a6   :  { %2579 = vmatprep.mubr.bf16.mxu1 %v5744_v30  ;;  %2508 = vmatprep.subr.bf16.mxu0 %v5092_v27  ;;  %v5108_v30 = vld [vmem:[#allocation5 + $0x468] ss:$16 sps:$4 sm:$0xff]   ;;  %v5179_v25 = vld [vmem:[#allocation5 + $0x70c] ss:$16 sps:$4 sm:$0xff]  }
 0x1a7   :  { %2549 = vmatprep.subr.bf16.mxu1 %v5095_v35  ;;  %v5174_v27 = vld [vmem:[#allocation5 + $0x508] ss:$16 sps:$4 sm:$0xff]  }
 0x1a8   :  { %2509 = vmatpush1.bf16.msra.mxu0 %v5090_v28  ;;  %v5177_v35 = vld [vmem:[#allocation5 + $0x708] ss:$16 sps:$4 sm:$0xff]   ;;  %v5182_v28 = vld [vmem:[#allocation7 + $0xe4] ss:$16 sps:$4 sm:$0xff]  }
 0x1a9   :  { %2550 = vmatpush1.bf16.msra.mxu1 %v5093_v29  ;;  %2510 = vmatprep.subr.bf16.mxu0 %v5098_v39  ;;  %v5180_v29 = vld [vmem:[#allocation7 + $0xe0] ss:$16 sps:$4 sm:$0xff]   ;;  %v5185_v39 = vld [vmem:[#allocation7 + $0xc4] ss:$16 sps:$4 sm:$0xff]  }
 0x1aa   :  { %2551 = vmatprep.subr.bf16.mxu1 %v5101_v31 }
 0x1ac   :  { %2511 = vmatpush1.bf16.msra.mxu0 %v5096_v32 }
 0x1ad   :  { %2552 = vmatpush1.bf16.msra.mxu1 %v5099_v38  ;;  %2512 = vmatprep.subr.bf16.mxu0 %v5104_v33  ;;  %v5183_v38 = vld [vmem:[#allocation7 + $0xc0] ss:$16 sps:$4 sm:$0xff]  }
 0x1ae   :  { %2553 = vmatprep.subr.bf16.mxu1 %v5107_v34  ;;  %v5188_v34 = vld [vmem:[#allocation7 + $0xa4] ss:$16 sps:$4 sm:$0xff]  }
 0x1b0   :  { %2513 = vmatpush1.bf16.msra.mxu0 %v5102_v36 }
 0x1b1   :  { %2554 = vmatpush1.bf16.msra.mxu1 %v5105_v26  ;;  %2514 = vmatprep.subr.bf16.mxu0 %v5110_v37 }
 0x1b2   :  { %2555 = vmatprep.subr.bf16.mxu1 %v5113_v40  ;;  %v5186_v40 = vld [vmem:[#allocation7 + $0xa0] ss:$16 sps:$4 sm:$0xff]  }
 0x1b4   :  { %2515 = vmatpush1.bf16.msra.mxu0 %v5108_v30 }
 0x1b5   :  { %2556 = vmatpush1.bf16.msra.mxu1 %v5111_v0  ;;  %2516 = vmatprep.subr.bf16.mxu0 %v5116_v41  ;;  %v5276_v41 = vld [vmem:[#allocation7 + $0x2e0] ss:$16 sps:$4 sm:$0xff]  }
 0x1b6   :  { %2557 = vmatprep.subr.bf16.mxu1 %v5119_v42  ;;  %v5278_v42 = vld [vmem:[#allocation7 + $0x2e4] ss:$16 sps:$4 sm:$0xff]  }
 0x1b8   :  { %2517 = vmatpush1.bf16.msra.mxu0 %v5114_v43  ;;  %v5194_v43 = vld [vmem:[#allocation7 + $0x64] ss:$16 sps:$4 sm:$0xff]  }
 0x1b9   :  { %2558 = vmatpush1.bf16.msra.mxu1 %v5117_v44  ;;  %2518 = vmatprep.subr.bf16.mxu0 %v5122_v45  ;;  %v5279_v44 = vld [vmem:[#allocation7 + $0x2c0] ss:$16 sps:$4 sm:$0xff]   ;;  %v5281_v45 = vld [vmem:[#allocation7 + $0x2c4] ss:$16 sps:$4 sm:$0xff]  }
 0x1ba   :  { %2559 = vmatprep.subr.bf16.mxu1 %v5125_v46  ;;  %v5192_v46 = vld [vmem:[#allocation7 + $0x60] ss:$16 sps:$4 sm:$0xff]  }
 0x1bc   :  { %2519 = vmatpush1.bf16.msra.mxu0 %v5120_v47  ;;  %v5284_v47 = vld [vmem:[#allocation7 + $0x2a4] ss:$16 sps:$4 sm:$0xff]  }
 0x1bd   :  { %2560 = vmatpush1.bf16.msra.mxu1 %v5123_v48  ;;  %2520 = vmatprep.subr.bf16.mxu0 %v5128_v49  ;;  %v5197_v48 = vld [vmem:[#allocation7 + $0x44] ss:$16 sps:$4 sm:$0xff]   ;;  %v5282_v49 = vld [vmem:[#allocation7 + $0x2a0] ss:$16 sps:$4 sm:$0xff]  }
 0x1be   :  { %2561 = vmatprep.subr.bf16.mxu1 %v5131_v50  ;;  %v5195_v50 = vld [vmem:[#allocation7 + $0x40] ss:$16 sps:$4 sm:$0xff]  }
 0x1c0   :  { %2521 = vmatpush1.bf16.msra.mxu0 %v5126_v51  ;;  %v5287_v51 = vld [vmem:[#allocation7 + $0x284] ss:$16 sps:$4 sm:$0xff]  }
 0x1c1   :  { %2562 = vmatpush1.bf16.msra.mxu1 %v5129_v52  ;;  %2522 = vmatprep.subr.bf16.mxu0 %v5134_v53  ;;  %v5200_v52 = vld [vmem:[#allocation7 + $0x24] ss:$16 sps:$4 sm:$0xff]   ;;  %v5285_v53 = vld [vmem:[#allocation7 + $0x280] ss:$16 sps:$4 sm:$0xff]  }
 0x1c2   :  { %2563 = vmatprep.subr.bf16.mxu1 %v5137_v54  ;;  %v5198_v54 = vld [vmem:[#allocation7 + $0x20] ss:$16 sps:$4 sm:$0xff]  }
 0x1c4   :  { %2523 = vmatpush2.bf16.msra.mxu0 %v5132_v55  ;;  %v5290_v55 = vld [vmem:[#allocation7 + $0x264] ss:$16 sps:$4 sm:$0xff]  }
 0x1c5   :  { %2564 = vmatpush2.bf16.msra.mxu1 %v5135_v56  ;;  %2524 = vmatprep.subr.bf16.mxu0 %v5140_v57  ;;  %v5203_v56 = vld [vmem:[#allocation7 + $0x4] ss:$16 sps:$4 sm:$0xff]   ;;  %v5288_v57 = vld [vmem:[#allocation7 + $0x260] ss:$16 sps:$4 sm:$0xff]  }
 0x1c6   :  { %2565 = vmatprep.subr.bf16.mxu1 %v5143_v58  ;;  %v5201_v58 = vld [vmem:[#allocation7] ss:$16 sps:$4 sm:$0xff]  }
 0x1c8   :  { %2525 = vmatpush2.bf16.msra.mxu0 %v5138_v59  ;;  %v5293_v59 = vld [vmem:[#allocation7 + $0x244] ss:$16 sps:$4 sm:$0xff]  }
 0x1c9   :  { %2566 = vmatpush2.bf16.msra.mxu1 %v5141_v60  ;;  %2526 = vmatprep.subr.bf16.mxu0 %v5146_v6  ;;  %v5206_v60 = vld [vmem:[#allocation7 + $0x1e4] ss:$16 sps:$4 sm:$0xff]   ;;  %v5291_v6 = vld [vmem:[#allocation7 + $0x240] ss:$16 sps:$4 sm:$0xff]  }
 0x1ca   :  { %2567 = vmatprep.subr.bf16.mxu1 %v5149_v61  ;;  %v5204_v61 = vld [vmem:[#allocation7 + $0x1e0] ss:$16 sps:$4 sm:$0xff]  }
 0x1cc   :  { %2527 = vmatpush2.bf16.msra.mxu0 %v5144_v62  ;;  %v5296_v62 = vld [vmem:[#allocation7 + $0x224] ss:$16 sps:$4 sm:$0xff]  }
 0x1cd   :  { %2568 = vmatpush2.bf16.msra.mxu1 %v5147_v63  ;;  %2528 = vmatprep.subr.bf16.mxu0 %v5152_v1  ;;  %v5209_v63 = vld [vmem:[#allocation7 + $0x1c4] ss:$16 sps:$4 sm:$0xff]   ;;  %v5294_v1 = vld [vmem:[#allocation7 + $0x220] ss:$16 sps:$4 sm:$0xff]  }
 0x1ce   :  { %2569 = vmatprep.subr.bf16.mxu1 %v5155_v7  ;;  %v5207_v7 = vld [vmem:[#allocation7 + $0x1c0] ss:$16 sps:$4 sm:$0xff]  }
 0x1d0   :  { %2529 = vmatpush2.bf16.msra.mxu0 %v5150_v3  ;;  %v5299_v3 = vld [vmem:[#allocation7 + $0x204] ss:$16 sps:$4 sm:$0xff]  }
 0x1d1   :  { %2570 = vmatpush2.bf16.msra.mxu1 %v5153_v4  ;;  %2530 = vmatprep.subr.bf16.mxu0 %v5158_v13  ;;  %v5212_v4 = vld [vmem:[#allocation7 + $0x1a4] ss:$16 sps:$4 sm:$0xff]   ;;  %v5297_v13 = vld [vmem:[#allocation7 + $0x200] ss:$16 sps:$4 sm:$0xff]  }
 0x1d2   :  { %2571 = vmatprep.subr.bf16.mxu1 %v5161_v5  ;;  %v5210_v5 = vld [vmem:[#allocation7 + $0x1a0] ss:$16 sps:$4 sm:$0xff]  }
 0x1d4   :  { %2531 = vmatpush2.bf16.msra.mxu0 %v5156_v2  ;;  %v5302_v2 = vld [vmem:[#allocation7 + $0x3e4] ss:$16 sps:$4 sm:$0xff]  }
 0x1d5   :  { %2572 = vmatpush2.bf16.msra.mxu1 %v5159_v16  ;;  %2532 = vmatprep.subr.bf16.mxu0 %v5164_v17  ;;  %v5215_v16 = vld [vmem:[#allocation7 + $0x184] ss:$16 sps:$4 sm:$0xff]   ;;  %v5300_v17 = vld [vmem:[#allocation7 + $0x3e0] ss:$16 sps:$4 sm:$0xff]  }
 0x1d6   :  { %2573 = vmatprep.subr.bf16.mxu1 %v5167_v18  ;;  %v5213_v18 = vld [vmem:[#allocation7 + $0x180] ss:$16 sps:$4 sm:$0xff]  }
 0x1d8   :  { %2533 = vmatpush2.bf16.msra.mxu0 %v5162_v19  ;;  %v5305_v19 = vld [vmem:[#allocation7 + $0x3c4] ss:$16 sps:$4 sm:$0xff]  }
 0x1d9   :  { %2574 = vmatpush2.bf16.msra.mxu1 %v5165_v20  ;;  %2534 = vmatprep.subr.bf16.mxu0 %v5170_v21  ;;  %v5218_v20 = vld [vmem:[#allocation7 + $0x164] ss:$16 sps:$4 sm:$0xff]   ;;  %v5303_v21 = vld [vmem:[#allocation7 + $0x3c0] ss:$16 sps:$4 sm:$0xff]  }
 0x1da   :  { %2575 = vmatprep.subr.bf16.mxu1 %v5173_v12  ;;  %v5216_v12 = vld [vmem:[#allocation7 + $0x160] ss:$16 sps:$4 sm:$0xff]  }
 0x1dc   :  { %2535 = vmatpush2.bf16.msra.mxu0 %v5168_v22  ;;  %v5308_v22 = vld [vmem:[#allocation7 + $0x3a4] ss:$16 sps:$4 sm:$0xff]  }
 0x1dd   :  { %2576 = vmatpush2.bf16.msra.mxu1 %v5171_v23  ;;  %2536 = vmatprep.subr.bf16.mxu0 %v5176_v24  ;;  %v5221_v23 = vld [vmem:[#allocation7 + $0x144] ss:$16 sps:$4 sm:$0xff]   ;;  %v5306_v24 = vld [vmem:[#allocation7 + $0x3a0] ss:$16 sps:$4 sm:$0xff]  }
 0x1de   :  { %2577 = vmatprep.subr.bf16.mxu1 %v5179_v25  ;;  %v5219_v25 = vld [vmem:[#allocation7 + $0x140] ss:$16 sps:$4 sm:$0xff]  }
 0x1e0   :  { %2537 = vmatpush2.bf16.msra.mxu0 %v5174_v27  ;;  %v5311_v27 = vld [vmem:[#allocation7 + $0x384] ss:$16 sps:$4 sm:$0xff]  }
 0x1e1   :  { %2578 = vmatpush2.bf16.msra.mxu1 %v5177_v35  ;;  %3386 = vmatprep.subr.bf16.mxu0 %v5182_v28  ;;  %v5224_v35 = vld [vmem:[#allocation7 + $0x124] ss:$16 sps:$4 sm:$0xff]   ;;  %v5779_v28 = vld [vmem:[%s5877_s4] sm:$0xf] }
 0x1e2   :  { %3427 = vmatprep.subr.bf16.mxu1 %v5278_v42 }
 0x1e3   :  { %2539 = vmatmul.mubr.bf16.vlgmr.msra.gmra.mxu0 %v5756_v15  ;;  %v5767_v31 = vpop.f32.mrf.mxu0  ;;  %v5770_v32 = vpop.f32.mrf.mxu1  ;;  %v5191_v15 = vld [vmem:[#allocation7 + $0x84] ss:$16 sps:$4 sm:$0xff]  }
 0x1e4   :  { %2580 = vmatmul.mubr.bf16.vlgmr.msra.gmra.mxu1 %v5754_v14  ;;  %3387 = vmatpush1.bf16.msra.mxu0 %v5180_v29  ;;  %v5189_v14 = vld [vmem:[#allocation7 + $0x80] ss:$16 sps:$4 sm:$0xff]  }
 0x1e5   :  { %v5772_v33 = vpop.f32.mrf.mxu0  ;;  %3388 = vmatprep.subr.bf16.mxu0 %v5185_v39  ;;  %v5774_v36 = vpop.f32.mrf.mxu1  ;;  %3428 = vmatpush1.bf16.msra.mxu1 %v5276_v41  ;;  %v5309_v29 = vld [vmem:[#allocation7 + $0x380] ss:$16 sps:$4 sm:$0xff]  }
 0x1e6   :  { %3429 = vmatprep.subr.bf16.mxu1 %v5281_v45  ;;  %v5222_v39 = vld [vmem:[#allocation7 + $0x120] ss:$16 sps:$4 sm:$0xff]  }
 0x1e7   :  { %v2298_v26 = vpop.f32.mrf.mxu0  ;;  %v2339_v37 = vpop.f32.mrf.mxu1  ;;  %v5315_v41 = vld [vmem:[#allocation7 + $0x340] ss:$16 sps:$4 sm:$0xff]  }
 0x1e8   :  { %3389 = vmatpush1.bf16.msra.mxu0 %v5183_v38  ;;  %v5314_v38 = vld [vmem:[#allocation7 + $0x364] ss:$16 sps:$4 sm:$0xff]   ;;  %v963_v26 = vrot.slane %v5779_v28, %v5703_v8  ;;  %v5312_v37 = vld [vmem:[#allocation7 + $0x360] ss:$16 sps:$4 sm:$0xff]  }
 0x1e9   :  { %v2299_v30 = vpop.f32.mrf.mxu0  ;;  %3390 = vmatprep.subr.bf16.mxu0 %v5188_v34  ;;  %v2340_v0 = vpop.f32.mrf.mxu1  ;;  %3430 = vmatpush1.bf16.msra.mxu1 %v5279_v44  ;;  %v5227_v34 = vld [vmem:[#allocation7 + $0x104] ss:$16 sps:$4 sm:$0xff]  }
 0x1ea   :  { %3431 = vmatprep.subr.bf16.mxu1 %v5284_v47  ;;  %v5225_v30 = vld [vmem:[#allocation7 + $0x100] ss:$16 sps:$4 sm:$0xff]   ;;  %v5230_v0 = vld [vmem:[#allocation7 + $0xec] ss:$16 sps:$4 sm:$0xff]  }
 0x1ec   :  { %3391 = vmatpush1.bf16.msra.mxu0 %v5186_v40  ;;  %v967_v40 = vrot.slane %v5779_v28, %v5709_v10 }
 0x1ed   :  { %3392 = vmatprep.subr.bf16.mxu0 %v5191_v15  ;;  %3432 = vmatpush1.bf16.msra.mxu1 %v5282_v49  ;;  %v5317_v15 = vld [vmem:[#allocation7 + $0x344] ss:$16 sps:$4 sm:$0xff]  }
 0x1ee   :  { %3433 = vmatprep.subr.bf16.mxu1 %v5287_v51  ;;  %v2297_v42 = vadd.f32 %v5772_v33, %v967_v40 }
 0x1f0   :  { %3393 = vmatpush1.bf16.msra.mxu0 %v5189_v14  ;;  %v2295_v14 = vadd.f32 %v5767_v31, %v963_v26  ;;  %v2338_v45 = vadd.f32 %v5774_v36, %v2297_v42  ;;  %v5320_v31 = vld [vmem:[#allocation7 + $0x324] ss:$16 sps:$4 sm:$0xff]   ;;  %v5272_v26 = vld [vmem:[#allocation7 + $0x12c] ss:$16 sps:$4 sm:$0xff]  }
 0x1f1   :  { %3394 = vmatprep.subr.bf16.mxu0 %v5194_v43  ;;  %3434 = vmatpush1.bf16.msra.mxu1 %v5285_v53  ;;  %v5318_v53 = vld [vmem:[#allocation7 + $0x320] ss:$16 sps:$4 sm:$0xff]  }
 0x1f2   :  { %3435 = vmatprep.subr.bf16.mxu1 %v5290_v55  ;;  %v2336_v43 = vadd.f32 %v5770_v32, %v2295_v14 }
 0x1f4   :  { %3395 = vmatpush1.bf16.msra.mxu0 %v5192_v46 }
 0x1f5   :  { %3396 = vmatprep.subr.bf16.mxu0 %v5197_v48  ;;  %3436 = vmatpush1.bf16.msra.mxu1 %v5288_v57 }
 0x1f6   :  { %3437 = vmatprep.subr.bf16.mxu1 %v5293_v59  ;;  %v5321_v59 = vld [vmem:[#allocation7 + $0x300] ss:$16 sps:$4 sm:$0xff]  }
 0x1f8   :  { %3397 = vmatpush1.bf16.msra.mxu0 %v5195_v50 }
 0x1f9   :  { %3398 = vmatprep.subr.bf16.mxu0 %v5200_v52  ;;  %3438 = vmatpush1.bf16.msra.mxu1 %v5291_v6 }
 0x1fa   :  { %3439 = vmatprep.subr.bf16.mxu1 %v5296_v62  ;;  %v5326_v62 = vld [vmem:[#allocation7 + $0x2ec] ss:$16 sps:$4 sm:$0xff]  }
 0x1fc   :  { %3399 = vmatpush1.bf16.msra.mxu0 %v5198_v54 }
 0x1fd   :  { %3400 = vmatprep.subr.bf16.mxu0 %v5203_v56  ;;  %3440 = vmatpush1.bf16.msra.mxu1 %v5294_v1  ;;  %v5236_v1 = vld [vmem:[#allocation7 + $0xac] ss:$16 sps:$4 sm:$0xff]  }
 0x1fe   :  { %3441 = vmatprep.subr.bf16.mxu1 %v5299_v3  ;;  %v5239_v3 = vld [vmem:[#allocation7 + $0x8c] ss:$16 sps:$4 sm:$0xff]  }
 0x200   :  { %3401 = vmatpush1.bf16.msra.mxu0 %v5201_v58  ;;  %v5323_v58 = vld [vmem:[#allocation7 + $0x304] ss:$16 sps:$4 sm:$0xff]  }
 0x201   :  { %3402 = vmatprep.subr.bf16.mxu0 %v5206_v60  ;;  %3442 = vmatpush1.bf16.msra.mxu1 %v5297_v13  ;;  %v5228_v60 = vld [vmem:[#allocation7 + $0xe8] ss:$16 sps:$4 sm:$0xff]   ;;  %v5242_v13 = vld [vmem:[#allocation7 + $0x6c] ss:$16 sps:$4 sm:$0xff]  }
 0x202   :  { %3443 = vmatprep.subr.bf16.mxu1 %v5302_v2  ;;  %v5245_v2 = vld [vmem:[#allocation7 + $0x4c] ss:$16 sps:$4 sm:$0xff]  }
 0x204   :  { %3403 = vmatpush2.bf16.msra.mxu0 %v5204_v61  ;;  %v5233_v61 = vld [vmem:[#allocation7 + $0xcc] ss:$16 sps:$4 sm:$0xff]  }
 0x205   :  { %3404 = vmatprep.subr.bf16.mxu0 %v5209_v63  ;;  %3444 = vmatpush2.bf16.msra.mxu1 %v5300_v17  ;;  %v5231_v63 = vld [vmem:[#allocation7 + $0xc8] ss:$16 sps:$4 sm:$0xff]   ;;  %v5248_v17 = vld [vmem:[#allocation7 + $0x2c] ss:$16 sps:$4 sm:$0xff]  }
 0x206   :  { %3445 = vmatprep.subr.bf16.mxu1 %v5305_v19  ;;  %v5251_v19 = vld [vmem:[#allocation7 + $0xc] ss:$16 sps:$4 sm:$0xff]  }
 0x208   :  { %3405 = vmatpush2.bf16.msra.mxu0 %v5207_v7  ;;  %v5234_v7 = vld [vmem:[#allocation7 + $0xa8] ss:$16 sps:$4 sm:$0xff]  }
 0x209   :  { %3406 = vmatprep.subr.bf16.mxu0 %v5212_v4  ;;  %3446 = vmatpush2.bf16.msra.mxu1 %v5303_v21  ;;  %v5237_v4 = vld [vmem:[#allocation7 + $0x88] ss:$16 sps:$4 sm:$0xff]   ;;  %v5254_v21 = vld [vmem:[#allocation7 + $0x1ec] ss:$16 sps:$4 sm:$0xff]  }
 0x20a   :  { %3447 = vmatprep.subr.bf16.mxu1 %v5308_v22  ;;  %v5257_v22 = vld [vmem:[#allocation7 + $0x1cc] ss:$16 sps:$4 sm:$0xff]  }
 0x20c   :  { %3407 = vmatpush2.bf16.msra.mxu0 %v5210_v5  ;;  %v5240_v5 = vld [vmem:[#allocation7 + $0x68] ss:$16 sps:$4 sm:$0xff]  }
 0x20d   :  { %3408 = vmatprep.subr.bf16.mxu0 %v5215_v16  ;;  %3448 = vmatpush2.bf16.msra.mxu1 %v5306_v24  ;;  %v5243_v16 = vld [vmem:[#allocation7 + $0x48] ss:$16 sps:$4 sm:$0xff]   ;;  %v5260_v24 = vld [vmem:[#allocation7 + $0x1ac] ss:$16 sps:$4 sm:$0xff]  }
 0x20e   :  { %3449 = vmatprep.subr.bf16.mxu1 %v5311_v27  ;;  %v5263_v27 = vld [vmem:[#allocation7 + $0x18c] ss:$16 sps:$4 sm:$0xff]  }
 0x210   :  { %3409 = vmatpush2.bf16.msra.mxu0 %v5213_v18  ;;  %v5246_v18 = vld [vmem:[#allocation7 + $0x28] ss:$16 sps:$4 sm:$0xff]  }
 0x211   :  { %3410 = vmatprep.subr.bf16.mxu0 %v5218_v20  ;;  %3450 = vmatpush2.bf16.msra.mxu1 %v5309_v29  ;;  %v5249_v20 = vld [vmem:[#allocation7 + $0x8] ss:$16 sps:$4 sm:$0xff]   ;;  %v5266_v29 = vld [vmem:[#allocation7 + $0x16c] ss:$16 sps:$4 sm:$0xff]  }
 0x212   :  { %3451 = vmatprep.subr.bf16.mxu1 %v5314_v38  ;;  %v5269_v38 = vld [vmem:[#allocation7 + $0x14c] ss:$16 sps:$4 sm:$0xff]  }
 0x214   :  { %3411 = vmatpush2.bf16.msra.mxu0 %v5216_v12  ;;  %v5252_v12 = vld [vmem:[#allocation7 + $0x1e8] ss:$16 sps:$4 sm:$0xff]  }
 0x215   :  { %3412 = vmatprep.subr.bf16.mxu0 %v5221_v23  ;;  %3452 = vmatpush2.bf16.msra.mxu1 %v5312_v37  ;;  %v5255_v23 = vld [vmem:[#allocation7 + $0x1c8] ss:$16 sps:$4 sm:$0xff]  }
 0x216   :  { %3453 = vmatprep.subr.bf16.mxu1 %v5317_v15 }
 0x218   :  { %3413 = vmatpush2.bf16.msra.mxu0 %v5219_v25  ;;  %v5258_v25 = vld [vmem:[#allocation7 + $0x1a8] ss:$16 sps:$4 sm:$0xff]  }
 0x219   :  { %3414 = vmatprep.subr.bf16.mxu0 %v5224_v35  ;;  %3454 = vmatpush2.bf16.msra.mxu1 %v5315_v41  ;;  %v5261_v35 = vld [vmem:[#allocation7 + $0x188] ss:$16 sps:$4 sm:$0xff]  }
 0x21a   :  { %3455 = vmatprep.subr.bf16.mxu1 %v5320_v31 }
 0x21c   :  { %3415 = vmatpush2.bf16.msra.mxu0 %v5222_v39  ;;  %v5264_v39 = vld [vmem:[#allocation7 + $0x168] ss:$16 sps:$4 sm:$0xff]  }
 0x21d   :  { %3416 = vmatprep.subr.bf16.mxu0 %v5227_v34  ;;  %3456 = vmatpush2.bf16.msra.mxu1 %v5318_v53  ;;  %v5267_v34 = vld [vmem:[#allocation7 + $0x148] ss:$16 sps:$4 sm:$0xff]  }
 0x21e   :  { %3457 = vmatprep.subr.bf16.mxu1 %v5323_v58 }
 0x220   :  { %3417 = vmatpush2.bf16.msra.mxu0 %v5225_v30  ;;  %v5270_v30 = vld [vmem:[#allocation7 + $0x128] ss:$16 sps:$4 sm:$0xff]  }
 0x221   :  { %3468 = vmatprep.subr.bf16.mxu0 %v5230_v0  ;;  %3458 = vmatpush2.bf16.msra.mxu1 %v5321_v59  ;;  %v5275_v0 = vld [vmem:[#allocation7 + $0x10c] ss:$16 sps:$4 sm:$0xff]  }
 0x222   :  { %3509 = vmatprep.subr.bf16.mxu1 %v5326_v62 }
 0x223   :  { %v2376_v44 = vpop.f32.mrf.mxu0  ;;  %v2417_v47 = vpop.f32.mrf.mxu1 }
 0x224   :  { %v2377_v46 = vadd.f32 %v2376_v44, %v2336_v43  ;;  %v5273_v43 = vld [vmem:[#allocation7 + $0x108] ss:$16 sps:$4 sm:$0xff]  }
 0x225   :  { %v2378_v48 = vpop.f32.mrf.mxu0  ;;  %v2419_v51 = vpop.f32.mrf.mxu1 }
 0x226   :  { %v2418_v49 = vadd.f32 %v2417_v47, %v2377_v46  ;;  %v2379_v50 = vadd.f32 %v2378_v48, %v2338_v45  ;;  %v971_v46 = vrot.slane %v5779_v28, %v5706_v9  ;;  %v975_v47 = vrot.slane %v5779_v28, %v5712_v11  ;;  %v5324_v28 = vld [vmem:[#allocation7 + $0x2e8] ss:$16 sps:$4 sm:$0xff]  }
 0x227   :  { %v2380_v52 = vpop.f32.mrf.mxu0  ;;  %v2421_v33 = vpop.f32.mrf.mxu1 }
 0x228   :  { %v2420_v54 = vadd.f32 %v2419_v51, %v2379_v50  ;;  %v2588_v55 = vmax.f32 %v2418_v49, 0.0 }
 0x229   :  { %v2381_v56 = vpop.f32.mrf.mxu0  ;;  %v2422_v57 = vpop.f32.mrf.mxu1 }
 0x22a   :  { %v2589_v32 = vmax.f32 %v2420_v54, 0.0  ;;  %v5789_v6 = vpack.c.bf16 %v2588_v55, %v2588_v55 }
 0x22c   :  { %v2593_v36 = vpack.c.bf16 %v2589_v32, %v2589_v32 }
 0x22e   :  { %3418 = vmatprep.mubr.bf16.mxu0 %v2593_v36 }
 0x22f   :  { %3419 = vmatmul.mubr.bf16.vlgmr.msra.gmra.mxu0 %v5789_v6 }
 0x230   :  { %3469 = vmatpush1.bf16.msra.mxu0 %v5228_v60  ;;  %3500 = vmatprep.mubr.bf16.mxu0 %v2593_v36 }
 0x231   :  { %3470 = vmatprep.subr.bf16.mxu0 %v5233_v61 }
 0x234   :  { %3471 = vmatpush1.bf16.msra.mxu0 %v5231_v63  ;;  %v5329_v63 = vld [vmem:[#allocation7 + $0x2cc] ss:$16 sps:$4 sm:$0xff]  }
 0x235   :  { %3472 = vmatprep.subr.bf16.mxu0 %v5236_v1  ;;  %v5327_v1 = vld [vmem:[#allocation7 + $0x2c8] ss:$16 sps:$4 sm:$0xff]  }
 0x238   :  { %3473 = vmatpush1.bf16.msra.mxu0 %v5234_v7  ;;  %v5332_v7 = vld [vmem:[#allocation7 + $0x2ac] ss:$16 sps:$4 sm:$0xff]  }
 0x239   :  { %3474 = vmatprep.subr.bf16.mxu0 %v5239_v3  ;;  %v5330_v3 = vld [vmem:[#allocation7 + $0x2a8] ss:$16 sps:$4 sm:$0xff]  }
 0x23c   :  { %3475 = vmatpush1.bf16.msra.mxu0 %v5237_v4  ;;  %v5335_v4 = vld [vmem:[#allocation7 + $0x28c] ss:$16 sps:$4 sm:$0xff]  }
 0x23d   :  { %3476 = vmatprep.subr.bf16.mxu0 %v5242_v13  ;;  %v5372_v13 = vld [vmem:[#allocation8 + $0x70] ss:$8 sps:$4 sm:$0xff]  }
 0x240   :  { %3477 = vmatpush1.bf16.msra.mxu0 %v5240_v5  ;;  %v5374_v5 = vld [vmem:[#allocation8 + $0x74] ss:$8 sps:$4 sm:$0xff]  }
 0x241   :  { %3478 = vmatprep.subr.bf16.mxu0 %v5245_v2  ;;  %v5377_v2 = vld [vmem:[#allocation8 + $0x64] ss:$8 sps:$4 sm:$0xff]  }
 0x244   :  { %3479 = vmatpush1.bf16.msra.mxu0 %v5243_v16  ;;  %v5333_v16 = vld [vmem:[#allocation7 + $0x288] ss:$16 sps:$4 sm:$0xff]  }
 0x245   :  { %3480 = vmatprep.subr.bf16.mxu0 %v5248_v17  ;;  %v5375_v17 = vld [vmem:[#allocation8 + $0x60] ss:$8 sps:$4 sm:$0xff]  }
 0x248   :  { %3481 = vmatpush1.bf16.msra.mxu0 %v5246_v18  ;;  %v5338_v18 = vld [vmem:[#allocation7 + $0x26c] ss:$16 sps:$4 sm:$0xff]  }
 0x249   :  { %3482 = vmatprep.subr.bf16.mxu0 %v5251_v19  ;;  %v5380_v19 = vld [vmem:[#allocation8 + $0x54] ss:$8 sps:$4 sm:$0xff]  }
 0x24c   :  { %3483 = vmatpush1.bf16.msra.mxu0 %v5249_v20  ;;  %v5336_v20 = vld [vmem:[#allocation7 + $0x268] ss:$16 sps:$4 sm:$0xff]  }
 0x24d   :  { %3484 = vmatprep.subr.bf16.mxu0 %v5254_v21  ;;  %v5378_v21 = vld [vmem:[#allocation8 + $0x50] ss:$8 sps:$4 sm:$0xff]  }
 0x250   :  { %3485 = vmatpush2.bf16.msra.mxu0 %v5252_v12  ;;  %v5341_v12 = vld [vmem:[#allocation7 + $0x24c] ss:$16 sps:$4 sm:$0xff]  }
 0x251   :  { %3486 = vmatprep.subr.bf16.mxu0 %v5257_v22  ;;  %v5383_v22 = vld [vmem:[#allocation8 + $0x44] ss:$8 sps:$4 sm:$0xff]  }
 0x254   :  { %3487 = vmatpush2.bf16.msra.mxu0 %v5255_v23  ;;  %v5339_v23 = vld [vmem:[#allocation7 + $0x248] ss:$16 sps:$4 sm:$0xff]  }
 0x255   :  { %3488 = vmatprep.subr.bf16.mxu0 %v5260_v24  ;;  %v5381_v24 = vld [vmem:[#allocation8 + $0x40] ss:$8 sps:$4 sm:$0xff]  }
 0x258   :  { %3489 = vmatpush2.bf16.msra.mxu0 %v5258_v25  ;;  %v5344_v25 = vld [vmem:[#allocation7 + $0x22c] ss:$16 sps:$4 sm:$0xff]  }
 0x259   :  { %3490 = vmatprep.subr.bf16.mxu0 %v5263_v27  ;;  %v5386_v27 = vld [vmem:[#allocation8 + $0x34] ss:$8 sps:$4 sm:$0xff]  }
 0x25c   :  { %3491 = vmatpush2.bf16.msra.mxu0 %v5261_v35  ;;  %v5342_v35 = vld [vmem:[#allocation7 + $0x228] ss:$16 sps:$4 sm:$0xff]  }
 0x25d   :  { %3492 = vmatprep.subr.bf16.mxu0 %v5266_v29  ;;  %v5384_v29 = vld [vmem:[#allocation8 + $0x30] ss:$8 sps:$4 sm:$0xff]  }
 0x260   :  { %3493 = vmatpush2.bf16.msra.mxu0 %v5264_v39  ;;  %v5347_v39 = vld [vmem:[#allocation7 + $0x20c] ss:$16 sps:$4 sm:$0xff]  }
 0x261   :  { %3494 = vmatprep.subr.bf16.mxu0 %v5269_v38  ;;  %v5389_v38 = vld [vmem:[#allocation8 + $0x24] ss:$8 sps:$4 sm:$0xff]  }
 0x263   :  { %v2458_v37 = vpop.f32.mrf.mxu0 }
 0x264   :  { %v2499_v40 = vpop.f32.mrf.mxu1  ;;  %3495 = vmatpush2.bf16.msra.mxu0 %v5267_v34  ;;  %v2459_v48 = vadd.f32 %v2458_v37, %v971_v46  ;;  %v5345_v34 = vld [vmem:[#allocation7 + $0x208] ss:$16 sps:$4 sm:$0xff]   ;;  %v5350_v37 = vld [vmem:[#allocation7 + $0x3ec] ss:$16 sps:$4 sm:$0xff]  }
 0x265   :  { %v2460_v15 = vpop.f32.mrf.mxu0  ;;  %3496 = vmatprep.subr.bf16.mxu0 %v5272_v26  ;;  %v5387_v26 = vld [vmem:[#allocation8 + $0x20] ss:$8 sps:$4 sm:$0xff]   ;;  %v5396_v46 = vld [vmem:[#allocation8 + $0xf0] ss:$8 sps:$4 sm:$0xff]  }
 0x266   :  { %v2501_v14 = vpop.f32.mrf.mxu1  ;;  %v2461_v49 = vadd.f32 %v2460_v15, %v975_v47  ;;  %v2500_v50 = vadd.f32 %v2499_v40, %v2459_v48  ;;  %v5392_v40 = vld [vmem:[#allocation8 + $0x14] ss:$8 sps:$4 sm:$0xff]   ;;  %v5390_v15 = vld [vmem:[#allocation8 + $0x10] ss:$8 sps:$4 sm:$0xff]   ;;  %v5401_v48 = vld [vmem:[#allocation8 + $0xe4] ss:$8 sps:$4 sm:$0xff]  }
 0x267   :  { %v2462_v41 = vpop.f32.mrf.mxu0  ;;  %v5359_v47 = vld [vmem:[#allocation7 + $0x38c] ss:$16 sps:$4 sm:$0xff]  }
 0x268   :  { %v2503_v42 = vpop.f32.mrf.mxu1  ;;  %3497 = vmatpush2.bf16.msra.mxu0 %v5270_v30  ;;  %v2502_v31 = vadd.f32 %v2501_v14, %v2461_v49  ;;  %v5348_v30 = vld [vmem:[#allocation7 + $0x3e8] ss:$16 sps:$4 sm:$0xff]   ;;  %v5395_v14 = vld [vmem:[#allocation8 + $0x4] ss:$8 sps:$4 sm:$0xff]  }
 0x269   :  { %v2463_v44 = vpop.f32.mrf.mxu0  ;;  %3498 = vmatprep.subr.bf16.mxu0 %v5275_v0  ;;  %v5353_v0 = vld [vmem:[#allocation7 + $0x3cc] ss:$16 sps:$4 sm:$0xff]   ;;  %v5351_v41 = vld [vmem:[#allocation7 + $0x3c8] ss:$16 sps:$4 sm:$0xff]  }
 0x26a   :  { %v2504_v45 = vpop.f32.mrf.mxu1  ;;  %v5393_v42 = vld [vmem:[#allocation8] ss:$8 sps:$4 sm:$0xff]   ;;  %v5398_v44 = vld [vmem:[#allocation8 + $0xf4] ss:$8 sps:$4 sm:$0xff]  }
 0x26b   :  { %v5354_v45 = vld [vmem:[#allocation7 + $0x3a8] ss:$16 sps:$4 sm:$0xff]  }
 0x26c   :  { %3499 = vmatpush2.bf16.msra.mxu0 %v5273_v43  ;;  %v5356_v43 = vld [vmem:[#allocation7 + $0x3ac] ss:$16 sps:$4 sm:$0xff]   ;;  %v5357_v49 = vld [vmem:[#allocation7 + $0x388] ss:$16 sps:$4 sm:$0xff]  }
 0x26d   :  { %3954 = vmatprep.subr.bf16.mxu0 %v5374_v5  ;;  %v5417_v5 = vld [vmem:[#allocation8 + $0x80] ss:$8 sps:$4 sm:$0xff]  }
 0x26f   :  { %3501 = vmatmul.mubr.bf16.vlgmr.msra.gmra.mxu0 %v5789_v6 }
 0x270   :  { %3955 = vmatpush1.bf16.msra.mxu0 %v5372_v13  ;;  %v5419_v13 = vld [vmem:[#allocation8 + $0x84] ss:$8 sps:$4 sm:$0xff]  }
 0x271   :  { %3956 = vmatprep.subr.bf16.mxu0 %v5377_v2  ;;  %v5420_v2 = vld [vmem:[#allocation8 + $0x170] ss:$8 sps:$4 sm:$0xff]  }
 0x274   :  { %3957 = vmatpush1.bf16.msra.mxu0 %v5375_v17  ;;  %v5425_v17 = vld [vmem:[#allocation8 + $0x164] ss:$8 sps:$4 sm:$0xff]  }
 0x275   :  { %3958 = vmatprep.subr.bf16.mxu0 %v5380_v19  ;;  %v5426_v19 = vld [vmem:[#allocation8 + $0x150] ss:$8 sps:$4 sm:$0xff]  }
 0x278   :  { %3959 = vmatpush1.bf16.msra.mxu0 %v5378_v21  ;;  %v5429_v21 = vld [vmem:[#allocation8 + $0x140] ss:$8 sps:$4 sm:$0xff]  }
 0x279   :  { %3960 = vmatprep.subr.bf16.mxu0 %v5383_v22  ;;  %v5432_v22 = vld [vmem:[#allocation8 + $0x130] ss:$8 sps:$4 sm:$0xff]  }
 0x27c   :  { %3961 = vmatpush1.bf16.msra.mxu0 %v5381_v24  ;;  %v5435_v24 = vld [vmem:[#allocation8 + $0x120] ss:$8 sps:$4 sm:$0xff]  }
 0x27d   :  { %3962 = vmatprep.subr.bf16.mxu0 %v5386_v27  ;;  %v5438_v27 = vld [vmem:[#allocation8 + $0x110] ss:$8 sps:$4 sm:$0xff]  }
 0x280   :  { %3963 = vmatpush1.bf16.msra.mxu0 %v5384_v29  ;;  %v5441_v29 = vld [vmem:[#allocation8 + $0x100] ss:$8 sps:$4 sm:$0xff]  }
 0x281   :  { %3964 = vmatprep.subr.bf16.mxu0 %v5389_v38  ;;  %v5444_v38 = vld [vmem:[#allocation8 + $0x1f0] ss:$8 sps:$4 sm:$0xff]  }
 0x284   :  { %3965 = vmatpush1.bf16.msra.mxu0 %v5387_v26  ;;  %v5447_v26 = vld [vmem:[#allocation8 + $0x1e0] ss:$8 sps:$4 sm:$0xff]  }
 0x285   :  { %3966 = vmatprep.subr.bf16.mxu0 %v5392_v40  ;;  %v5450_v40 = vld [vmem:[#allocation8 + $0x1d0] ss:$8 sps:$4 sm:$0xff]  }
 0x288   :  { %3967 = vmatpush1.bf16.msra.mxu0 %v5390_v15  ;;  %v5453_v15 = vld [vmem:[#allocation8 + $0x1c0] ss:$8 sps:$4 sm:$0xff]  }
 0x289   :  { %3968 = vmatprep.subr.bf16.mxu0 %v5395_v14  ;;  %v5456_v14 = vld [vmem:[#allocation8 + $0x1b0] ss:$8 sps:$4 sm:$0xff]  }
 0x28c   :  { %3969 = vmatpush1.bf16.msra.mxu0 %v5393_v42  ;;  %v2724_v42 = vld [vmem:[%s5879_s6] sm:$0xf] }
 0x28d   :  { %3970 = vmatprep.subr.bf16.mxu0 %v5398_v44  ;;  %v2737_v44 = vrot.slane %v2724_v42, %v5706_v9  ;;  %v2729_v9 = vrot.slane %v2724_v42, %v5703_v8 }
 0x290   :  { %3971 = vmatpush2.bf16.msra.mxu0 %v5396_v46 }
 0x291   :  { %3972 = vmatprep.subr.bf16.mxu0 %v5401_v48  ;;  %v5464_v48 = vld [vmem:[#allocation8 + $0x194] ss:$8 sps:$4 sm:$0xff]  }
 0x2a3   :  { %v2540_v51 = vpop.f32.mrf.mxu0 }
 0x2a4   :  { %v2541_v52 = vadd.f32 %v2540_v51, %v2500_v50  ;;  %v2581_v53 = vpop.f32.mrf.mxu1  ;;  %v5399_v50 = vld [vmem:[#allocation8 + $0xe0] ss:$8 sps:$4 sm:$0xff]   ;;  %v5362_v51 = vld [vmem:[#allocation7 + $0x36c] ss:$16 sps:$4 sm:$0xff]  }
 0x2a5   :  { %v2542_v54 = vpop.f32.mrf.mxu0  ;;  %3973 = vmatpush2.bf16.msra.mxu0 %v5399_v50  ;;  %v5462_v50 = vld [vmem:[#allocation8 + $0x190] ss:$8 sps:$4 sm:$0xff]  }
 0x2a6   :  { %v2582_v33 = vadd.f32 %v2581_v53, %v2541_v52  ;;  %v2543_v55 = vadd.f32 %v2542_v54, %v2502_v31  ;;  %v2583_v56 = vpop.f32.mrf.mxu1  ;;  %v5404_v31 = vld [vmem:[#allocation8 + $0xd4] ss:$8 sps:$4 sm:$0xff]   ;;  %v5360_v52 = vld [vmem:[#allocation7 + $0x368] ss:$16 sps:$4 sm:$0xff]  }
 0x2a7   :  { %v2544_v32 = vpop.f32.mrf.mxu0  ;;  %v5402_v53 = vld [vmem:[#allocation8 + $0xd0] ss:$8 sps:$4 sm:$0xff]   ;;  %v5365_v54 = vld [vmem:[#allocation7 + $0x34c] ss:$16 sps:$4 sm:$0xff]   ;;  %3974 = vmatprep.subr.bf16.mxu0 %v5404_v31 }
 0x2a8   :  { %v2584_v57 = vadd.f32 %v2583_v56, %v2543_v55  ;;  %v2585_v58 = vpop.f32.mrf.mxu1  ;;  %v2590_v59 = vmax.f32 %v2582_v33, 0.0  ;;  %v5407_v33 = vld [vmem:[#allocation8 + $0xc4] ss:$8 sps:$4 sm:$0xff]   ;;  %v5363_v55 = vld [vmem:[#allocation7 + $0x348] ss:$16 sps:$4 sm:$0xff]  }
 0x2a9   :  { %v2545_v36 = vpop.f32.mrf.mxu0  ;;  %3975 = vmatpush2.bf16.msra.mxu0 %v5402_v53  ;;  %v5405_v56 = vld [vmem:[#allocation8 + $0xc0] ss:$8 sps:$4 sm:$0xff]   ;;  %v5368_v32 = vld [vmem:[#allocation7 + $0x32c] ss:$16 sps:$4 sm:$0xff]  }
 0x2aa   :  { %v2591_v60 = vmax.f32 %v2584_v57, 0.0  ;;  %v2586_v6 = vpop.f32.mrf.mxu1  ;;  %v5797_v62 = vpack.c.bf16 %v2590_v59, %v2590_v59  ;;  %3976 = vmatprep.subr.bf16.mxu0 %v5407_v33  ;;  %v5410_v57 = vld [vmem:[#allocation8 + $0xb4] ss:$8 sps:$4 sm:$0xff]   ;;  %v5366_v58 = vld [vmem:[#allocation7 + $0x328] ss:$16 sps:$4 sm:$0xff]   ;;  %v2733_v33 = vrot.slane %v2724_v42, %v5709_v10 }
 0x2ab   :  { %v5408_v59 = vld [vmem:[#allocation8 + $0xb0] ss:$8 sps:$4 sm:$0xff]   ;;  %v5371_v36 = vld [vmem:[#allocation7 + $0x30c] ss:$16 sps:$4 sm:$0xff]  }
 0x2ac   :  { %v2595_v61 = vpack.c.bf16 %v2591_v60, %v2591_v60  ;;  %v5413_v60 = vld [vmem:[#allocation8 + $0xa4] ss:$8 sps:$4 sm:$0xff]   ;;  %v5369_v6 = vld [vmem:[#allocation7 + $0x308] ss:$16 sps:$4 sm:$0xff]  }
 0x2ad   :  { %3977 = vmatpush2.bf16.msra.mxu0 %v5405_v56 }
 0x2ae   :  { %3459 = vmatprep.mubr.bf16.mxu1 %v2595_v61  ;;  %3978 = vmatprep.subr.bf16.mxu0 %v5410_v57 }
 0x2af   :  { %3460 = vmatmul.mubr.bf16.vlgmr.msra.gmra.mxu1 %v5797_v62 }
 0x2b0   :  { %3510 = vmatpush1.bf16.msra.mxu1 %v5324_v28  ;;  %3541 = vmatprep.mubr.bf16.mxu1 %v2595_v61  ;;  %v5411_v61 = vld [vmem:[#allocation8 + $0xa0] ss:$8 sps:$4 sm:$0xff]  }
 0x2b1   :  { %3511 = vmatprep.subr.bf16.mxu1 %v5329_v63  ;;  %3979 = vmatpush2.bf16.msra.mxu0 %v5408_v59 }
 0x2b2   :  { %3980 = vmatprep.subr.bf16.mxu0 %v5413_v60 }
 0x2b4   :  { %3512 = vmatpush1.bf16.msra.mxu1 %v5327_v1  ;;  %v5416_v1 = vld [vmem:[#allocation8 + $0x94] ss:$8 sps:$4 sm:$0xff]  }
 0x2b5   :  { %3513 = vmatprep.subr.bf16.mxu1 %v5332_v7  ;;  %3981 = vmatpush2.bf16.msra.mxu0 %v5411_v61  ;;  %v5414_v7 = vld [vmem:[#allocation8 + $0x90] ss:$8 sps:$4 sm:$0xff]  }
 0x2b6   :  { %3982 = vmatprep.subr.bf16.mxu0 %v5416_v1 }
 0x2b8   :  { %3514 = vmatpush1.bf16.msra.mxu1 %v5330_v3 }
 0x2b9   :  { %3515 = vmatprep.subr.bf16.mxu1 %v5335_v4  ;;  %3983 = vmatpush2.bf16.msra.mxu0 %v5414_v7 }
 0x2ba   :  { %3984 = vmatprep.subr.bf16.mxu0 %v5419_v13 }
 0x2bc   :  { %3516 = vmatpush1.bf16.msra.mxu1 %v5333_v16  ;;  %v5422_v16 = vld [vmem:[#allocation8 + $0x174] ss:$8 sps:$4 sm:$0xff]  }
 0x2bd   :  { %3517 = vmatprep.subr.bf16.mxu1 %v5338_v18  ;;  %3985 = vmatpush2.bf16.msra.mxu0 %v5417_v5  ;;  %v5428_v18 = vld [vmem:[#allocation8 + $0x154] ss:$8 sps:$4 sm:$0xff]  }
 0x2c0   :  { %3518 = vmatpush1.bf16.msra.mxu1 %v5336_v20  ;;  %v5431_v20 = vld [vmem:[#allocation8 + $0x144] ss:$8 sps:$4 sm:$0xff]  }
 0x2c1   :  { %3519 = vmatprep.subr.bf16.mxu1 %v5341_v12  ;;  %v5434_v12 = vld [vmem:[#allocation8 + $0x134] ss:$8 sps:$4 sm:$0xff]  }
 0x2c4   :  { %3520 = vmatpush1.bf16.msra.mxu1 %v5339_v23  ;;  %v5437_v23 = vld [vmem:[#allocation8 + $0x124] ss:$8 sps:$4 sm:$0xff]  }
 0x2c5   :  { %3521 = vmatprep.subr.bf16.mxu1 %v5344_v25  ;;  %v5440_v25 = vld [vmem:[#allocation8 + $0x114] ss:$8 sps:$4 sm:$0xff]  }
 0x2c8   :  { %3522 = vmatpush1.bf16.msra.mxu1 %v5342_v35  ;;  %v5443_v35 = vld [vmem:[#allocation8 + $0x104] ss:$8 sps:$4 sm:$0xff]  }
 0x2c9   :  { %3523 = vmatprep.subr.bf16.mxu1 %v5347_v39  ;;  %v5446_v39 = vld [vmem:[#allocation8 + $0x1f4] ss:$8 sps:$4 sm:$0xff]  }
 0x2cc   :  { %3524 = vmatpush1.bf16.msra.mxu1 %v5345_v34  ;;  %v5449_v34 = vld [vmem:[#allocation8 + $0x1e4] ss:$8 sps:$4 sm:$0xff]  }
 0x2cd   :  { %3525 = vmatprep.subr.bf16.mxu1 %v5350_v37  ;;  %v5452_v37 = vld [vmem:[#allocation8 + $0x1d4] ss:$8 sps:$4 sm:$0xff]  }
 0x2d0   :  { %3526 = vmatpush2.bf16.msra.mxu1 %v5348_v30  ;;  %v5455_v30 = vld [vmem:[#allocation8 + $0x1c4] ss:$8 sps:$4 sm:$0xff]  }
 0x2d1   :  { %3527 = vmatprep.subr.bf16.mxu1 %v5353_v0  ;;  %v5458_v0 = vld [vmem:[#allocation8 + $0x1b4] ss:$8 sps:$4 sm:$0xff]  }
 0x2d4   :  { %3528 = vmatpush2.bf16.msra.mxu1 %v5351_v41  ;;  %v5461_v41 = vld [vmem:[#allocation8 + $0x1a4] ss:$8 sps:$4 sm:$0xff]  }
 0x2d5   :  { %3529 = vmatprep.subr.bf16.mxu1 %v5356_v43  ;;  %v5459_v43 = vld [vmem:[#allocation8 + $0x1a0] ss:$8 sps:$4 sm:$0xff]  }
 0x2d8   :  { %3530 = vmatpush2.bf16.msra.mxu1 %v5354_v45  ;;  %v2741_v45 = vrot.slane %v2724_v42, %v5712_v11 }
 0x2d9   :  { %3531 = vmatprep.subr.bf16.mxu1 %v5359_v47 }
 0x2dc   :  { %3532 = vmatpush2.bf16.msra.mxu1 %v5357_v49 }
 0x2dd   :  { %3533 = vmatprep.subr.bf16.mxu1 %v5362_v51 }
 0x2e0   :  { %3534 = vmatpush2.bf16.msra.mxu1 %v5360_v52  ;;  %v5467_v52 = vld [vmem:[#allocation8 + $0x184] ss:$8 sps:$4 sm:$0xff]  }
 0x2e1   :  { %3535 = vmatprep.subr.bf16.mxu1 %v5365_v54  ;;  %v5465_v54 = vld [vmem:[#allocation8 + $0x180] ss:$8 sps:$4 sm:$0xff]  }
 0x2e4   :  { %3536 = vmatpush2.bf16.msra.mxu1 %v5363_v55 }
 0x2e5   :  { %3537 = vmatprep.subr.bf16.mxu1 %v5368_v32 }
 0x2e8   :  { %3538 = vmatpush2.bf16.msra.mxu1 %v5366_v58 }
 0x2e9   :  { %3539 = vmatprep.subr.bf16.mxu1 %v5371_v36 }
 0x2ec   :  { %3540 = vmatpush2.bf16.msra.mxu1 %v5369_v6 }
 0x2ed   :  { %3995 = vmatprep.subr.bf16.mxu1 %v5422_v16 }
 0x2ef   :  { %3542 = vmatmul.mubr.bf16.vlgmr.msra.gmra.mxu1 %v5797_v62  ;;  %v5801_v28 = vpop.f32.mrf.mxu0  ;;  %v5423_v62 = vld [vmem:[#allocation8 + $0x160] ss:$8 sps:$4 sm:$0xff]  }
 0x2f0   :  { %3996 = vmatpush1.bf16.msra.mxu1 %v5420_v2  ;;  %v3421_v11 = vadd.f32 %v5801_v28, %v2729_v9 }
 0x2f1   :  { %v5803_v63 = vpop.f32.mrf.mxu0  ;;  %3997 = vmatprep.subr.bf16.mxu1 %v5425_v17 }
 0x2f2   :  { %v3423_v56 = vadd.f32 %v5803_v63, %v2733_v33 }
 0x2f3   :  { %v3424_v3 = vpop.f32.mrf.mxu0 }
 0x2f4   :  { %3998 = vmatpush1.bf16.msra.mxu1 %v5423_v62  ;;  %v5468_v62 = vld [vmem:[%s5882_s9 + $0x78] sm:$0xff]  }
 0x2f5   :  { %v3425_v4 = vpop.f32.mrf.mxu0  ;;  %3999 = vmatprep.subr.bf16.mxu1 %v5428_v18  ;;  %v5469_v18 = vld [vmem:[%s5882_s9 + $0x38] sm:$0xff]   ;;  %4762 = vmatprep.subr.bf16.mxu0 %v5468_v62 }
 0x2f8   :  { %4000 = vmatpush1.bf16.msra.mxu1 %v5426_v19  ;;  %v5470_v19 = vld [vmem:[%s5882_s9 + $0x70] sm:$0xff]  }
 0x2f9   :  { %4001 = vmatprep.subr.bf16.mxu1 %v5431_v20  ;;  %v5471_v20 = vld [vmem:[%s5882_s9 + $0x30] sm:$0xff]  }
 0x2fc   :  { %4002 = vmatpush1.bf16.msra.mxu1 %v5429_v21  ;;  %v5472_v21 = vld [vmem:[%s5882_s9 + $0x68] sm:$0xff]  }
 0x2fd   :  { %4003 = vmatprep.subr.bf16.mxu1 %v5434_v12  ;;  %v5473_v12 = vld [vmem:[%s5882_s9 + $0x28] sm:$0xff]  }
 0x300   :  { %4004 = vmatpush1.bf16.msra.mxu1 %v5432_v22  ;;  %v5474_v22 = vld [vmem:[%s5882_s9 + $0x60] sm:$0xff]  }
 0x301   :  { %4005 = vmatprep.subr.bf16.mxu1 %v5437_v23  ;;  %v5475_v23 = vld [vmem:[%s5882_s9 + $0x20] sm:$0xff]  }
 0x304   :  { %4006 = vmatpush1.bf16.msra.mxu1 %v5435_v24  ;;  %v5476_v24 = vld [vmem:[%s5882_s9 + $0x58] sm:$0xff]  }
 0x305   :  { %4007 = vmatprep.subr.bf16.mxu1 %v5440_v25  ;;  %v5477_v25 = vld [vmem:[%s5882_s9 + $0x18] sm:$0xff]  }
 0x308   :  { %4008 = vmatpush1.bf16.msra.mxu1 %v5438_v27  ;;  %v5478_v27 = vld [vmem:[%s5882_s9 + $0x50] sm:$0xff]  }
 0x309   :  { %4009 = vmatprep.subr.bf16.mxu1 %v5443_v35  ;;  %v5479_v35 = vld [vmem:[%s5882_s9 + $0x10] sm:$0xff]  }
 0x30c   :  { %4010 = vmatpush1.bf16.msra.mxu1 %v5441_v29  ;;  %v5480_v29 = vld [vmem:[%s5882_s9 + $0x48] sm:$0xff]  }
 0x30d   :  { %4011 = vmatprep.subr.bf16.mxu1 %v5446_v39  ;;  %v5481_v39 = vld [vmem:[%s5882_s9 + $0x8] sm:$0xff]  }
 0x310   :  { %4012 = vmatpush2.bf16.msra.mxu1 %v5444_v38  ;;  %v5482_v38 = vld [vmem:[%s5882_s9 + $0x40] sm:$0xff]  }
 0x311   :  { %4013 = vmatprep.subr.bf16.mxu1 %v5449_v34  ;;  %v5483_v34 = vld [vmem:[%s5882_s9] sm:$0xff]  }
 0x314   :  { %4014 = vmatpush2.bf16.msra.mxu1 %v5447_v26 }
 0x315   :  { %4015 = vmatprep.subr.bf16.mxu1 %v5452_v37 }
 0x318   :  { %4016 = vmatpush2.bf16.msra.mxu1 %v5450_v40 }
 0x319   :  { %4017 = vmatprep.subr.bf16.mxu1 %v5455_v30 }
 0x31c   :  { %4018 = vmatpush2.bf16.msra.mxu1 %v5453_v15  ;;  %v3622_v15 = vld [vmem:[%s5881_s8] sm:$0x3] }
 0x31d   :  { %4019 = vmatprep.subr.bf16.mxu1 %v5458_v0  ;;  %v3627_v0 = vrot.slane %v3622_v15, %v5703_v8  ;;  %v4745_v8 = vld [vmem:[%s5883_s10] ss:$0 sm:$0xff] }
 0x320   :  { %4020 = vmatpush2.bf16.msra.mxu1 %v5456_v14  ;;  %v3631_v14 = vrot.slane %v3622_v15, %v5709_v10 }
 0x321   :  { %4021 = vmatprep.subr.bf16.mxu1 %v5461_v41 }
 0x324   :  { %4022 = vmatpush2.bf16.msra.mxu1 %v5459_v43 }
 0x325   :  { %4023 = vmatprep.subr.bf16.mxu1 %v5464_v48 }
 0x328   :  { %4024 = vmatpush2.bf16.msra.mxu1 %v5462_v50 }
 0x329   :  { %4025 = vmatprep.subr.bf16.mxu1 %v5467_v52 }
 0x32c   :  { %4026 = vmatpush2.bf16.msra.mxu1 %v5465_v54 }
 0x32f   :  { %v3502_v46 = vpop.f32.mrf.mxu0 }
 0x330   :  { %v3503_v47 = vadd.f32 %v3502_v46, %v2737_v44 }
 0x331   :  { %v3504_v49 = vpop.f32.mrf.mxu0 }
 0x332   :  { %v3505_v51 = vadd.f32 %v3504_v49, %v2741_v45 }
 0x333   :  { %v3506_v31 = vpop.f32.mrf.mxu0 }
 0x335   :  { %v3507_v53 = vpop.f32.mrf.mxu0 }
 0x36f   :  { %v3461_v55 = vpop.f32.mrf.mxu1 }
 0x370   :  { %v3462_v32 = vadd.f32 %v3461_v55, %v3421_v11 }
 0x371   :  { %v3463_v57 = vpop.f32.mrf.mxu1 }
 0x372   :  { %v3464_v58 = vadd.f32 %v3463_v57, %v3423_v56  ;;  %v3550_v59 = vmax.f32 %v3462_v32, 0.0 }
 0x373   :  { %v3465_v36 = vpop.f32.mrf.mxu1 }
 0x374   :  { %v3551_v60 = vmax.f32 %v3464_v58, 0.0  ;;  %v3554_v1 = vpack.c.bf16 %v3550_v59, %v3550_v59 }
 0x375   :  { %v3466_v6 = vpop.f32.mrf.mxu1 }
 0x376   :  { %v3555_v61 = vpack.c.bf16 %v3551_v60, %v3551_v60 }
 0x378   :  { %3986 = vmatprep.mubr.bf16.mxu0 %v3555_v61 }
 0x379   :  { %3987 = vmatmul.mubr.bf16.vlgmr.msra.gmra.mxu0 %v3554_v1 }
 0x37a   :  { %4763 = vmatpush3.bf16.msra.mxu0 %v5469_v18 }
 0x37b   :  { %4764 = vmatprep.subr.bf16.mxu0 %v5470_v19 }
 0x37e   :  { %4765 = vmatpush3.bf16.msra.mxu0 %v5471_v20 }
 0x37f   :  { %4766 = vmatprep.subr.bf16.mxu0 %v5472_v21 }
 0x382   :  { %4767 = vmatpush3.bf16.msra.mxu0 %v5473_v12 }
 0x383   :  { %4768 = vmatprep.subr.bf16.mxu0 %v5474_v22 }
 0x386   :  { %4769 = vmatpush3.bf16.msra.mxu0 %v5475_v23 }
 0x387   :  { %4770 = vmatprep.subr.bf16.mxu0 %v5476_v24 }
 0x38a   :  { %4771 = vmatpush3.bf16.msra.mxu0 %v5477_v25 }
 0x38b   :  { %4772 = vmatprep.subr.bf16.mxu0 %v5478_v27 }
 0x38e   :  { %4773 = vmatpush3.bf16.msra.mxu0 %v5479_v35 }
 0x38f   :  { %4774 = vmatprep.subr.bf16.mxu0 %v5480_v29 }
 0x392   :  { %4775 = vmatpush3.bf16.msra.mxu0 %v5481_v39 }
 0x393   :  { %4776 = vmatprep.subr.bf16.mxu0 %v5482_v38 }
 0x396   :  { %4777 = vmatpush3.bf16.msra.mxu0 %v5483_v34 }
 0x3af   :  { %v3543_v7 = vpop.f32.mrf.mxu1 }
 0x3b0   :  { %v3544_v3 = vadd.f32 %v3543_v7, %v3503_v47 }
 0x3b1   :  { %v3545_v4 = vpop.f32.mrf.mxu1 }
 0x3b2   :  { %v3546_v13 = vadd.f32 %v3545_v4, %v3505_v51  ;;  %v3552_v5 = vmax.f32 %v3544_v3, 0.0 }
 0x3b3   :  { %v3547_v28 = vpop.f32.mrf.mxu1 }
 0x3b4   :  { %v3553_v2 = vmax.f32 %v3546_v13, 0.0  ;;  %v3556_v17 = vpack.c.bf16 %v3552_v5, %v3552_v5 }
 0x3b5   :  { %v3548_v16 = vpop.f32.mrf.mxu1 }
 0x3b6   :  { %v3557_v63 = vpack.c.bf16 %v3553_v2, %v3553_v2 }
 0x3b8   :  { %4027 = vmatprep.mubr.bf16.mxu1 %v3557_v63 }
 0x3b9   :  { %4028 = vmatmul.mubr.bf16.vlgmr.msra.gmra.mxu1 %v3556_v17 }
 0x439   :  { %v3988_v26 = vpop.f32.mrf.mxu0 }
 0x43a   :  { %v3989_v41 = vadd.f32 %v3988_v26, %v3627_v0 }
 0x43b   :  { %v3990_v37 = vpop.f32.mrf.mxu0 }
 0x43c   :  { %v3991_v43 = vadd.f32 %v3990_v37, %v3631_v14 }
 0x43d   :  { %v3992_v40 = vpop.f32.mrf.mxu0 }
 0x43f   :  { %v3993_v30 = vpop.f32.mrf.mxu0 }
 0x479   :  { %v4029_v42 = vpop.f32.mrf.mxu1 }
 0x47a   :  { %v4030_v44 = vadd.f32 %v4029_v42, %v3989_v41 }
 0x47b   :  { %v4031_v45 = vpop.f32.mrf.mxu1 }
 0x47c   :  { %v4032_v46 = vadd.f32 %v4031_v45, %v3991_v43  ;;  %v4036_v47 = vmax.f32 %v4030_v44, 0.0 }
 0x47d   :  { %v4033_v48 = vpop.f32.mrf.mxu1 }
 0x47e   :  { %v4037_v49 = vmax.f32 %v4032_v46, 0.0  ;;  %v4038_v31 = vpack.c.bf16 %v4036_v47, %v4036_v47 }
 0x47f   :  { %v4034_v50 = vpop.f32.mrf.mxu1 }
 0x480   :  { %v4039_v51 = vpack.c.bf16 %v4037_v49, %v4037_v49 }
 0x482   :  { %4207 = vmatprep.mubr.bf16.mxu0 %v4039_v51 }
 0x483   :  { %4208 = vmatmul.mubr.bf16.vlgmr.msra.gmra.mxu0 %v4038_v31 }
 0x543   :  { %v4778_v52 = vpop.f32.mrf.mxu0 }
 0x545   :  { %v4779_v10 = vpop.f32.mrf.mxu0 }
 0x546   :  { %v4780_v53 = vadd.f32 %v4779_v10, %v4778_v52 }
 0x547   :  { %v4781_v54 = vpop.f32.mrf.mxu0 }
 0x548   :  { %v4210_v9 = vadd.f32 %v4780_v53, %v4745_v8 }
 0x549   :  { %v4782_v33 = vpop.f32.mrf.mxu0 }
 0x54a   :  { %4215 = vst [vmem:[#allocation10] sm:$0xff] %v4210_v9 }
 0x54b   :  { %5575 = shalt.err (!%p5572_p10)
}
 0x54c   :  { %4225 = dma.vmem_to_hbm [thread:$0]  %s4223_s13, 128, %s5884_s11, [#allocation4]  }
 0x54d   :  { %5590 = dma.done.wait [#allocation4], 128  }
 0x54e   :  { %5591 = vsyncadd [#allocation4], 4294967168 }
 0x54f   :  { %4229 = vsyncpa [#allocation3], 1 }
 0x550   :  { %4230 = vsyncpa [#allocation6], 1 }
 0x551   :  { %4231 = vsyncpa [#allocation9], 1 }
 0x552   :  { %4232 = vsyncpa [#allocation4], 1 }

// kernel: _forward_impl.1
= control target key start
LH: loop header
LB: loop body
LE: loop exit
PB: predicated region body
PF: predicated region fallthrough
CT: control target
= control target key end

     0   :  { %16 = vsyncpa [#allocation3], 0  ;;  %s5873_s0 = inlined_call_operand.vmem [shape: bf16[8,128], index: 0, kind: input, shape index: {}]   ;;  %s5874_s1 = inlined_call_operand.hbm [shape: bf16[128,1024], index: 1, kind: input, shape index: {}]   ;;  %s5875_s2 = inlined_call_operand.vmem [shape: f32[1,1024], index: 2, kind: input, shape index: {}]   ;;  %s5876_s3 = inlined_call_operand.hbm [shape: bf16[1024,512], index: 3, kind: input, shape index: {}]   ;;  %s5877_s4 = inlined_call_operand.vmem [shape: f32[1,512], index: 4, kind: input, shape index: {}]   ;;  %s5878_s5 = inlined_call_operand.hbm [shape: bf16[512,512], index: 5, kind: input, shape index: {}]   ;;  %s5879_s6 = inlined_call_operand.vmem [shape: f32[1,512], index: 6, kind: input, shape index: {}]   ;;  %s5880_s7 = inlined_call_operand.hbm [shape: bf16[512,256], index: 7, kind: input, shape index: {}]   ;;  %s5881_s8 = inlined_call_operand.vmem [shape: f32[1,256], index: 8, kind: input, shape index: {}]   ;;  %s5882_s9 = inlined_call_operand.vmem [shape: bf16[256,128], index: 9, kind: input, shape index: {}]   ;;  %s5883_s10 = inlined_call_operand.vmem [shape: f32[1,128], index: 10, kind: input, shape index: {}]   ;;  %s5884_s11 = inlined_call_operand.hbm [shape: f32[8,128], index: 11, kind: output, shape index: {}]  }
   0x1   :  { %17 = vsyncpa [#allocation6], 0 }
   0x2   :  { %18 = vsyncpa [#allocation9], 0 }
   0x3   :  { %19 = vsyncpa [#allocation4], 0  ;;  %s5592_s17 = smov [#allocation5]  }
   0x4   :  { %s41_s18 = sshll.u32 %s5592_s17, 4  ;;  %s42_s18 = int_to_ptr.vmem [resolvable:$true] %s41_s18 }
   0x5   :  { %s5492_s19 = scalar_lea.vmem %s42_s18, 32768  ;;  %p5497_p1 = scmp.lt.s32.totalorder %s42_s18, %s42_s18 }
   0x6   :  { %p5493_p0 = scmp.ne.s32.totalorder %s42_s18, %s5492_s19  ;;  %p5498_p2 = scmp.lt.s32.totalorder %s5492_s19, %s5492_s19 }
   0x8   :  { %p5499_p3 = por %p5498_p2, %p5497_p1 }
   0xa   :  { %p5500_p4 = pnand %p5499_p3, %p5493_p0 }
   0xc   :  { %5503 = shalt.err (!%p5500_p4)
}
   0xd   :  { %s5593_s20 = smov 256   ;;  %s5594_s21 = smov 16  }
   0xe   :  { %47 = dma.hbm_to_vmem [thread:$0]  %s5876_s3, 32768, %s42_s18, [#allocation6], %s5593_s20, %s5593_s20, %s5594_s21  }
   0xf   :  { %s5595_s24 = smov [#allocation2]  }
  0x10   :  { %s27_s25 = sshll.u32 %s5595_s24, 4  ;;  %s28_s25 = int_to_ptr.vmem [resolvable:$true] %s27_s25 }
  0x11   :  { %s5512_s26 = scalar_lea.vmem %s28_s25, 8192  ;;  %p5517_p6 = scmp.lt.s32.totalorder %s28_s25, %s28_s25 }
  0x12   :  { %p5513_p5 = scmp.ne.s32.totalorder %s28_s25, %s5512_s26  ;;  %p5518_p7 = scmp.lt.s32.totalorder %s5512_s26, %s5512_s26 }
  0x14   :  { %p5519_p8 = por %p5518_p7, %p5517_p6 }
  0x16   :  { %p5520_p9 = pnand %p5519_p8, %p5513_p5 }
  0x18   :  { %5523 = shalt.err (!%p5520_p9)
}
  0x19   :  { %s5596_s27 = smov 512   ;;  %s5597_s28 = smov 32  }
  0x1a   :  { %33 = dma.hbm_to_vmem [thread:$0]  %s5874_s1, 8192, %s28_s25, [#allocation3], %s5596_s27, %s5596_s27, %s5597_s28  }
  0x1b   :  { %s5598_s12 = smov [#allocation7]   ;;  %s5599_s14 = smov [#allocation8]  }
  0x1c   :  { %s55_s13 = sshll.u32 %s5598_s12, 4  ;;  %s69_s3 = sshll.u32 %s5599_s14, 4  ;;  %s56_s13 = int_to_ptr.vmem [resolvable:$true] %s55_s13  ;;  %s70_s3 = int_to_ptr.vmem [resolvable:$true] %s69_s3 }
  0x1d   :  { %s5532_s15 = scalar_lea.vmem %s56_s13, 16384  ;;  %p5537_p11 = scmp.lt.s32.totalorder %s56_s13, %s56_s13 }
  0x1e   :  { %p5533_p10 = scmp.ne.s32.totalorder %s56_s13, %s5532_s15  ;;  %p5538_p12 = scmp.lt.s32.totalorder %s5532_s15, %s5532_s15 }
  0x20   :  { %p5539_p13 = por %p5538_p12, %p5537_p11 }
  0x22   :  { %p5540_p0 = pnand %p5539_p13, %p5533_p10 }
  0x24   :  { %5543 = shalt.err (!%p5540_p0)
}
  0x25   :  { %61 = dma.hbm_to_vmem [thread:$0]  %s5878_s5, 16384, %s56_s13, [#allocation6], %s5593_s20, %s5593_s20, %s5594_s21  }
  0x26   :  { %s5552_s1 = scalar_lea.vmem %s70_s3, 8192  ;;  %p5557_p2 = scmp.lt.s32.totalorder %s70_s3, %s70_s3 }
  0x27   :  { %p5553_p1 = scmp.ne.s32.totalorder %s70_s3, %s5552_s1  ;;  %p5558_p3 = scmp.lt.s32.totalorder %s5552_s1, %s5552_s1 }
  0x29   :  { %p5559_p4 = por %p5558_p3, %p5557_p2 }
  0x2b   :  { %p5560_p5 = pnand %p5559_p4, %p5553_p1 }
  0x2d   :  { %5563 = shalt.err (!%p5560_p5)
}
  0x2e   :  { %s5600_s18 = smov 128   ;;  %s5601_s19 = smov 8  }
  0x2f   :  { %75 = dma.hbm_to_vmem [thread:$0]  %s5880_s7, 8192, %s70_s3, [#allocation9], %s5600_s18, %s5600_s18, %s5601_s19  }
  0x30   :  { %5584 = dma.done.wait [#allocation3], 8192  }
  0x31   :  { %5585 = vsyncadd [#allocation3], 4294959104 }
  0x32   :  { %5586 = dma.done.wait [#allocation6], 49152  }
  0x33   :  { %5587 = vsyncadd [#allocation6], 4294918144 }
  0x34   :  { %5588 = dma.done.wait [#allocation9], 8192  }
  0x35   :  { %5589 = vsyncadd [#allocation9], 4294959104  ;;  %v5602_v0 = vmov 0   ;;  %v152_v1 = vld [vmem:[#allocation2 + $0x1c0] sm:$0xff]  ;;  %v153_v3 = vld [vmem:[#allocation2 + $0x1c8] sm:$0xff]  ;;  %s5603_s12 = smov [#allocation10]  }
  0x36   :  { %554 = vmatprep.mubr.bf16.mxu0 %v5602_v0  ;;  %595 = vmatprep.mubr.bf16.mxu1 %v5602_v0  ;;  %v156_v2 = vld [vmem:[#allocation2 + $0x1e0] sm:$0xff]  ;;  %v157_v5 = vld [vmem:[#allocation2 + $0x1e8] sm:$0xff]  ;;  %v154_v62 = vld [vmem:[#allocation2 + $0x1d0] sm:$0xff]  ;;  %s4222_s13 = sshll.u32 %s5603_s12, 4  ;;  %s4223_s13 = int_to_ptr.vmem [resolvable:$true] %s4222_s13 }
  0x37   :  { %v4290_v4 = vcombine.high %v152_v1, %v156_v2  ;;  %v4289_v6 = vcombine.low %v152_v1, %v156_v2  ;;  %v144_v7 = vld [vmem:[#allocation2 + $0x180] sm:$0xff]  ;;  %v4292_v9 = vcombine.high %v153_v3, %v157_v5  ;;  %v4291_v10 = vcombine.low %v153_v3, %v157_v5  ;;  %v145_v12 = vld [vmem:[#allocation2 + $0x188] sm:$0xff]  ;;  %v158_v1 = vld [vmem:[#allocation2 + $0x1f0] sm:$0xff]  ;;  %s5564_s14 = scalar_lea.vmem %s4223_s13, 128  ;;  %p5569_p7 = scmp.lt.s32.totalorder %s4223_s13, %s4223_s13 }
  0x38   :  { %v148_v8 = vld [vmem:[#allocation2 + $0x1a0] sm:$0xff]  ;;  %v149_v13 = vld [vmem:[#allocation2 + $0x1a8] sm:$0xff]  ;;  %v155_v2 = vld [vmem:[#allocation2 + $0x1d8] sm:$0xff]  ;;  %p5565_p6 = scmp.ne.s32.totalorder %s4223_s13, %s5564_s14  ;;  %p5570_p8 = scmp.lt.s32.totalorder %s5564_s14, %s5564_s14 }
  0x39   :  { %v4282_v11 = vcombine.high %v144_v7, %v148_v8  ;;  %v136_v14 = vld [vmem:[#allocation2 + $0x140] sm:$0xff]  ;;  %522 = vmatprep.subr.bf16.mxu0 %v4290_v4  ;;  %v4284_v15 = vcombine.high %v145_v12, %v149_v13  ;;  %v137_v17 = vld [vmem:[#allocation2 + $0x148] sm:$0xff]  ;;  %563 = vmatprep.subr.bf16.mxu1 %v4292_v9  ;;  %v4281_v19 = vcombine.low %v144_v7, %v148_v8  ;;  %v159_v3 = vld [vmem:[#allocation2 + $0x1f8] sm:$0xff] }
  0x3a   :  { %v140_v16 = vld [vmem:[#allocation2 + $0x160] sm:$0xff]  ;;  %v141_v18 = vld [vmem:[#allocation2 + $0x168] sm:$0xff]  ;;  %523 = vmatpush1.bf16.msra.mxu0 %v4289_v6  ;;  %564 = vmatpush1.bf16.msra.mxu1 %v4291_v10  ;;  %v4283_v20 = vcombine.low %v145_v12, %v149_v13  ;;  %v4294_v6 = vcombine.high %v154_v62, %v158_v1  ;;  %v146_v7 = vld [vmem:[#allocation2 + $0x190] sm:$0xff]  ;;  %v4296_v8 = vcombine.high %v155_v2, %v159_v3  ;;  %p5571_p9 = por %p5570_p8, %p5569_p7 }
  0x3b   :  { %524 = vmatprep.subr.bf16.mxu0 %v4282_v11  ;;  %v4274_v21 = vcombine.high %v136_v14, %v140_v16  ;;  %565 = vmatprep.subr.bf16.mxu1 %v4284_v15  ;;  %v4276_v22 = vcombine.high %v137_v17, %v141_v18  ;;  %v128_v23 = vld [vmem:[#allocation2 + $0x100] sm:$0xff]  ;;  %v129_v25 = vld [vmem:[#allocation2 + $0x108] sm:$0xff]  ;;  %v4273_v27 = vcombine.low %v136_v14, %v140_v16  ;;  %v150_v9 = vld [vmem:[#allocation2 + $0x1b0] sm:$0xff] }
  0x3c   :  { %v132_v24 = vld [vmem:[#allocation2 + $0x120] sm:$0xff]  ;;  %v133_v26 = vld [vmem:[#allocation2 + $0x128] sm:$0xff]  ;;  %v4275_v28 = vcombine.low %v137_v17, %v141_v18  ;;  %v147_v10 = vld [vmem:[#allocation2 + $0x198] sm:$0xff]  ;;  %v4293_v13 = vcombine.low %v154_v62, %v158_v1  ;;  %v4295_v14 = vcombine.low %v155_v2, %v159_v3  ;;  %v4286_v15 = vcombine.high %v146_v7, %v150_v9  ;;  %p5572_p10 = pnand %p5571_p9, %p5565_p6 }
  0x3d   :  { %v4266_v29 = vcombine.high %v128_v23, %v132_v24  ;;  %v4268_v30 = vcombine.high %v129_v25, %v133_v26  ;;  %v120_v31 = vld [vmem:[#allocation2 + $0xc0] sm:$0xff]  ;;  %v121_v33 = vld [vmem:[#allocation2 + $0xc8] sm:$0xff]  ;;  %v4265_v35 = vcombine.low %v128_v23, %v132_v24  ;;  %v4267_v36 = vcombine.low %v129_v25, %v133_v26  ;;  %v151_v11 = vld [vmem:[#allocation2 + $0x1b8] sm:$0xff] }
  0x3e   :  { %525 = vmatpush1.bf16.msra.mxu0 %v4281_v19  ;;  %566 = vmatpush1.bf16.msra.mxu1 %v4283_v20  ;;  %v124_v32 = vld [vmem:[#allocation2 + $0xe0] sm:$0xff]  ;;  %v125_v34 = vld [vmem:[#allocation2 + $0xe8] sm:$0xff]  ;;  %v138_v16 = vld [vmem:[#allocation2 + $0x150] sm:$0xff]  ;;  %v4288_v17 = vcombine.high %v147_v10, %v151_v11 }
  0x3f   :  { %526 = vmatprep.subr.bf16.mxu0 %v4274_v21  ;;  %567 = vmatprep.subr.bf16.mxu1 %v4276_v22  ;;  %v4258_v37 = vcombine.high %v120_v31, %v124_v32  ;;  %v4260_v38 = vcombine.high %v121_v33, %v125_v34  ;;  %v112_v39 = vld [vmem:[#allocation2 + $0x80] sm:$0xff]  ;;  %v113_v41 = vld [vmem:[#allocation2 + $0x88] sm:$0xff]  ;;  %v4257_v43 = vcombine.low %v120_v31, %v124_v32  ;;  %v142_v18 = vld [vmem:[#allocation2 + $0x170] sm:$0xff] }
  0x40   :  { %v116_v40 = vld [vmem:[#allocation2 + $0xa0] sm:$0xff]  ;;  %v117_v42 = vld [vmem:[#allocation2 + $0xa8] sm:$0xff]  ;;  %v4259_v44 = vcombine.low %v121_v33, %v125_v34  ;;  %v139_v19 = vld [vmem:[#allocation2 + $0x158] sm:$0xff]  ;;  %v4285_v21 = vcombine.low %v146_v7, %v150_v9  ;;  %v4287_v22 = vcombine.low %v147_v10, %v151_v11  ;;  %v4278_v23 = vcombine.high %v138_v16, %v142_v18 }
  0x41   :  { %v4250_v45 = vcombine.high %v112_v39, %v116_v40  ;;  %v4252_v46 = vcombine.high %v113_v41, %v117_v42  ;;  %v104_v47 = vld [vmem:[#allocation2 + $0x40] sm:$0xff]  ;;  %v105_v49 = vld [vmem:[#allocation2 + $0x48] sm:$0xff]  ;;  %v4249_v51 = vcombine.low %v112_v39, %v116_v40  ;;  %v4251_v52 = vcombine.low %v113_v41, %v117_v42  ;;  %v143_v20 = vld [vmem:[#allocation2 + $0x178] sm:$0xff] }
  0x42   :  { %527 = vmatpush1.bf16.msra.mxu0 %v4273_v27  ;;  %568 = vmatpush1.bf16.msra.mxu1 %v4275_v28  ;;  %v108_v48 = vld [vmem:[#allocation2 + $0x60] sm:$0xff]  ;;  %v109_v50 = vld [vmem:[#allocation2 + $0x68] sm:$0xff]  ;;  %v130_v24 = vld [vmem:[#allocation2 + $0x110] sm:$0xff]  ;;  %v4280_v25 = vcombine.high %v139_v19, %v143_v20 }
  0x43   :  { %528 = vmatprep.subr.bf16.mxu0 %v4266_v29  ;;  %569 = vmatprep.subr.bf16.mxu1 %v4268_v30  ;;  %v4242_v53 = vcombine.high %v104_v47, %v108_v48  ;;  %v96_v54 = vld [vmem:[#allocation2] sm:$0xff]  ;;  %v4244_v55 = vcombine.high %v105_v49, %v109_v50  ;;  %v97_v57 = vld [vmem:[#allocation2 + $0x8] sm:$0xff]  ;;  %v4241_v59 = vcombine.low %v104_v47, %v108_v48  ;;  %v134_v26 = vld [vmem:[#allocation2 + $0x130] sm:$0xff] }
  0x44   :  { %v100_v56 = vld [vmem:[#allocation2 + $0x20] sm:$0xff]  ;;  %v101_v58 = vld [vmem:[#allocation2 + $0x28] sm:$0xff]  ;;  %v4243_v60 = vcombine.low %v105_v49, %v109_v50  ;;  %v131_v27 = vld [vmem:[#allocation2 + $0x118] sm:$0xff]  ;;  %v4277_v29 = vcombine.low %v138_v16, %v142_v18  ;;  %v4279_v30 = vcombine.low %v139_v19, %v143_v20  ;;  %v4270_v31 = vcombine.high %v130_v24, %v134_v26 }
  0x45   :  { %v4234_v61 = vcombine.high %v96_v54, %v100_v56  ;;  %v4236_v63 = vcombine.high %v97_v57, %v101_v58  ;;  %v4233_v4 = vcombine.low %v96_v54, %v100_v56  ;;  %v4235_v5 = vcombine.low %v97_v57, %v101_v58  ;;  %v5687_v12 = vld [vmem:[%s5873_s0] sm:$0xf]  ;;  %v135_v28 = vld [vmem:[#allocation2 + $0x138] sm:$0xff]  ;;  %v122_v32 = vld [vmem:[#allocation2 + $0xd0] sm:$0xff] }
  0x46   :  { %529 = vmatpush1.bf16.msra.mxu0 %v4265_v35  ;;  %570 = vmatpush1.bf16.msra.mxu1 %v4267_v36  ;;  %v4272_v33 = vcombine.high %v131_v27, %v135_v28  ;;  %v126_v34 = vld [vmem:[#allocation2 + $0xf0] sm:$0xff]  ;;  %v123_v35 = vld [vmem:[#allocation2 + $0xd8] sm:$0xff] }
  0x47   :  { %530 = vmatprep.subr.bf16.mxu0 %v4258_v37  ;;  %571 = vmatprep.subr.bf16.mxu1 %v4260_v38  ;;  %v127_v36 = vld [vmem:[#allocation2 + $0xf8] sm:$0xff]  ;;  %v4269_v37 = vcombine.low %v130_v24, %v134_v26  ;;  %v4271_v38 = vcombine.low %v131_v27, %v135_v28  ;;  %v4262_v39 = vcombine.high %v122_v32, %v126_v34  ;;  %v114_v40 = vld [vmem:[#allocation2 + $0x90] sm:$0xff] }
  0x48   :  { %v118_v41 = vld [vmem:[#allocation2 + $0xb0] sm:$0xff]  ;;  %v115_v42 = vld [vmem:[#allocation2 + $0x98] sm:$0xff] }
  0x49   :  { %v106_v47 = vld [vmem:[#allocation2 + $0x50] sm:$0xff]  ;;  %v107_v50 = vld [vmem:[#allocation2 + $0x58] sm:$0xff] }
  0x4a   :  { %531 = vmatpush1.bf16.msra.mxu0 %v4257_v43  ;;  %572 = vmatpush1.bf16.msra.mxu1 %v4259_v44  ;;  %v119_v43 = vld [vmem:[#allocation2 + $0xb8] sm:$0xff]  ;;  %v4261_v44 = vcombine.low %v122_v32, %v126_v34  ;;  %v110_v49 = vld [vmem:[#allocation2 + $0x70] sm:$0xff] }
  0x4b   :  { %532 = vmatprep.subr.bf16.mxu0 %v4250_v45  ;;  %573 = vmatprep.subr.bf16.mxu1 %v4252_v46  ;;  %v4263_v45 = vcombine.low %v123_v35, %v127_v36  ;;  %v4254_v46 = vcombine.high %v114_v40, %v118_v41  ;;  %v4256_v48 = vcombine.high %v115_v42, %v119_v43  ;;  %v102_v57 = vld [vmem:[#allocation2 + $0x30] sm:$0xff]  ;;  %v99_v58 = vld [vmem:[#allocation2 + $0x18] sm:$0xff] }
  0x4c   :  { %v4246_v54 = vcombine.high %v106_v47, %v110_v49  ;;  %v4798_v1 = vld [vmem:[#allocation5 + $0xe4] ss:$16 sps:$4 sm:$0xff]   ;;  %v4802_v9 = vld [vmem:[#allocation5 + $0xc0] ss:$16 sps:$4 sm:$0xff]  }
  0x4d   :  { %v4801_v3 = vld [vmem:[#allocation5 + $0x2e4] ss:$16 sps:$4 sm:$0xff]   ;;  %v4805_v10 = vld [vmem:[#allocation5 + $0x2c0] ss:$16 sps:$4 sm:$0xff]  }
  0x4e   :  { %533 = vmatpush1.bf16.msra.mxu0 %v4249_v51  ;;  %574 = vmatpush1.bf16.msra.mxu1 %v4251_v52  ;;  %v111_v51 = vld [vmem:[#allocation2 + $0x78] sm:$0xff]  ;;  %v4253_v52 = vcombine.low %v114_v40, %v118_v41  ;;  %v4804_v7 = vld [vmem:[#allocation5 + $0xc4] ss:$16 sps:$4 sm:$0xff]   ;;  %v4814_v18 = vld [vmem:[#allocation5 + $0x80] ss:$16 sps:$4 sm:$0xff]  }
  0x4f   :  { %534 = vmatprep.subr.bf16.mxu0 %v4242_v53  ;;  %575 = vmatprep.subr.bf16.mxu1 %v4244_v55  ;;  %v4255_v53 = vcombine.low %v115_v42, %v119_v43  ;;  %v98_v55 = vld [vmem:[#allocation2 + $0x10] sm:$0xff]  ;;  %v4248_v56 = vcombine.high %v107_v50, %v111_v51 }
  0x50   :  { %v4238_v62 = vcombine.high %v98_v55, %v102_v57  ;;  %v4237_v2 = vcombine.low %v98_v55, %v102_v57  ;;  %v4810_v11 = vld [vmem:[#allocation5 + $0xa4] ss:$16 sps:$4 sm:$0xff]   ;;  %v4817_v19 = vld [vmem:[#allocation5 + $0x280] ss:$16 sps:$4 sm:$0xff]  }
  0x51   :  { %v4816_v16 = vld [vmem:[#allocation5 + $0x84] ss:$16 sps:$4 sm:$0xff]   ;;  %v4829_v26 = vld [vmem:[#allocation5 + $0x240] ss:$16 sps:$4 sm:$0xff]  }
  0x52   :  { %535 = vmatpush1.bf16.msra.mxu0 %v4241_v59  ;;  %576 = vmatpush1.bf16.msra.mxu1 %v4243_v60  ;;  %v103_v59 = vld [vmem:[#allocation2 + $0x38] sm:$0xff]  ;;  %v4245_v60 = vcombine.low %v106_v47, %v110_v49  ;;  %v4822_v20 = vld [vmem:[#allocation5 + $0x64] ss:$16 sps:$4 sm:$0xff]   ;;  %v4841_v34 = vld [vmem:[#allocation5 + $0x200] ss:$16 sps:$4 sm:$0xff]  }
  0x53   :  { %536 = vmatprep.subr.bf16.mxu0 %v4234_v61  ;;  %577 = vmatprep.subr.bf16.mxu1 %v4236_v63  ;;  %v4247_v61 = vcombine.low %v107_v50, %v111_v51  ;;  %v4240_v63 = vcombine.high %v99_v58, %v103_v59  ;;  %v4831_v24 = vld [vmem:[#allocation5 + $0x244] ss:$16 sps:$4 sm:$0xff]   ;;  %v4853_v41 = vld [vmem:[#allocation5 + $0x3c0] ss:$16 sps:$4 sm:$0xff]  }
  0x54   :  { %v4834_v27 = vld [vmem:[#allocation5 + $0x24] ss:$16 sps:$4 sm:$0xff]   ;;  %v4865_v49 = vld [vmem:[#allocation5 + $0x380] ss:$16 sps:$4 sm:$0xff]  }
  0x55   :  { %v4837_v28 = vld [vmem:[#allocation5 + $0x224] ss:$16 sps:$4 sm:$0xff]   ;;  %v4877_v57 = vld [vmem:[#allocation5 + $0x340] ss:$16 sps:$4 sm:$0xff]  }
  0x56   :  { %537 = vmatpush1.bf16.msra.mxu0 %v4233_v4  ;;  %578 = vmatpush1.bf16.msra.mxu1 %v4235_v5  ;;  %v4239_v4 = vcombine.low %v99_v58, %v103_v59  ;;  %v4796_v5 = vld [vmem:[#allocation5 + $0xe0] ss:$16 sps:$4 sm:$0xff]   ;;  %v4843_v32 = vld [vmem:[#allocation5 + $0x204] ss:$16 sps:$4 sm:$0xff]  }
  0x57   :  { %604 = vmatprep.subr.bf16.mxu0 %v4294_v6  ;;  %645 = vmatprep.subr.bf16.mxu1 %v4296_v8  ;;  %v4799_v6 = vld [vmem:[#allocation5 + $0x2e0] ss:$16 sps:$4 sm:$0xff]   ;;  %v4807_v8 = vld [vmem:[#allocation5 + $0x2c4] ss:$16 sps:$4 sm:$0xff]  }
  0x58   :  { %v4855_v40 = vld [vmem:[#allocation5 + $0x3c4] ss:$16 sps:$4 sm:$0xff]  }
  0x59   :  { %555 = vmatmul.mubr.bf16.vlgmr.msra.gmra.mxu0 %v5687_v12  ;;  %596 = vmatmul.mubr.bf16.vlgmr.msra.gmra.mxu1 %v5687_v12  ;;  %v4858_v42 = vld [vmem:[#allocation5 + $0x1a4] ss:$16 sps:$4 sm:$0xff]  }
  0x5a   :  { %605 = vmatpush1.bf16.msra.mxu0 %v4293_v13  ;;  %646 = vmatpush1.bf16.msra.mxu1 %v4295_v14  ;;  %v4813_v13 = vld [vmem:[#allocation5 + $0x2a4] ss:$16 sps:$4 sm:$0xff]   ;;  %v4808_v14 = vld [vmem:[#allocation5 + $0xa0] ss:$16 sps:$4 sm:$0xff]  }
  0x5b   :  { %606 = vmatprep.subr.bf16.mxu0 %v4286_v15  ;;  %647 = vmatprep.subr.bf16.mxu1 %v4288_v17  ;;  %v4811_v15 = vld [vmem:[#allocation5 + $0x2a0] ss:$16 sps:$4 sm:$0xff]   ;;  %v4819_v17 = vld [vmem:[#allocation5 + $0x284] ss:$16 sps:$4 sm:$0xff]  }
  0x5c   :  { %636 = vmatprep.mubr.bf16.mxu0 %v5602_v0  ;;  %677 = vmatprep.mubr.bf16.mxu1 %v5602_v0  ;;  %v4264_v0 = vcombine.high %v123_v35, %v127_v36  ;;  %v4846_v35 = vld [vmem:[#allocation5 + $0x1e4] ss:$16 sps:$4 sm:$0xff]  }
  0x5d   :  { %v4849_v36 = vld [vmem:[#allocation5 + $0x3e4] ss:$16 sps:$4 sm:$0xff]  }
  0x5e   :  { %607 = vmatpush1.bf16.msra.mxu0 %v4285_v21  ;;  %648 = vmatpush1.bf16.msra.mxu1 %v4287_v22  ;;  %v4825_v21 = vld [vmem:[#allocation5 + $0x264] ss:$16 sps:$4 sm:$0xff]   ;;  %v4823_v22 = vld [vmem:[#allocation5 + $0x260] ss:$16 sps:$4 sm:$0xff]  }
  0x5f   :  { %608 = vmatprep.subr.bf16.mxu0 %v4278_v23  ;;  %649 = vmatprep.subr.bf16.mxu1 %v4280_v25  ;;  %v4828_v23 = vld [vmem:[#allocation5 + $0x44] ss:$16 sps:$4 sm:$0xff]   ;;  %v4826_v25 = vld [vmem:[#allocation5 + $0x40] ss:$16 sps:$4 sm:$0xff]  }
  0x60   :  { %v4861_v43 = vld [vmem:[#allocation5 + $0x3a4] ss:$16 sps:$4 sm:$0xff]  }
  0x61   :  { %v4867_v47 = vld [vmem:[#allocation5 + $0x384] ss:$16 sps:$4 sm:$0xff]  }
  0x62   :  { %609 = vmatpush1.bf16.msra.mxu0 %v4277_v29  ;;  %650 = vmatpush1.bf16.msra.mxu1 %v4279_v30  ;;  %v4832_v29 = vld [vmem:[#allocation5 + $0x20] ss:$16 sps:$4 sm:$0xff]   ;;  %v4870_v50 = vld [vmem:[#allocation5 + $0x164] ss:$16 sps:$4 sm:$0xff]  }
  0x63   :  { %610 = vmatprep.subr.bf16.mxu0 %v4270_v31  ;;  %651 = vmatprep.subr.bf16.mxu1 %v4272_v33  ;;  %v4835_v30 = vld [vmem:[#allocation5 + $0x220] ss:$16 sps:$4 sm:$0xff]   ;;  %v4840_v31 = vld [vmem:[#allocation5 + $0x4] ss:$16 sps:$4 sm:$0xff]  }
  0x64   :  { %v4838_v33 = vld [vmem:[#allocation5] ss:$16 sps:$4 sm:$0xff]   ;;  %v4873_v51 = vld [vmem:[#allocation5 + $0x364] ss:$16 sps:$4 sm:$0xff]  }
  0x65   :  { %v4879_v55 = vld [vmem:[#allocation5 + $0x344] ss:$16 sps:$4 sm:$0xff]  }
  0x66   :  { %611 = vmatpush1.bf16.msra.mxu0 %v4269_v37  ;;  %652 = vmatpush1.bf16.msra.mxu1 %v4271_v38  ;;  %v4844_v37 = vld [vmem:[#allocation5 + $0x1e0] ss:$16 sps:$4 sm:$0xff]   ;;  %v4882_v58 = vld [vmem:[#allocation5 + $0x124] ss:$16 sps:$4 sm:$0xff]  }
  0x67   :  { %612 = vmatprep.subr.bf16.mxu0 %v4262_v39  ;;  %653 = vmatprep.subr.bf16.mxu1 %v4264_v0  ;;  %v4847_v38 = vld [vmem:[#allocation5 + $0x3e0] ss:$16 sps:$4 sm:$0xff]   ;;  %v4852_v39 = vld [vmem:[#allocation5 + $0x1c4] ss:$16 sps:$4 sm:$0xff]  }
  0x68   :  { %v4850_v0 = vld [vmem:[#allocation5 + $0x1c0] ss:$16 sps:$4 sm:$0xff]   ;;  %v4885_v59 = vld [vmem:[#allocation5 + $0x324] ss:$16 sps:$4 sm:$0xff]  }
  0x6a   :  { %613 = vmatpush1.bf16.msra.mxu0 %v4261_v44  ;;  %654 = vmatpush1.bf16.msra.mxu1 %v4263_v45  ;;  %v4856_v44 = vld [vmem:[#allocation5 + $0x1a0] ss:$16 sps:$4 sm:$0xff]  }
  0x6b   :  { %614 = vmatprep.subr.bf16.mxu0 %v4254_v46  ;;  %655 = vmatprep.subr.bf16.mxu1 %v4256_v48  ;;  %v4859_v45 = vld [vmem:[#allocation5 + $0x3a0] ss:$16 sps:$4 sm:$0xff]   ;;  %v4864_v46 = vld [vmem:[#allocation5 + $0x184] ss:$16 sps:$4 sm:$0xff]  }
  0x6c   :  { %v4862_v48 = vld [vmem:[#allocation5 + $0x180] ss:$16 sps:$4 sm:$0xff]  }
  0x6e   :  { %615 = vmatpush1.bf16.msra.mxu0 %v4253_v52  ;;  %656 = vmatpush1.bf16.msra.mxu1 %v4255_v53  ;;  %v4868_v52 = vld [vmem:[#allocation5 + $0x160] ss:$16 sps:$4 sm:$0xff]  }
  0x6f   :  { %616 = vmatprep.subr.bf16.mxu0 %v4246_v54  ;;  %657 = vmatprep.subr.bf16.mxu1 %v4248_v56  ;;  %v4871_v53 = vld [vmem:[#allocation5 + $0x360] ss:$16 sps:$4 sm:$0xff]   ;;  %v4876_v54 = vld [vmem:[#allocation5 + $0x144] ss:$16 sps:$4 sm:$0xff]  }
  0x70   :  { %v4874_v56 = vld [vmem:[#allocation5 + $0x140] ss:$16 sps:$4 sm:$0xff]  }
  0x72   :  { %617 = vmatpush1.bf16.msra.mxu0 %v4245_v60  ;;  %658 = vmatpush1.bf16.msra.mxu1 %v4247_v61  ;;  %v4880_v60 = vld [vmem:[#allocation5 + $0x120] ss:$16 sps:$4 sm:$0xff]  }
  0x73   :  { %618 = vmatprep.subr.bf16.mxu0 %v4238_v62  ;;  %659 = vmatprep.subr.bf16.mxu1 %v4240_v63  ;;  %v4883_v61 = vld [vmem:[#allocation5 + $0x320] ss:$16 sps:$4 sm:$0xff]   ;;  %v4888_v62 = vld [vmem:[#allocation5 + $0x104] ss:$16 sps:$4 sm:$0xff]  }
  0x74   :  { %v4891_v63 = vld [vmem:[#allocation5 + $0x304] ss:$16 sps:$4 sm:$0xff]  }
  0x76   :  { %619 = vmatpush1.bf16.msra.mxu0 %v4237_v2  ;;  %660 = vmatpush1.bf16.msra.mxu1 %v4239_v4  ;;  %v4889_v2 = vld [vmem:[#allocation5 + $0x300] ss:$16 sps:$4 sm:$0xff]   ;;  %v4897_v4 = vld [vmem:[#allocation5 + $0x6e4] ss:$16 sps:$4 sm:$0xff]  }
  0x77   :  { %2260 = vmatprep.subr.bf16.mxu0 %v4798_v1  ;;  %2301 = vmatprep.subr.bf16.mxu1 %v4801_v3  ;;  %v4886_v1 = vld [vmem:[#allocation5 + $0x100] ss:$16 sps:$4 sm:$0xff]   ;;  %v4894_v3 = vld [vmem:[#allocation5 + $0x4e4] ss:$16 sps:$4 sm:$0xff]  }
  0x79   :  { %637 = vmatmul.mubr.bf16.vlgmr.msra.gmra.mxu0 %v5687_v12  ;;  %678 = vmatmul.mubr.bf16.vlgmr.msra.gmra.mxu1 %v5687_v12  ;;  %v4820_v12 = vld [vmem:[#allocation5 + $0x60] ss:$16 sps:$4 sm:$0xff]  }
  0x7a   :  { %2261 = vmatpush1.bf16.msra.mxu0 %v4796_v5  ;;  %2302 = vmatpush1.bf16.msra.mxu1 %v4799_v6  ;;  %v162_v5 = vlaneseq }
  0x7b   :  { %2262 = vmatprep.subr.bf16.mxu0 %v4804_v7  ;;  %2303 = vmatprep.subr.bf16.mxu1 %v4807_v8  ;;  %v5700_v7 = vld [vmem:[%s5875_s2] sm:$0xff] }
  0x7c   :  { %v5695_v6 = vshrl.u32 %v162_v5, 7 }
  0x7e   :  { %2263 = vmatpush1.bf16.msra.mxu0 %v4802_v9  ;;  %2304 = vmatpush1.bf16.msra.mxu1 %v4805_v10  ;;  %v5703_v8 = vsub.s32 0, %v5695_v6  ;;  %v5706_v9 = vsub.s32 2, %v5695_v6  ;;  %v5709_v10 = vsub.s32 1, %v5695_v6 }
  0x7f   :  { %2264 = vmatprep.subr.bf16.mxu0 %v4810_v11  ;;  %2305 = vmatprep.subr.bf16.mxu1 %v4813_v13  ;;  %v5712_v11 = vsub.s32 3, %v5695_v6 }
  0x80   :  { %v165_v13 = vrot.slane %v5700_v7, %v5703_v8 }
  0x82   :  { %2265 = vmatpush1.bf16.msra.mxu0 %v4808_v14  ;;  %2306 = vmatpush1.bf16.msra.mxu1 %v4811_v15  ;;  %v173_v14 = vrot.slane %v5700_v7, %v5706_v9  ;;  %v169_v15 = vrot.slane %v5700_v7, %v5709_v10 }
  0x83   :  { %2266 = vmatprep.subr.bf16.mxu0 %v4816_v16  ;;  %2307 = vmatprep.subr.bf16.mxu1 %v4819_v17  ;;  %v177_v17 = vrot.slane %v5700_v7, %v5712_v11 }
  0x86   :  { %2267 = vmatpush1.bf16.msra.mxu0 %v4814_v18  ;;  %2308 = vmatpush1.bf16.msra.mxu1 %v4817_v19 }
  0x87   :  { %2268 = vmatprep.subr.bf16.mxu0 %v4822_v20  ;;  %2309 = vmatprep.subr.bf16.mxu1 %v4825_v21 }
  0x8a   :  { %2269 = vmatpush1.bf16.msra.mxu0 %v4820_v12  ;;  %2310 = vmatpush1.bf16.msra.mxu1 %v4823_v22 }
  0x8b   :  { %2270 = vmatprep.subr.bf16.mxu0 %v4828_v23  ;;  %2311 = vmatprep.subr.bf16.mxu1 %v4831_v24 }
  0x8e   :  { %2271 = vmatpush1.bf16.msra.mxu0 %v4826_v25  ;;  %2312 = vmatpush1.bf16.msra.mxu1 %v4829_v26 }
  0x8f   :  { %2272 = vmatprep.subr.bf16.mxu0 %v4834_v27  ;;  %2313 = vmatprep.subr.bf16.mxu1 %v4837_v28 }
  0x92   :  { %2273 = vmatpush1.bf16.msra.mxu0 %v4832_v29  ;;  %2314 = vmatpush1.bf16.msra.mxu1 %v4835_v30  ;;  %v4892_v29 = vld [vmem:[#allocation5 + $0x4e0] ss:$16 sps:$4 sm:$0xff]  }
  0x93   :  { %2274 = vmatprep.subr.bf16.mxu0 %v4840_v31  ;;  %2315 = vmatprep.subr.bf16.mxu1 %v4843_v32  ;;  %v4895_v32 = vld [vmem:[#allocation5 + $0x6e0] ss:$16 sps:$4 sm:$0xff]  }
  0x96   :  { %2275 = vmatpush1.bf16.msra.mxu0 %v4838_v33  ;;  %2316 = vmatpush1.bf16.msra.mxu1 %v4841_v34  ;;  %v4900_v33 = vld [vmem:[#allocation5 + $0x4c4] ss:$16 sps:$4 sm:$0xff]  }
  0x97   :  { %2276 = vmatprep.subr.bf16.mxu0 %v4846_v35  ;;  %2317 = vmatprep.subr.bf16.mxu1 %v4849_v36 }
  0x9a   :  { %2277 = vmatpush2.bf16.msra.mxu0 %v4844_v37  ;;  %2318 = vmatpush2.bf16.msra.mxu1 %v4847_v38  ;;  %v4903_v37 = vld [vmem:[#allocation5 + $0x6c4] ss:$16 sps:$4 sm:$0xff]  }
  0x9b   :  { %2278 = vmatprep.subr.bf16.mxu0 %v4852_v39  ;;  %2319 = vmatprep.subr.bf16.mxu1 %v4855_v40  ;;  %v4898_v40 = vld [vmem:[#allocation5 + $0x4c0] ss:$16 sps:$4 sm:$0xff]  }
  0x9e   :  { %2279 = vmatpush2.bf16.msra.mxu0 %v4850_v0  ;;  %2320 = vmatpush2.bf16.msra.mxu1 %v4853_v41  ;;  %v4901_v0 = vld [vmem:[#allocation5 + $0x6c0] ss:$16 sps:$4 sm:$0xff]   ;;  %v4906_v41 = vld [vmem:[#allocation5 + $0x4a4] ss:$16 sps:$4 sm:$0xff]  }
  0x9f   :  { %2280 = vmatprep.subr.bf16.mxu0 %v4858_v42  ;;  %2321 = vmatprep.subr.bf16.mxu1 %v4861_v43  ;;  %v4909_v42 = vld [vmem:[#allocation5 + $0x6a4] ss:$16 sps:$4 sm:$0xff]   ;;  %v4904_v43 = vld [vmem:[#allocation5 + $0x4a0] ss:$16 sps:$4 sm:$0xff]  }
  0xa2   :  { %2281 = vmatpush2.bf16.msra.mxu0 %v4856_v44  ;;  %2322 = vmatpush2.bf16.msra.mxu1 %v4859_v45  ;;  %v4907_v44 = vld [vmem:[#allocation5 + $0x6a0] ss:$16 sps:$4 sm:$0xff]   ;;  %v4912_v45 = vld [vmem:[#allocation5 + $0x484] ss:$16 sps:$4 sm:$0xff]  }
  0xa3   :  { %2282 = vmatprep.subr.bf16.mxu0 %v4864_v46  ;;  %2323 = vmatprep.subr.bf16.mxu1 %v4867_v47  ;;  %v4910_v46 = vld [vmem:[#allocation5 + $0x480] ss:$16 sps:$4 sm:$0xff]   ;;  %v4915_v47 = vld [vmem:[#allocation5 + $0x684] ss:$16 sps:$4 sm:$0xff]  }
  0xa6   :  { %2283 = vmatpush2.bf16.msra.mxu0 %v4862_v48  ;;  %2324 = vmatpush2.bf16.msra.mxu1 %v4865_v49  ;;  %v4913_v48 = vld [vmem:[#allocation5 + $0x680] ss:$16 sps:$4 sm:$0xff]   ;;  %v4918_v49 = vld [vmem:[#allocation5 + $0x464] ss:$16 sps:$4 sm:$0xff]  }
  0xa7   :  { %2284 = vmatprep.subr.bf16.mxu0 %v4870_v50  ;;  %2325 = vmatprep.subr.bf16.mxu1 %v4873_v51  ;;  %v4916_v50 = vld [vmem:[#allocation5 + $0x460] ss:$16 sps:$4 sm:$0xff]   ;;  %v4921_v51 = vld [vmem:[#allocation5 + $0x664] ss:$16 sps:$4 sm:$0xff]  }
  0xaa   :  { %2285 = vmatpush2.bf16.msra.mxu0 %v4868_v52  ;;  %2326 = vmatpush2.bf16.msra.mxu1 %v4871_v53  ;;  %v4919_v52 = vld [vmem:[#allocation5 + $0x660] ss:$16 sps:$4 sm:$0xff]   ;;  %v4924_v53 = vld [vmem:[#allocation5 + $0x444] ss:$16 sps:$4 sm:$0xff]  }
  0xab   :  { %2286 = vmatprep.subr.bf16.mxu0 %v4876_v54  ;;  %2327 = vmatprep.subr.bf16.mxu1 %v4879_v55  ;;  %v4927_v54 = vld [vmem:[#allocation5 + $0x644] ss:$16 sps:$4 sm:$0xff]   ;;  %v4922_v55 = vld [vmem:[#allocation5 + $0x440] ss:$16 sps:$4 sm:$0xff]  }
  0xae   :  { %2287 = vmatpush2.bf16.msra.mxu0 %v4874_v56  ;;  %2328 = vmatpush2.bf16.msra.mxu1 %v4877_v57  ;;  %v184_v56 = vsub.s32 5, %v5695_v6  ;;  %v4925_v57 = vld [vmem:[#allocation5 + $0x640] ss:$16 sps:$4 sm:$0xff]  }
  0xaf   :  { %2288 = vmatprep.subr.bf16.mxu0 %v4882_v58  ;;  %2329 = vmatprep.subr.bf16.mxu1 %v4885_v59  ;;  %v4930_v58 = vld [vmem:[#allocation5 + $0x424] ss:$16 sps:$4 sm:$0xff]   ;;  %v192_v59 = vsub.s32 7, %v5695_v6 }
  0xb2   :  { %2289 = vmatpush2.bf16.msra.mxu0 %v4880_v60  ;;  %2330 = vmatpush2.bf16.msra.mxu1 %v4883_v61  ;;  %v4933_v60 = vld [vmem:[#allocation5 + $0x624] ss:$16 sps:$4 sm:$0xff]   ;;  %v4928_v61 = vld [vmem:[#allocation5 + $0x420] ss:$16 sps:$4 sm:$0xff]  }
  0xb3   :  { %2290 = vmatprep.subr.bf16.mxu0 %v4888_v62  ;;  %2331 = vmatprep.subr.bf16.mxu1 %v4891_v63  ;;  %v185_v62 = vrot.slane %v5700_v7, %v184_v56  ;;  %v4931_v63 = vld [vmem:[#allocation5 + $0x620] ss:$16 sps:$4 sm:$0xff]  }
  0xb4   :  { %v4973_v56 = vld [vmem:[#allocation5 + $0x740] ss:$16 sps:$4 sm:$0xff]  }
  0xb6   :  { %2291 = vmatpush2.bf16.msra.mxu0 %v4886_v1  ;;  %2332 = vmatpush2.bf16.msra.mxu1 %v4889_v2  ;;  %v4936_v1 = vld [vmem:[#allocation5 + $0x404] ss:$16 sps:$4 sm:$0xff]  }
  0xb7   :  { %2342 = vmatprep.subr.bf16.mxu0 %v4894_v3  ;;  %2383 = vmatprep.subr.bf16.mxu1 %v4897_v4  ;;  %v193_v3 = vrot.slane %v5700_v7, %v192_v59  ;;  %v4939_v4 = vld [vmem:[#allocation5 + $0x604] ss:$16 sps:$4 sm:$0xff]  }
 0x119   :  { %v556_v16 = vpop.f32.mrf.mxu0  ;;  %v597_v19 = vpop.f32.mrf.mxu1 }
 0x11a   :  { %v557_v18 = vadd.f32 %v556_v16, %v165_v13  ;;  %v598_v20 = vadd.f32 %v597_v19, %v173_v14  ;;  %v4934_v14 = vld [vmem:[#allocation5 + $0x400] ss:$16 sps:$4 sm:$0xff]  }
 0x11b   :  { %v558_v21 = vpop.f32.mrf.mxu0  ;;  %v599_v22 = vpop.f32.mrf.mxu1 }
 0x11c   :  { %v559_v12 = vadd.f32 %v558_v21, %v169_v15  ;;  %v686_v23 = vmax.f32 %v557_v18, 0.0  ;;  %v688_v24 = vmax.f32 %v598_v20, 0.0  ;;  %v600_v25 = vadd.f32 %v599_v22, %v177_v17  ;;  %v4937_v17 = vld [vmem:[#allocation5 + $0x600] ss:$16 sps:$4 sm:$0xff]   ;;  %v4942_v18 = vld [vmem:[#allocation5 + $0x5e4] ss:$16 sps:$4 sm:$0xff]  }
 0x11d   :  { %v560_v26 = vpop.f32.mrf.mxu0  ;;  %v601_v28 = vpop.f32.mrf.mxu1  ;;  %v4945_v21 = vld [vmem:[#allocation5 + $0x7e4] ss:$16 sps:$4 sm:$0xff]  }
 0x11e   :  { %v687_v27 = vmax.f32 %v559_v12, 0.0  ;;  %v689_v30 = vmax.f32 %v600_v25, 0.0  ;;  %v5722_v34 = vpack.c.bf16 %v688_v24, %v688_v24  ;;  %v5726_v38 = vpack.c.bf16 %v686_v23, %v686_v23  ;;  %v4940_v25 = vld [vmem:[#allocation5 + $0x5e0] ss:$16 sps:$4 sm:$0xff]  }
 0x11f   :  { %v561_v31 = vpop.f32.mrf.mxu0  ;;  %v602_v36 = vpop.f32.mrf.mxu1  ;;  %v4943_v28 = vld [vmem:[#allocation5 + $0x7e0] ss:$16 sps:$4 sm:$0xff]  }
 0x120   :  { %v5724_v35 = vpack.c.bf16 %v687_v27, %v687_v27  ;;  %v5728_v39 = vpack.c.bf16 %v689_v30, %v689_v30  ;;  %v4951_v31 = vld [vmem:[#allocation5 + $0x7c4] ss:$16 sps:$4 sm:$0xff]  }
 0x121   :  { %v4954_v36 = vld [vmem:[#allocation5 + $0x5a4] ss:$16 sps:$4 sm:$0xff]  }
 0x122   :  { %2292 = vmatprep.mubr.bf16.mxu0 %v5724_v35  ;;  %2333 = vmatprep.mubr.bf16.mxu1 %v5728_v39 }
 0x123   :  { %2293 = vmatmul.mubr.bf16.vlgmr.msra.gmra.mxu0 %v5726_v38  ;;  %2334 = vmatmul.mubr.bf16.vlgmr.msra.gmra.mxu1 %v5722_v34 }
 0x124   :  { %2343 = vmatpush1.bf16.msra.mxu0 %v4892_v29  ;;  %2384 = vmatpush1.bf16.msra.mxu1 %v4895_v32  ;;  %v4948_v29 = vld [vmem:[#allocation5 + $0x5c4] ss:$16 sps:$4 sm:$0xff]   ;;  %v4946_v32 = vld [vmem:[#allocation5 + $0x5c0] ss:$16 sps:$4 sm:$0xff]  }
 0x125   :  { %2344 = vmatprep.subr.bf16.mxu0 %v4900_v33  ;;  %2385 = vmatprep.subr.bf16.mxu1 %v4903_v37  ;;  %v4949_v33 = vld [vmem:[#allocation5 + $0x7c0] ss:$16 sps:$4 sm:$0xff]   ;;  %v4957_v37 = vld [vmem:[#allocation5 + $0x7a4] ss:$16 sps:$4 sm:$0xff]  }
 0x128   :  { %2345 = vmatpush1.bf16.msra.mxu0 %v4898_v40  ;;  %2386 = vmatpush1.bf16.msra.mxu1 %v4901_v0  ;;  %v4952_v40 = vld [vmem:[#allocation5 + $0x5a0] ss:$16 sps:$4 sm:$0xff]  }
 0x129   :  { %2346 = vmatprep.subr.bf16.mxu0 %v4906_v41  ;;  %2387 = vmatprep.subr.bf16.mxu1 %v4909_v42  ;;  %v4955_v0 = vld [vmem:[#allocation5 + $0x7a0] ss:$16 sps:$4 sm:$0xff]   ;;  %v4960_v41 = vld [vmem:[#allocation5 + $0x584] ss:$16 sps:$4 sm:$0xff]  }
 0x12a   :  { %v4963_v42 = vld [vmem:[#allocation5 + $0x784] ss:$16 sps:$4 sm:$0xff]  }
 0x12c   :  { %2347 = vmatpush1.bf16.msra.mxu0 %v4904_v43  ;;  %2388 = vmatpush1.bf16.msra.mxu1 %v4907_v44  ;;  %v4958_v43 = vld [vmem:[#allocation5 + $0x580] ss:$16 sps:$4 sm:$0xff]  }
 0x12d   :  { %2348 = vmatprep.subr.bf16.mxu0 %v4912_v45  ;;  %2389 = vmatprep.subr.bf16.mxu1 %v4915_v47  ;;  %v4961_v44 = vld [vmem:[#allocation5 + $0x780] ss:$16 sps:$4 sm:$0xff]   ;;  %v4966_v45 = vld [vmem:[#allocation5 + $0x564] ss:$16 sps:$4 sm:$0xff]  }
 0x12e   :  { %v4964_v47 = vld [vmem:[#allocation5 + $0x560] ss:$16 sps:$4 sm:$0xff]  }
 0x130   :  { %2349 = vmatpush1.bf16.msra.mxu0 %v4910_v46  ;;  %2390 = vmatpush1.bf16.msra.mxu1 %v4913_v48  ;;  %v4969_v46 = vld [vmem:[#allocation5 + $0x764] ss:$16 sps:$4 sm:$0xff]   ;;  %v188_v48 = vsub.s32 6, %v5695_v6 }
 0x131   :  { %2350 = vmatprep.subr.bf16.mxu0 %v4918_v49  ;;  %2391 = vmatprep.subr.bf16.mxu1 %v4921_v51  ;;  %v4967_v49 = vld [vmem:[#allocation5 + $0x760] ss:$16 sps:$4 sm:$0xff]   ;;  %v4972_v51 = vld [vmem:[#allocation5 + $0x544] ss:$16 sps:$4 sm:$0xff]  }
 0x134   :  { %2351 = vmatpush1.bf16.msra.mxu0 %v4916_v50  ;;  %2392 = vmatpush1.bf16.msra.mxu1 %v4919_v52  ;;  %v180_v50 = vsub.s32 4, %v5695_v6  ;;  %v4975_v52 = vld [vmem:[#allocation5 + $0x744] ss:$16 sps:$4 sm:$0xff]  }
 0x135   :  { %2352 = vmatprep.subr.bf16.mxu0 %v4924_v53  ;;  %2393 = vmatprep.subr.bf16.mxu1 %v4927_v54  ;;  %v189_v53 = vrot.slane %v5700_v7, %v188_v48  ;;  %v4970_v54 = vld [vmem:[#allocation5 + $0x540] ss:$16 sps:$4 sm:$0xff]   ;;  %v5041_v48 = vld [vmem:[#allocation5 + $0x3ec] ss:$16 sps:$4 sm:$0xff]  }
 0x138   :  { %2353 = vmatpush1.bf16.msra.mxu0 %v4922_v55  ;;  %2394 = vmatpush1.bf16.msra.mxu1 %v4925_v57  ;;  %v181_v55 = vrot.slane %v5700_v7, %v180_v50  ;;  %v4978_v57 = vld [vmem:[#allocation5 + $0x524] ss:$16 sps:$4 sm:$0xff]   ;;  %v4982_v7 = vld [vmem:[#allocation5 + $0x500] ss:$16 sps:$4 sm:$0xff]   ;;  %v5039_v50 = vld [vmem:[#allocation5 + $0x3e8] ss:$16 sps:$4 sm:$0xff]  }
 0x139   :  { %2354 = vmatprep.subr.bf16.mxu0 %v4930_v58  ;;  %v5737_v2 = vpop.f32.mrf.mxu0  ;;  %2395 = vmatprep.subr.bf16.mxu1 %v4933_v60  ;;  %v5740_v5 = vpop.f32.mrf.mxu1  ;;  %v4981_v58 = vld [vmem:[#allocation5 + $0x724] ss:$16 sps:$4 sm:$0xff]   ;;  %v4976_v60 = vld [vmem:[#allocation5 + $0x520] ss:$16 sps:$4 sm:$0xff]  }
 0x13a   :  { %v680_v59 = vadd.f32 %v5740_v5, %v189_v53  ;;  %v639_v6 = vadd.f32 %v5737_v2, %v181_v55  ;;  %v4993_v5 = vld [vmem:[#allocation5 + $0x2ec] ss:$16 sps:$4 sm:$0xff]   ;;  %v4988_v2 = vld [vmem:[#allocation5 + $0xe8] ss:$16 sps:$4 sm:$0xff]  }
 0x13b   :  { %v640_v13 = vpop.f32.mrf.mxu0  ;;  %v681_v16 = vpop.f32.mrf.mxu1  ;;  %v5042_v53 = vld [vmem:[#allocation5 + $0x1c8] ss:$16 sps:$4 sm:$0xff]   ;;  %v5050_v55 = vld [vmem:[#allocation5 + $0x1ac] ss:$16 sps:$4 sm:$0xff]  }
 0x13c   :  { %2355 = vmatpush1.bf16.msra.mxu0 %v4928_v61  ;;  %v641_v15 = vadd.f32 %v640_v13, %v185_v62  ;;  %2396 = vmatpush1.bf16.msra.mxu1 %v4931_v63  ;;  %v682_v20 = vadd.f32 %v681_v16, %v193_v3  ;;  %v4979_v61 = vld [vmem:[#allocation5 + $0x720] ss:$16 sps:$4 sm:$0xff]   ;;  %v4984_v62 = vld [vmem:[#allocation5 + $0x504] ss:$16 sps:$4 sm:$0xff]   ;;  %v690_v3 = vmax.f32 %v639_v6, 0.0 }
 0x13d   :  { %2356 = vmatprep.subr.bf16.mxu0 %v4936_v1  ;;  %v642_v19 = vpop.f32.mrf.mxu0  ;;  %2397 = vmatprep.subr.bf16.mxu1 %v4939_v4  ;;  %v683_v22 = vpop.f32.mrf.mxu1  ;;  %v4987_v63 = vld [vmem:[#allocation5 + $0x704] ss:$16 sps:$4 sm:$0xff]   ;;  %v692_v1 = vmax.f32 %v680_v59, 0.0  ;;  %v4985_v4 = vld [vmem:[#allocation5 + $0x700] ss:$16 sps:$4 sm:$0xff]  }
 0x13e   :  { %v691_v12 = vmax.f32 %v641_v15, 0.0  ;;  %v693_v23 = vmax.f32 %v682_v20, 0.0  ;;  %v4990_v13 = vld [vmem:[#allocation5 + $0xec] ss:$16 sps:$4 sm:$0xff]   ;;  %v5756_v15 = vpack.c.bf16 %v690_v3, %v690_v3  ;;  %v4991_v16 = vld [vmem:[#allocation5 + $0x2e8] ss:$16 sps:$4 sm:$0xff]  }
 0x13f   :  { %v643_v24 = vpop.f32.mrf.mxu0  ;;  %v684_v27 = vpop.f32.mrf.mxu1  ;;  %v4994_v19 = vld [vmem:[#allocation5 + $0xc8] ss:$16 sps:$4 sm:$0xff]   ;;  %v5056_v59 = vld [vmem:[#allocation5 + $0x18c] ss:$16 sps:$4 sm:$0xff]  }
 0x140   :  { %2357 = vmatpush1.bf16.msra.mxu0 %v4934_v14  ;;  %v5742_v26 = vpack.c.bf16 %v691_v12, %v691_v12  ;;  %2398 = vmatpush1.bf16.msra.mxu1 %v4937_v17  ;;  %v5744_v30 = vpack.c.bf16 %v693_v23, %v693_v23  ;;  %v5754_v14 = vpack.c.bf16 %v692_v1, %v692_v1  ;;  %v4996_v17 = vld [vmem:[#allocation5 + $0xcc] ss:$16 sps:$4 sm:$0xff]   ;;  %v4997_v20 = vld [vmem:[#allocation5 + $0x2c8] ss:$16 sps:$4 sm:$0xff]  }
 0x141   :  { %2358 = vmatprep.subr.bf16.mxu0 %v4942_v18  ;;  %2399 = vmatprep.subr.bf16.mxu1 %v4945_v21  ;;  %v4999_v18 = vld [vmem:[#allocation5 + $0x2cc] ss:$16 sps:$4 sm:$0xff]   ;;  %v5000_v22 = vld [vmem:[#allocation5 + $0xa8] ss:$16 sps:$4 sm:$0xff]  }
 0x142   :  { %2374 = vmatprep.mubr.bf16.mxu0 %v5742_v26  ;;  %2415 = vmatprep.mubr.bf16.mxu1 %v5744_v30  ;;  %v5002_v21 = vld [vmem:[#allocation5 + $0xac] ss:$16 sps:$4 sm:$0xff]   ;;  %v5003_v23 = vld [vmem:[#allocation5 + $0x2a8] ss:$16 sps:$4 sm:$0xff]  }
 0x143   :  { %v5005_v12 = vld [vmem:[#allocation5 + $0x2ac] ss:$16 sps:$4 sm:$0xff]   ;;  %v5006_v27 = vld [vmem:[#allocation5 + $0x88] ss:$16 sps:$4 sm:$0xff]  }
 0x144   :  { %2359 = vmatpush2.bf16.msra.mxu0 %v4940_v25  ;;  %2400 = vmatpush2.bf16.msra.mxu1 %v4943_v28  ;;  %v5008_v24 = vld [vmem:[#allocation5 + $0x8c] ss:$16 sps:$4 sm:$0xff]   ;;  %v5054_v6 = vld [vmem:[#allocation5 + $0x188] ss:$16 sps:$4 sm:$0xff]  }
 0x145   :  { %2360 = vmatprep.subr.bf16.mxu0 %v4948_v29  ;;  %2401 = vmatprep.subr.bf16.mxu1 %v4951_v31  ;;  %v5011_v25 = vld [vmem:[#allocation5 + $0x28c] ss:$16 sps:$4 sm:$0xff]   ;;  %v5015_v31 = vld [vmem:[#allocation5 + $0x268] ss:$16 sps:$4 sm:$0xff]  }
 0x146   :  { %v5014_v28 = vld [vmem:[#allocation5 + $0x6c] ss:$16 sps:$4 sm:$0xff]   ;;  %v5060_v1 = vld [vmem:[#allocation5 + $0x168] ss:$16 sps:$4 sm:$0xff]  }
 0x147   :  { %v5017_v29 = vld [vmem:[#allocation5 + $0x26c] ss:$16 sps:$4 sm:$0xff]  }
 0x148   :  { %2361 = vmatpush2.bf16.msra.mxu0 %v4946_v32  ;;  %2402 = vmatpush2.bf16.msra.mxu1 %v4949_v33  ;;  %v5020_v32 = vld [vmem:[#allocation5 + $0x4c] ss:$16 sps:$4 sm:$0xff]  }
 0x149   :  { %2362 = vmatprep.subr.bf16.mxu0 %v4954_v36  ;;  %2403 = vmatprep.subr.bf16.mxu1 %v4957_v37  ;;  %v5023_v33 = vld [vmem:[#allocation5 + $0x24c] ss:$16 sps:$4 sm:$0xff]   ;;  %v5018_v36 = vld [vmem:[#allocation5 + $0x48] ss:$16 sps:$4 sm:$0xff]  }
 0x14a   :  { %v5021_v37 = vld [vmem:[#allocation5 + $0x248] ss:$16 sps:$4 sm:$0xff]   ;;  %v5068_v3 = vld [vmem:[#allocation5 + $0x14c] ss:$16 sps:$4 sm:$0xff]  }
 0x14c   :  { %2363 = vmatpush2.bf16.msra.mxu0 %v4952_v40  ;;  %2404 = vmatpush2.bf16.msra.mxu1 %v4955_v0  ;;  %v5026_v40 = vld [vmem:[#allocation5 + $0x2c] ss:$16 sps:$4 sm:$0xff]  }
 0x14d   :  { %2364 = vmatprep.subr.bf16.mxu0 %v4960_v41  ;;  %2405 = vmatprep.subr.bf16.mxu1 %v4963_v42  ;;  %v5029_v0 = vld [vmem:[#allocation5 + $0x22c] ss:$16 sps:$4 sm:$0xff]   ;;  %v5024_v41 = vld [vmem:[#allocation5 + $0x28] ss:$16 sps:$4 sm:$0xff]  }
 0x14e   :  { %v5027_v42 = vld [vmem:[#allocation5 + $0x228] ss:$16 sps:$4 sm:$0xff]  }
 0x150   :  { %2365 = vmatpush2.bf16.msra.mxu0 %v4958_v43  ;;  %2406 = vmatpush2.bf16.msra.mxu1 %v4961_v44  ;;  %v5032_v43 = vld [vmem:[#allocation5 + $0xc] ss:$16 sps:$4 sm:$0xff]  }
 0x151   :  { %2366 = vmatprep.subr.bf16.mxu0 %v4966_v45  ;;  %2407 = vmatprep.subr.bf16.mxu1 %v4969_v46  ;;  %v5035_v44 = vld [vmem:[#allocation5 + $0x20c] ss:$16 sps:$4 sm:$0xff]   ;;  %v5030_v45 = vld [vmem:[#allocation5 + $0x8] ss:$16 sps:$4 sm:$0xff]  }
 0x152   :  { %v5033_v46 = vld [vmem:[#allocation5 + $0x208] ss:$16 sps:$4 sm:$0xff]  }
 0x154   :  { %2367 = vmatpush2.bf16.msra.mxu0 %v4964_v47  ;;  %2408 = vmatpush2.bf16.msra.mxu1 %v4967_v49  ;;  %v5038_v47 = vld [vmem:[#allocation5 + $0x1ec] ss:$16 sps:$4 sm:$0xff]   ;;  %v5036_v49 = vld [vmem:[#allocation5 + $0x1e8] ss:$16 sps:$4 sm:$0xff]  }
 0x155   :  { %2368 = vmatprep.subr.bf16.mxu0 %v4972_v51  ;;  %2409 = vmatprep.subr.bf16.mxu1 %v4975_v52  ;;  %v5044_v51 = vld [vmem:[#allocation5 + $0x1cc] ss:$16 sps:$4 sm:$0xff]  }
 0x156   :  { %v5047_v52 = vld [vmem:[#allocation5 + $0x3cc] ss:$16 sps:$4 sm:$0xff]  }
 0x158   :  { %2369 = vmatpush2.bf16.msra.mxu0 %v4970_v54  ;;  %2410 = vmatpush2.bf16.msra.mxu1 %v4973_v56  ;;  %v5045_v54 = vld [vmem:[#allocation5 + $0x3c8] ss:$16 sps:$4 sm:$0xff]   ;;  %v5053_v56 = vld [vmem:[#allocation5 + $0x3ac] ss:$16 sps:$4 sm:$0xff]  }
 0x159   :  { %2370 = vmatprep.subr.bf16.mxu0 %v4978_v57  ;;  %2411 = vmatprep.subr.bf16.mxu1 %v4981_v58  ;;  %v5048_v57 = vld [vmem:[#allocation5 + $0x1a8] ss:$16 sps:$4 sm:$0xff]  }
 0x15a   :  { %v5051_v58 = vld [vmem:[#allocation5 + $0x3a8] ss:$16 sps:$4 sm:$0xff]  }
 0x15c   :  { %2371 = vmatpush2.bf16.msra.mxu0 %v4976_v60  ;;  %2412 = vmatpush2.bf16.msra.mxu1 %v4979_v61  ;;  %v5059_v60 = vld [vmem:[#allocation5 + $0x38c] ss:$16 sps:$4 sm:$0xff]   ;;  %v5057_v61 = vld [vmem:[#allocation5 + $0x388] ss:$16 sps:$4 sm:$0xff]  }
 0x15d   :  { %2372 = vmatprep.subr.bf16.mxu0 %v4984_v62  ;;  %2413 = vmatprep.subr.bf16.mxu1 %v4987_v63  ;;  %v5062_v62 = vld [vmem:[#allocation5 + $0x16c] ss:$16 sps:$4 sm:$0xff]  }
 0x15e   :  { %v5065_v63 = vld [vmem:[#allocation5 + $0x36c] ss:$16 sps:$4 sm:$0xff]  }
 0x160   :  { %2373 = vmatpush2.bf16.msra.mxu0 %v4982_v7  ;;  %2414 = vmatpush2.bf16.msra.mxu1 %v4985_v4  ;;  %v5063_v7 = vld [vmem:[#allocation5 + $0x368] ss:$16 sps:$4 sm:$0xff]   ;;  %v5071_v4 = vld [vmem:[#allocation5 + $0x34c] ss:$16 sps:$4 sm:$0xff]  }
 0x161   :  { %2424 = vmatprep.subr.bf16.mxu0 %v4990_v13  ;;  %2465 = vmatprep.subr.bf16.mxu1 %v4993_v5  ;;  %v5066_v13 = vld [vmem:[#allocation5 + $0x148] ss:$16 sps:$4 sm:$0xff]  }
 0x162   :  { %v5069_v5 = vld [vmem:[#allocation5 + $0x348] ss:$16 sps:$4 sm:$0xff]  }
 0x163   :  { %2375 = vmatmul.mubr.bf16.vlgmr.msra.gmra.mxu0 %v5756_v15  ;;  %2416 = vmatmul.mubr.bf16.vlgmr.msra.gmra.mxu1 %v5754_v14 }
 0x164   :  { %2425 = vmatpush1.bf16.msra.mxu0 %v4988_v2  ;;  %2456 = vmatprep.mubr.bf16.mxu0 %v5724_v35  ;;  %v5009_v35 = vld [vmem:[#allocation5 + $0x288] ss:$16 sps:$4 sm:$0xff]   ;;  %v5074_v2 = vld [vmem:[#allocation5 + $0x12c] ss:$16 sps:$4 sm:$0xff]  }
 0x165   :  { %2466 = vmatpush1.bf16.msra.mxu1 %v4991_v16  ;;  %2497 = vmatprep.mubr.bf16.mxu1 %v5728_v39  ;;  %v5012_v39 = vld [vmem:[#allocation5 + $0x68] ss:$16 sps:$4 sm:$0xff]   ;;  %v5077_v16 = vld [vmem:[#allocation5 + $0x32c] ss:$16 sps:$4 sm:$0xff]  }
 0x166   :  { %2426 = vmatprep.subr.bf16.mxu0 %v4996_v17  ;;  %2467 = vmatprep.subr.bf16.mxu1 %v4999_v18  ;;  %v5072_v17 = vld [vmem:[#allocation5 + $0x128] ss:$16 sps:$4 sm:$0xff]  }
 0x167   :  { %v5075_v18 = vld [vmem:[#allocation5 + $0x328] ss:$16 sps:$4 sm:$0xff]  }
 0x168   :  { %2427 = vmatpush1.bf16.msra.mxu0 %v4994_v19  ;;  %v5080_v19 = vld [vmem:[#allocation5 + $0x10c] ss:$16 sps:$4 sm:$0xff]  }
 0x169   :  { %2468 = vmatpush1.bf16.msra.mxu1 %v4997_v20  ;;  %2428 = vmatprep.subr.bf16.mxu0 %v5002_v21  ;;  %v5083_v20 = vld [vmem:[#allocation5 + $0x30c] ss:$16 sps:$4 sm:$0xff]   ;;  %v5078_v21 = vld [vmem:[#allocation5 + $0x108] ss:$16 sps:$4 sm:$0xff]  }
 0x16a   :  { %2469 = vmatprep.subr.bf16.mxu1 %v5005_v12  ;;  %v5081_v12 = vld [vmem:[#allocation5 + $0x308] ss:$16 sps:$4 sm:$0xff]  }
 0x16c   :  { %2429 = vmatpush1.bf16.msra.mxu0 %v5000_v22  ;;  %v5086_v22 = vld [vmem:[#allocation5 + $0x4ec] ss:$16 sps:$4 sm:$0xff]  }
 0x16d   :  { %2470 = vmatpush1.bf16.msra.mxu1 %v5003_v23  ;;  %2430 = vmatprep.subr.bf16.mxu0 %v5008_v24  ;;  %v5089_v23 = vld [vmem:[#allocation5 + $0x6ec] ss:$16 sps:$4 sm:$0xff]   ;;  %v5084_v24 = vld [vmem:[#allocation5 + $0x4e8] ss:$16 sps:$4 sm:$0xff]  }
 0x16e   :  { %2471 = vmatprep.subr.bf16.mxu1 %v5011_v25  ;;  %v5087_v25 = vld [vmem:[#allocation5 + $0x6e8] ss:$16 sps:$4 sm:$0xff]  }
 0x170   :  { %2431 = vmatpush1.bf16.msra.mxu0 %v5006_v27  ;;  %v5092_v27 = vld [vmem:[#allocation5 + $0x4cc] ss:$16 sps:$4 sm:$0xff]  }
 0x171   :  { %2472 = vmatpush1.bf16.msra.mxu1 %v5009_v35  ;;  %2432 = vmatprep.subr.bf16.mxu0 %v5014_v28  ;;  %v5095_v35 = vld [vmem:[#allocation5 + $0x6cc] ss:$16 sps:$4 sm:$0xff]   ;;  %v5090_v28 = vld [vmem:[#allocation5 + $0x4c8] ss:$16 sps:$4 sm:$0xff]  }
 0x172   :  { %2473 = vmatprep.subr.bf16.mxu1 %v5017_v29  ;;  %v5093_v29 = vld [vmem:[#allocation5 + $0x6c8] ss:$16 sps:$4 sm:$0xff]  }
 0x174   :  { %2433 = vmatpush1.bf16.msra.mxu0 %v5012_v39  ;;  %v5098_v39 = vld [vmem:[#allocation5 + $0x4ac] ss:$16 sps:$4 sm:$0xff]  }
 0x175   :  { %2474 = vmatpush1.bf16.msra.mxu1 %v5015_v31  ;;  %2434 = vmatprep.subr.bf16.mxu0 %v5020_v32  ;;  %v5101_v31 = vld [vmem:[#allocation5 + $0x6ac] ss:$16 sps:$4 sm:$0xff]   ;;  %v5096_v32 = vld [vmem:[#allocation5 + $0x4a8] ss:$16 sps:$4 sm:$0xff]  }
 0x176   :  { %2475 = vmatprep.subr.bf16.mxu1 %v5023_v33  ;;  %v5104_v33 = vld [vmem:[#allocation5 + $0x48c] ss:$16 sps:$4 sm:$0xff]  }
 0x178   :  { %2435 = vmatpush1.bf16.msra.mxu0 %v5018_v36  ;;  %v5102_v36 = vld [vmem:[#allocation5 + $0x488] ss:$16 sps:$4 sm:$0xff]  }
 0x179   :  { %2476 = vmatpush1.bf16.msra.mxu1 %v5021_v37  ;;  %2436 = vmatprep.subr.bf16.mxu0 %v5026_v40  ;;  %v5110_v37 = vld [vmem:[#allocation5 + $0x46c] ss:$16 sps:$4 sm:$0xff]  }
 0x17a   :  { %2477 = vmatprep.subr.bf16.mxu1 %v5029_v0  ;;  %v5113_v40 = vld [vmem:[#allocation5 + $0x66c] ss:$16 sps:$4 sm:$0xff]   ;;  %v5111_v0 = vld [vmem:[#allocation5 + $0x668] ss:$16 sps:$4 sm:$0xff]  }
 0x17c   :  { %2437 = vmatpush1.bf16.msra.mxu0 %v5024_v41  ;;  %v5116_v41 = vld [vmem:[#allocation5 + $0x44c] ss:$16 sps:$4 sm:$0xff]  }
 0x17d   :  { %2478 = vmatpush1.bf16.msra.mxu1 %v5027_v42  ;;  %2438 = vmatprep.subr.bf16.mxu0 %v5032_v43  ;;  %v5119_v42 = vld [vmem:[#allocation5 + $0x64c] ss:$16 sps:$4 sm:$0xff]   ;;  %v5114_v43 = vld [vmem:[#allocation5 + $0x448] ss:$16 sps:$4 sm:$0xff]  }
 0x17e   :  { %2479 = vmatprep.subr.bf16.mxu1 %v5035_v44  ;;  %v5117_v44 = vld [vmem:[#allocation5 + $0x648] ss:$16 sps:$4 sm:$0xff]  }
 0x180   :  { %2439 = vmatpush1.bf16.msra.mxu0 %v5030_v45  ;;  %v5122_v45 = vld [vmem:[#allocation5 + $0x42c] ss:$16 sps:$4 sm:$0xff]  }
 0x181   :  { %2480 = vmatpush1.bf16.msra.mxu1 %v5033_v46  ;;  %2440 = vmatprep.subr.bf16.mxu0 %v5038_v47  ;;  %v5125_v46 = vld [vmem:[#allocation5 + $0x62c] ss:$16 sps:$4 sm:$0xff]   ;;  %v5120_v47 = vld [vmem:[#allocation5 + $0x428] ss:$16 sps:$4 sm:$0xff]  }
 0x182   :  { %2481 = vmatprep.subr.bf16.mxu1 %v5041_v48  ;;  %v5123_v48 = vld [vmem:[#allocation5 + $0x628] ss:$16 sps:$4 sm:$0xff]  }
 0x184   :  { %2441 = vmatpush2.bf16.msra.mxu0 %v5036_v49  ;;  %v5128_v49 = vld [vmem:[#allocation5 + $0x40c] ss:$16 sps:$4 sm:$0xff]  }
 0x185   :  { %2482 = vmatpush2.bf16.msra.mxu1 %v5039_v50  ;;  %2442 = vmatprep.subr.bf16.mxu0 %v5044_v51  ;;  %v5131_v50 = vld [vmem:[#allocation5 + $0x60c] ss:$16 sps:$4 sm:$0xff]   ;;  %v5126_v51 = vld [vmem:[#allocation5 + $0x408] ss:$16 sps:$4 sm:$0xff]  }
 0x186   :  { %2483 = vmatprep.subr.bf16.mxu1 %v5047_v52  ;;  %v5129_v52 = vld [vmem:[#allocation5 + $0x608] ss:$16 sps:$4 sm:$0xff]  }
 0x188   :  { %2443 = vmatpush2.bf16.msra.mxu0 %v5042_v53  ;;  %v5134_v53 = vld [vmem:[#allocation5 + $0x5ec] ss:$16 sps:$4 sm:$0xff]  }
 0x189   :  { %2484 = vmatpush2.bf16.msra.mxu1 %v5045_v54  ;;  %2444 = vmatprep.subr.bf16.mxu0 %v5050_v55  ;;  %v5137_v54 = vld [vmem:[#allocation5 + $0x7ec] ss:$16 sps:$4 sm:$0xff]   ;;  %v5132_v55 = vld [vmem:[#allocation5 + $0x5e8] ss:$16 sps:$4 sm:$0xff]  }
 0x18a   :  { %2485 = vmatprep.subr.bf16.mxu1 %v5053_v56  ;;  %v5135_v56 = vld [vmem:[#allocation5 + $0x7e8] ss:$16 sps:$4 sm:$0xff]  }
 0x18c   :  { %2445 = vmatpush2.bf16.msra.mxu0 %v5048_v57  ;;  %v5140_v57 = vld [vmem:[#allocation5 + $0x5cc] ss:$16 sps:$4 sm:$0xff]  }
 0x18d   :  { %2486 = vmatpush2.bf16.msra.mxu1 %v5051_v58  ;;  %2446 = vmatprep.subr.bf16.mxu0 %v5056_v59  ;;  %v5143_v58 = vld [vmem:[#allocation5 + $0x7cc] ss:$16 sps:$4 sm:$0xff]   ;;  %v5138_v59 = vld [vmem:[#allocation5 + $0x5c8] ss:$16 sps:$4 sm:$0xff]  }
 0x18e   :  { %2487 = vmatprep.subr.bf16.mxu1 %v5059_v60  ;;  %v5141_v60 = vld [vmem:[#allocation5 + $0x7c8] ss:$16 sps:$4 sm:$0xff]  }
 0x190   :  { %2447 = vmatpush2.bf16.msra.mxu0 %v5054_v6  ;;  %v5146_v6 = vld [vmem:[#allocation5 + $0x5ac] ss:$16 sps:$4 sm:$0xff]  }
 0x191   :  { %2488 = vmatpush2.bf16.msra.mxu1 %v5057_v61  ;;  %2448 = vmatprep.subr.bf16.mxu0 %v5062_v62  ;;  %v5149_v61 = vld [vmem:[#allocation5 + $0x7ac] ss:$16 sps:$4 sm:$0xff]   ;;  %v5144_v62 = vld [vmem:[#allocation5 + $0x5a8] ss:$16 sps:$4 sm:$0xff]  }
 0x192   :  { %2489 = vmatprep.subr.bf16.mxu1 %v5065_v63  ;;  %v5147_v63 = vld [vmem:[#allocation5 + $0x7a8] ss:$16 sps:$4 sm:$0xff]  }
 0x194   :  { %2449 = vmatpush2.bf16.msra.mxu0 %v5060_v1  ;;  %v5152_v1 = vld [vmem:[#allocation5 + $0x58c] ss:$16 sps:$4 sm:$0xff]  }
 0x195   :  { %2490 = vmatpush2.bf16.msra.mxu1 %v5063_v7  ;;  %2450 = vmatprep.subr.bf16.mxu0 %v5068_v3  ;;  %v5155_v7 = vld [vmem:[#allocation5 + $0x78c] ss:$16 sps:$4 sm:$0xff]   ;;  %v5150_v3 = vld [vmem:[#allocation5 + $0x588] ss:$16 sps:$4 sm:$0xff]  }
 0x196   :  { %2491 = vmatprep.subr.bf16.mxu1 %v5071_v4  ;;  %v5153_v4 = vld [vmem:[#allocation5 + $0x788] ss:$16 sps:$4 sm:$0xff]  }
 0x198   :  { %2451 = vmatpush2.bf16.msra.mxu0 %v5066_v13  ;;  %v5158_v13 = vld [vmem:[#allocation5 + $0x56c] ss:$16 sps:$4 sm:$0xff]  }
 0x199   :  { %2492 = vmatpush2.bf16.msra.mxu1 %v5069_v5  ;;  %2452 = vmatprep.subr.bf16.mxu0 %v5074_v2  ;;  %v5161_v5 = vld [vmem:[#allocation5 + $0x76c] ss:$16 sps:$4 sm:$0xff]   ;;  %v5156_v2 = vld [vmem:[#allocation5 + $0x568] ss:$16 sps:$4 sm:$0xff]  }
 0x19a   :  { %2493 = vmatprep.subr.bf16.mxu1 %v5077_v16  ;;  %v5159_v16 = vld [vmem:[#allocation5 + $0x768] ss:$16 sps:$4 sm:$0xff]  }
 0x19c   :  { %2453 = vmatpush2.bf16.msra.mxu0 %v5072_v17  ;;  %v5164_v17 = vld [vmem:[#allocation5 + $0x54c] ss:$16 sps:$4 sm:$0xff]  }
 0x19d   :  { %2494 = vmatpush2.bf16.msra.mxu1 %v5075_v18  ;;  %2454 = vmatprep.subr.bf16.mxu0 %v5080_v19  ;;  %v5167_v18 = vld [vmem:[#allocation5 + $0x74c] ss:$16 sps:$4 sm:$0xff]   ;;  %v5162_v19 = vld [vmem:[#allocation5 + $0x548] ss:$16 sps:$4 sm:$0xff]  }
 0x19e   :  { %2495 = vmatprep.subr.bf16.mxu1 %v5083_v20  ;;  %v5165_v20 = vld [vmem:[#allocation5 + $0x748] ss:$16 sps:$4 sm:$0xff]  }
 0x1a0   :  { %2455 = vmatpush2.bf16.msra.mxu0 %v5078_v21  ;;  %v5170_v21 = vld [vmem:[#allocation5 + $0x52c] ss:$16 sps:$4 sm:$0xff]  }
 0x1a1   :  { %2496 = vmatpush2.bf16.msra.mxu1 %v5081_v12  ;;  %2506 = vmatprep.subr.bf16.mxu0 %v5086_v22  ;;  %v5173_v12 = vld [vmem:[#allocation5 + $0x72c] ss:$16 sps:$4 sm:$0xff]   ;;  %v5168_v22 = vld [vmem:[#allocation5 + $0x528] ss:$16 sps:$4 sm:$0xff]  }
 0x1a2   :  { %2547 = vmatprep.subr.bf16.mxu1 %v5089_v23  ;;  %v5171_v23 = vld [vmem:[#allocation5 + $0x728] ss:$16 sps:$4 sm:$0xff]  }
 0x1a3   :  { %2457 = vmatmul.mubr.bf16.vlgmr.msra.gmra.mxu0 %v5726_v38  ;;  %v5099_v38 = vld [vmem:[#allocation5 + $0x6a8] ss:$16 sps:$4 sm:$0xff]  }
 0x1a4   :  { %2498 = vmatmul.mubr.bf16.vlgmr.msra.gmra.mxu1 %v5722_v34  ;;  %2507 = vmatpush1.bf16.msra.mxu0 %v5084_v24  ;;  %v5107_v34 = vld [vmem:[#allocation5 + $0x68c] ss:$16 sps:$4 sm:$0xff]  }
 0x1a5   :  { %2538 = vmatprep.mubr.bf16.mxu0 %v5742_v26  ;;  %2548 = vmatpush1.bf16.msra.mxu1 %v5087_v25  ;;  %v5105_v26 = vld [vmem:[#allocation5 + $0x688] ss:$16 sps:$4 sm:$0xff]   ;;  %v5176_v24 = vld [vmem:[#allocation5 + $0x50c] ss:$16 sps:$4 sm:$0xff]  }
 0x1a6   :  { %2579 = vmatprep.mubr.bf16.mxu1 %v5744_v30  ;;  %2508 = vmatprep.subr.bf16.mxu0 %v5092_v27  ;;  %v5108_v30 = vld [vmem:[#allocation5 + $0x468] ss:$16 sps:$4 sm:$0xff]   ;;  %v5179_v25 = vld [vmem:[#allocation5 + $0x70c] ss:$16 sps:$4 sm:$0xff]  }
 0x1a7   :  { %2549 = vmatprep.subr.bf16.mxu1 %v5095_v35  ;;  %v5174_v27 = vld [vmem:[#allocation5 + $0x508] ss:$16 sps:$4 sm:$0xff]  }
 0x1a8   :  { %2509 = vmatpush1.bf16.msra.mxu0 %v5090_v28  ;;  %v5177_v35 = vld [vmem:[#allocation5 + $0x708] ss:$16 sps:$4 sm:$0xff]   ;;  %v5182_v28 = vld [vmem:[#allocation7 + $0xe4] ss:$16 sps:$4 sm:$0xff]  }
 0x1a9   :  { %2550 = vmatpush1.bf16.msra.mxu1 %v5093_v29  ;;  %2510 = vmatprep.subr.bf16.mxu0 %v5098_v39  ;;  %v5180_v29 = vld [vmem:[#allocation7 + $0xe0] ss:$16 sps:$4 sm:$0xff]   ;;  %v5185_v39 = vld [vmem:[#allocation7 + $0xc4] ss:$16 sps:$4 sm:$0xff]  }
 0x1aa   :  { %2551 = vmatprep.subr.bf16.mxu1 %v5101_v31 }
 0x1ac   :  { %2511 = vmatpush1.bf16.msra.mxu0 %v5096_v32 }
 0x1ad   :  { %2552 = vmatpush1.bf16.msra.mxu1 %v5099_v38  ;;  %2512 = vmatprep.subr.bf16.mxu0 %v5104_v33  ;;  %v5183_v38 = vld [vmem:[#allocation7 + $0xc0] ss:$16 sps:$4 sm:$0xff]  }
 0x1ae   :  { %2553 = vmatprep.subr.bf16.mxu1 %v5107_v34  ;;  %v5188_v34 = vld [vmem:[#allocation7 + $0xa4] ss:$16 sps:$4 sm:$0xff]  }
 0x1b0   :  { %2513 = vmatpush1.bf16.msra.mxu0 %v5102_v36 }
 0x1b1   :  { %2554 = vmatpush1.bf16.msra.mxu1 %v5105_v26  ;;  %2514 = vmatprep.subr.bf16.mxu0 %v5110_v37 }
 0x1b2   :  { %2555 = vmatprep.subr.bf16.mxu1 %v5113_v40  ;;  %v5186_v40 = vld [vmem:[#allocation7 + $0xa0] ss:$16 sps:$4 sm:$0xff]  }
 0x1b4   :  { %2515 = vmatpush1.bf16.msra.mxu0 %v5108_v30 }
 0x1b5   :  { %2556 = vmatpush1.bf16.msra.mxu1 %v5111_v0  ;;  %2516 = vmatprep.subr.bf16.mxu0 %v5116_v41  ;;  %v5276_v41 = vld [vmem:[#allocation7 + $0x2e0] ss:$16 sps:$4 sm:$0xff]  }
 0x1b6   :  { %2557 = vmatprep.subr.bf16.mxu1 %v5119_v42  ;;  %v5278_v42 = vld [vmem:[#allocation7 + $0x2e4] ss:$16 sps:$4 sm:$0xff]  }
 0x1b8   :  { %2517 = vmatpush1.bf16.msra.mxu0 %v5114_v43  ;;  %v5194_v43 = vld [vmem:[#allocation7 + $0x64] ss:$16 sps:$4 sm:$0xff]  }
 0x1b9   :  { %2558 = vmatpush1.bf16.msra.mxu1 %v5117_v44  ;;  %2518 = vmatprep.subr.bf16.mxu0 %v5122_v45  ;;  %v5279_v44 = vld [vmem:[#allocation7 + $0x2c0] ss:$16 sps:$4 sm:$0xff]   ;;  %v5281_v45 = vld [vmem:[#allocation7 + $0x2c4] ss:$16 sps:$4 sm:$0xff]  }
 0x1ba   :  { %2559 = vmatprep.subr.bf16.mxu1 %v5125_v46  ;;  %v5192_v46 = vld [vmem:[#allocation7 + $0x60] ss:$16 sps:$4 sm:$0xff]  }
 0x1bc   :  { %2519 = vmatpush1.bf16.msra.mxu0 %v5120_v47  ;;  %v5284_v47 = vld [vmem:[#allocation7 + $0x2a4] ss:$16 sps:$4 sm:$0xff]  }
 0x1bd   :  { %2560 = vmatpush1.bf16.msra.mxu1 %v5123_v48  ;;  %2520 = vmatprep.subr.bf16.mxu0 %v5128_v49  ;;  %v5197_v48 = vld [vmem:[#allocation7 + $0x44] ss:$16 sps:$4 sm:$0xff]   ;;  %v5282_v49 = vld [vmem:[#allocation7 + $0x2a0] ss:$16 sps:$4 sm:$0xff]  }
 0x1be   :  { %2561 = vmatprep.subr.bf16.mxu1 %v5131_v50  ;;  %v5195_v50 = vld [vmem:[#allocation7 + $0x40] ss:$16 sps:$4 sm:$0xff]  }
 0x1c0   :  { %2521 = vmatpush1.bf16.msra.mxu0 %v5126_v51  ;;  %v5287_v51 = vld [vmem:[#allocation7 + $0x284] ss:$16 sps:$4 sm:$0xff]  }
 0x1c1   :  { %2562 = vmatpush1.bf16.msra.mxu1 %v5129_v52  ;;  %2522 = vmatprep.subr.bf16.mxu0 %v5134_v53  ;;  %v5200_v52 = vld [vmem:[#allocation7 + $0x24] ss:$16 sps:$4 sm:$0xff]   ;;  %v5285_v53 = vld [vmem:[#allocation7 + $0x280] ss:$16 sps:$4 sm:$0xff]  }
 0x1c2   :  { %2563 = vmatprep.subr.bf16.mxu1 %v5137_v54  ;;  %v5198_v54 = vld [vmem:[#allocation7 + $0x20] ss:$16 sps:$4 sm:$0xff]  }
 0x1c4   :  { %2523 = vmatpush2.bf16.msra.mxu0 %v5132_v55  ;;  %v5290_v55 = vld [vmem:[#allocation7 + $0x264] ss:$16 sps:$4 sm:$0xff]  }
 0x1c5   :  { %2564 = vmatpush2.bf16.msra.mxu1 %v5135_v56  ;;  %2524 = vmatprep.subr.bf16.mxu0 %v5140_v57  ;;  %v5203_v56 = vld [vmem:[#allocation7 + $0x4] ss:$16 sps:$4 sm:$0xff]   ;;  %v5288_v57 = vld [vmem:[#allocation7 + $0x260] ss:$16 sps:$4 sm:$0xff]  }
 0x1c6   :  { %2565 = vmatprep.subr.bf16.mxu1 %v5143_v58  ;;  %v5201_v58 = vld [vmem:[#allocation7] ss:$16 sps:$4 sm:$0xff]  }
 0x1c8   :  { %2525 = vmatpush2.bf16.msra.mxu0 %v5138_v59  ;;  %v5293_v59 = vld [vmem:[#allocation7 + $0x244] ss:$16 sps:$4 sm:$0xff]  }
 0x1c9   :  { %2566 = vmatpush2.bf16.msra.mxu1 %v5141_v60  ;;  %2526 = vmatprep.subr.bf16.mxu0 %v5146_v6  ;;  %v5206_v60 = vld [vmem:[#allocation7 + $0x1e4] ss:$16 sps:$4 sm:$0xff]   ;;  %v5291_v6 = vld [vmem:[#allocation7 + $0x240] ss:$16 sps:$4 sm:$0xff]  }
 0x1ca   :  { %2567 = vmatprep.subr.bf16.mxu1 %v5149_v61  ;;  %v5204_v61 = vld [vmem:[#allocation7 + $0x1e0] ss:$16 sps:$4 sm:$0xff]  }
 0x1cc   :  { %2527 = vmatpush2.bf16.msra.mxu0 %v5144_v62  ;;  %v5296_v62 = vld [vmem:[#allocation7 + $0x224] ss:$16 sps:$4 sm:$0xff]  }
 0x1cd   :  { %2568 = vmatpush2.bf16.msra.mxu1 %v5147_v63  ;;  %2528 = vmatprep.subr.bf16.mxu0 %v5152_v1  ;;  %v5209_v63 = vld [vmem:[#allocation7 + $0x1c4] ss:$16 sps:$4 sm:$0xff]   ;;  %v5294_v1 = vld [vmem:[#allocation7 + $0x220] ss:$16 sps:$4 sm:$0xff]  }
 0x1ce   :  { %2569 = vmatprep.subr.bf16.mxu1 %v5155_v7  ;;  %v5207_v7 = vld [vmem:[#allocation7 + $0x1c0] ss:$16 sps:$4 sm:$0xff]  }
 0x1d0   :  { %2529 = vmatpush2.bf16.msra.mxu0 %v5150_v3  ;;  %v5299_v3 = vld [vmem:[#allocation7 + $0x204] ss:$16 sps:$4 sm:$0xff]  }
 0x1d1   :  { %2570 = vmatpush2.bf16.msra.mxu1 %v5153_v4  ;;  %2530 = vmatprep.subr.bf16.mxu0 %v5158_v13  ;;  %v5212_v4 = vld [vmem:[#allocation7 + $0x1a4] ss:$16 sps:$4 sm:$0xff]   ;;  %v5297_v13 = vld [vmem:[#allocation7 + $0x200] ss:$16 sps:$4 sm:$0xff]  }
 0x1d2   :  { %2571 = vmatprep.subr.bf16.mxu1 %v5161_v5  ;;  %v5210_v5 = vld [vmem:[#allocation7 + $0x1a0] ss:$16 sps:$4 sm:$0xff]  }
 0x1d4   :  { %2531 = vmatpush2.bf16.msra.mxu0 %v5156_v2  ;;  %v5302_v2 = vld [vmem:[#allocation7 + $0x3e4] ss:$16 sps:$4 sm:$0xff]  }
 0x1d5   :  { %2572 = vmatpush2.bf16.msra.mxu1 %v5159_v16  ;;  %2532 = vmatprep.subr.bf16.mxu0 %v5164_v17  ;;  %v5215_v16 = vld [vmem:[#allocation7 + $0x184] ss:$16 sps:$4 sm:$0xff]   ;;  %v5300_v17 = vld [vmem:[#allocation7 + $0x3e0] ss:$16 sps:$4 sm:$0xff]  }
 0x1d6   :  { %2573 = vmatprep.subr.bf16.mxu1 %v5167_v18  ;;  %v5213_v18 = vld [vmem:[#allocation7 + $0x180] ss:$16 sps:$4 sm:$0xff]  }
 0x1d8   :  { %2533 = vmatpush2.bf16.msra.mxu0 %v5162_v19  ;;  %v5305_v19 = vld [vmem:[#allocation7 + $0x3c4] ss:$16 sps:$4 sm:$0xff]  }
 0x1d9   :  { %2574 = vmatpush2.bf16.msra.mxu1 %v5165_v20  ;;  %2534 = vmatprep.subr.bf16.mxu0 %v5170_v21  ;;  %v5218_v20 = vld [vmem:[#allocation7 + $0x164] ss:$16 sps:$4 sm:$0xff]   ;;  %v5303_v21 = vld [vmem:[#allocation7 + $0x3c0] ss:$16 sps:$4 sm:$0xff]  }
 0x1da   :  { %2575 = vmatprep.subr.bf16.mxu1 %v5173_v12  ;;  %v5216_v12 = vld [vmem:[#allocation7 + $0x160] ss:$16 sps:$4 sm:$0xff]  }
 0x1dc   :  { %2535 = vmatpush2.bf16.msra.mxu0 %v5168_v22  ;;  %v5308_v22 = vld [vmem:[#allocation7 + $0x3a4] ss:$16 sps:$4 sm:$0xff]  }
 0x1dd   :  { %2576 = vmatpush2.bf16.msra.mxu1 %v5171_v23  ;;  %2536 = vmatprep.subr.bf16.mxu0 %v5176_v24  ;;  %v5221_v23 = vld [vmem:[#allocation7 + $0x144] ss:$16 sps:$4 sm:$0xff]   ;;  %v5306_v24 = vld [vmem:[#allocation7 + $0x3a0] ss:$16 sps:$4 sm:$0xff]  }
 0x1de   :  { %2577 = vmatprep.subr.bf16.mxu1 %v5179_v25  ;;  %v5219_v25 = vld [vmem:[#allocation7 + $0x140] ss:$16 sps:$4 sm:$0xff]  }
 0x1e0   :  { %2537 = vmatpush2.bf16.msra.mxu0 %v5174_v27  ;;  %v5311_v27 = vld [vmem:[#allocation7 + $0x384] ss:$16 sps:$4 sm:$0xff]  }
 0x1e1   :  { %2578 = vmatpush2.bf16.msra.mxu1 %v5177_v35  ;;  %3386 = vmatprep.subr.bf16.mxu0 %v5182_v28  ;;  %v5224_v35 = vld [vmem:[#allocation7 + $0x124] ss:$16 sps:$4 sm:$0xff]   ;;  %v5779_v28 = vld [vmem:[%s5877_s4] sm:$0xf] }
 0x1e2   :  { %3427 = vmatprep.subr.bf16.mxu1 %v5278_v42 }
 0x1e3   :  { %2539 = vmatmul.mubr.bf16.vlgmr.msra.gmra.mxu0 %v5756_v15  ;;  %v5767_v31 = vpop.f32.mrf.mxu0  ;;  %v5770_v32 = vpop.f32.mrf.mxu1  ;;  %v5191_v15 = vld [vmem:[#allocation7 + $0x84] ss:$16 sps:$4 sm:$0xff]  }
 0x1e4   :  { %2580 = vmatmul.mubr.bf16.vlgmr.msra.gmra.mxu1 %v5754_v14  ;;  %3387 = vmatpush1.bf16.msra.mxu0 %v5180_v29  ;;  %v5189_v14 = vld [vmem:[#allocation7 + $0x80] ss:$16 sps:$4 sm:$0xff]  }
 0x1e5   :  { %v5772_v33 = vpop.f32.mrf.mxu0  ;;  %3388 = vmatprep.subr.bf16.mxu0 %v5185_v39  ;;  %v5774_v36 = vpop.f32.mrf.mxu1  ;;  %3428 = vmatpush1.bf16.msra.mxu1 %v5276_v41  ;;  %v5309_v29 = vld [vmem:[#allocation7 + $0x380] ss:$16 sps:$4 sm:$0xff]  }
 0x1e6   :  { %3429 = vmatprep.subr.bf16.mxu1 %v5281_v45  ;;  %v5222_v39 = vld [vmem:[#allocation7 + $0x120] ss:$16 sps:$4 sm:$0xff]  }
 0x1e7   :  { %v2298_v26 = vpop.f32.mrf.mxu0  ;;  %v2339_v37 = vpop.f32.mrf.mxu1  ;;  %v5315_v41 = vld [vmem:[#allocation7 + $0x340] ss:$16 sps:$4 sm:$0xff]  }
 0x1e8   :  { %3389 = vmatpush1.bf16.msra.mxu0 %v5183_v38  ;;  %v5314_v38 = vld [vmem:[#allocation7 + $0x364] ss:$16 sps:$4 sm:$0xff]   ;;  %v963_v26 = vrot.slane %v5779_v28, %v5703_v8  ;;  %v5312_v37 = vld [vmem:[#allocation7 + $0x360] ss:$16 sps:$4 sm:$0xff]  }
 0x1e9   :  { %v2299_v30 = vpop.f32.mrf.mxu0  ;;  %3390 = vmatprep.subr.bf16.mxu0 %v5188_v34  ;;  %v2340_v0 = vpop.f32.mrf.mxu1  ;;  %3430 = vmatpush1.bf16.msra.mxu1 %v5279_v44  ;;  %v5227_v34 = vld [vmem:[#allocation7 + $0x104] ss:$16 sps:$4 sm:$0xff]  }
 0x1ea   :  { %3431 = vmatprep.subr.bf16.mxu1 %v5284_v47  ;;  %v5225_v30 = vld [vmem:[#allocation7 + $0x100] ss:$16 sps:$4 sm:$0xff]   ;;  %v5230_v0 = vld [vmem:[#allocation7 + $0xec] ss:$16 sps:$4 sm:$0xff]  }
 0x1ec   :  { %3391 = vmatpush1.bf16.msra.mxu0 %v5186_v40  ;;  %v967_v40 = vrot.slane %v5779_v28, %v5709_v10 }
 0x1ed   :  { %3392 = vmatprep.subr.bf16.mxu0 %v5191_v15  ;;  %3432 = vmatpush1.bf16.msra.mxu1 %v5282_v49  ;;  %v5317_v15 = vld [vmem:[#allocation7 + $0x344] ss:$16 sps:$4 sm:$0xff]  }
 0x1ee   :  { %3433 = vmatprep.subr.bf16.mxu1 %v5287_v51  ;;  %v2297_v42 = vadd.f32 %v5772_v33, %v967_v40 }
 0x1f0   :  { %3393 = vmatpush1.bf16.msra.mxu0 %v5189_v14  ;;  %v2295_v14 = vadd.f32 %v5767_v31, %v963_v26  ;;  %v2338_v45 = vadd.f32 %v5774_v36, %v2297_v42  ;;  %v5320_v31 = vld [vmem:[#allocation7 + $0x324] ss:$16 sps:$4 sm:$0xff]   ;;  %v5272_v26 = vld [vmem:[#allocation7 + $0x12c] ss:$16 sps:$4 sm:$0xff]  }
 0x1f1   :  { %3394 = vmatprep.subr.bf16.mxu0 %v5194_v43  ;;  %3434 = vmatpush1.bf16.msra.mxu1 %v5285_v53  ;;  %v5318_v53 = vld [vmem:[#allocation7 + $0x320] ss:$16 sps:$4 sm:$0xff]  }
 0x1f2   :  { %3435 = vmatprep.subr.bf16.mxu1 %v5290_v55  ;;  %v2336_v43 = vadd.f32 %v5770_v32, %v2295_v14 }
 0x1f4   :  { %3395 = vmatpush1.bf16.msra.mxu0 %v5192_v46 }
 0x1f5   :  { %3396 = vmatprep.subr.bf16.mxu0 %v5197_v48  ;;  %3436 = vmatpush1.bf16.msra.mxu1 %v5288_v57 }
 0x1f6   :  { %3437 = vmatprep.subr.bf16.mxu1 %v5293_v59  ;;  %v5321_v59 = vld [vmem:[#allocation7 + $0x300] ss:$16 sps:$4 sm:$0xff]  }
 0x1f8   :  { %3397 = vmatpush1.bf16.msra.mxu0 %v5195_v50 }
 0x1f9   :  { %3398 = vmatprep.subr.bf16.mxu0 %v5200_v52  ;;  %3438 = vmatpush1.bf16.msra.mxu1 %v5291_v6 }
 0x1fa   :  { %3439 = vmatprep.subr.bf16.mxu1 %v5296_v62  ;;  %v5326_v62 = vld [vmem:[#allocation7 + $0x2ec] ss:$16 sps:$4 sm:$0xff]  }
 0x1fc   :  { %3399 = vmatpush1.bf16.msra.mxu0 %v5198_v54 }
 0x1fd   :  { %3400 = vmatprep.subr.bf16.mxu0 %v5203_v56  ;;  %3440 = vmatpush1.bf16.msra.mxu1 %v5294_v1  ;;  %v5236_v1 = vld [vmem:[#allocation7 + $0xac] ss:$16 sps:$4 sm:$0xff]  }
 0x1fe   :  { %3441 = vmatprep.subr.bf16.mxu1 %v5299_v3  ;;  %v5239_v3 = vld [vmem:[#allocation7 + $0x8c] ss:$16 sps:$4 sm:$0xff]  }
 0x200   :  { %3401 = vmatpush1.bf16.msra.mxu0 %v5201_v58  ;;  %v5323_v58 = vld [vmem:[#allocation7 + $0x304] ss:$16 sps:$4 sm:$0xff]  }
 0x201   :  { %3402 = vmatprep.subr.bf16.mxu0 %v5206_v60  ;;  %3442 = vmatpush1.bf16.msra.mxu1 %v5297_v13  ;;  %v5228_v60 = vld [vmem:[#allocation7 + $0xe8] ss:$16 sps:$4 sm:$0xff]   ;;  %v5242_v13 = vld [vmem:[#allocation7 + $0x6c] ss:$16 sps:$4 sm:$0xff]  }
 0x202   :  { %3443 = vmatprep.subr.bf16.mxu1 %v5302_v2  ;;  %v5245_v2 = vld [vmem:[#allocation7 + $0x4c] ss:$16 sps:$4 sm:$0xff]  }
 0x204   :  { %3403 = vmatpush2.bf16.msra.mxu0 %v5204_v61  ;;  %v5233_v61 = vld [vmem:[#allocation7 + $0xcc] ss:$16 sps:$4 sm:$0xff]  }
 0x205   :  { %3404 = vmatprep.subr.bf16.mxu0 %v5209_v63  ;;  %3444 = vmatpush2.bf16.msra.mxu1 %v5300_v17  ;;  %v5231_v63 = vld [vmem:[#allocation7 + $0xc8] ss:$16 sps:$4 sm:$0xff]   ;;  %v5248_v17 = vld [vmem:[#allocation7 + $0x2c] ss:$16 sps:$4 sm:$0xff]  }
 0x206   :  { %3445 = vmatprep.subr.bf16.mxu1 %v5305_v19  ;;  %v5251_v19 = vld [vmem:[#allocation7 + $0xc] ss:$16 sps:$4 sm:$0xff]  }
 0x208   :  { %3405 = vmatpush2.bf16.msra.mxu0 %v5207_v7  ;;  %v5234_v7 = vld [vmem:[#allocation7 + $0xa8] ss:$16 sps:$4 sm:$0xff]  }
 0x209   :  { %3406 = vmatprep.subr.bf16.mxu0 %v5212_v4  ;;  %3446 = vmatpush2.bf16.msra.mxu1 %v5303_v21  ;;  %v5237_v4 = vld [vmem:[#allocation7 + $0x88] ss:$16 sps:$4 sm:$0xff]   ;;  %v5254_v21 = vld [vmem:[#allocation7 + $0x1ec] ss:$16 sps:$4 sm:$0xff]  }
 0x20a   :  { %3447 = vmatprep.subr.bf16.mxu1 %v5308_v22  ;;  %v5257_v22 = vld [vmem:[#allocation7 + $0x1cc] ss:$16 sps:$4 sm:$0xff]  }
 0x20c   :  { %3407 = vmatpush2.bf16.msra.mxu0 %v5210_v5  ;;  %v5240_v5 = vld [vmem:[#allocation7 + $0x68] ss:$16 sps:$4 sm:$0xff]  }
 0x20d   :  { %3408 = vmatprep.subr.bf16.mxu0 %v5215_v16  ;;  %3448 = vmatpush2.bf16.msra.mxu1 %v5306_v24  ;;  %v5243_v16 = vld [vmem:[#allocation7 + $0x48] ss:$16 sps:$4 sm:$0xff]   ;;  %v5260_v24 = vld [vmem:[#allocation7 + $0x1ac] ss:$16 sps:$4 sm:$0xff]  }
 0x20e   :  { %3449 = vmatprep.subr.bf16.mxu1 %v5311_v27  ;;  %v5263_v27 = vld [vmem:[#allocation7 + $0x18c] ss:$16 sps:$4 sm:$0xff]  }
 0x210   :  { %3409 = vmatpush2.bf16.msra.mxu0 %v5213_v18  ;;  %v5246_v18 = vld [vmem:[#allocation7 + $0x28] ss:$16 sps:$4 sm:$0xff]  }
 0x211   :  { %3410 = vmatprep.subr.bf16.mxu0 %v5218_v20  ;;  %3450 = vmatpush2.bf16.msra.mxu1 %v5309_v29  ;;  %v5249_v20 = vld [vmem:[#allocation7 + $0x8] ss:$16 sps:$4 sm:$0xff]   ;;  %v5266_v29 = vld [vmem:[#allocation7 + $0x16c] ss:$16 sps:$4 sm:$0xff]  }
 0x212   :  { %3451 = vmatprep.subr.bf16.mxu1 %v5314_v38  ;;  %v5269_v38 = vld [vmem:[#allocation7 + $0x14c] ss:$16 sps:$4 sm:$0xff]  }
 0x214   :  { %3411 = vmatpush2.bf16.msra.mxu0 %v5216_v12  ;;  %v5252_v12 = vld [vmem:[#allocation7 + $0x1e8] ss:$16 sps:$4 sm:$0xff]  }
 0x215   :  { %3412 = vmatprep.subr.bf16.mxu0 %v5221_v23  ;;  %3452 = vmatpush2.bf16.msra.mxu1 %v5312_v37  ;;  %v5255_v23 = vld [vmem:[#allocation7 + $0x1c8] ss:$16 sps:$4 sm:$0xff]  }
 0x216   :  { %3453 = vmatprep.subr.bf16.mxu1 %v5317_v15 }
 0x218   :  { %3413 = vmatpush2.bf16.msra.mxu0 %v5219_v25  ;;  %v5258_v25 = vld [vmem:[#allocation7 + $0x1a8] ss:$16 sps:$4 sm:$0xff]  }
 0x219   :  { %3414 = vmatprep.subr.bf16.mxu0 %v5224_v35  ;;  %3454 = vmatpush2.bf16.msra.mxu1 %v5315_v41  ;;  %v5261_v35 = vld [vmem:[#allocation7 + $0x188] ss:$16 sps:$4 sm:$0xff]  }
 0x21a   :  { %3455 = vmatprep.subr.bf16.mxu1 %v5320_v31 }
 0x21c   :  { %3415 = vmatpush2.bf16.msra.mxu0 %v5222_v39  ;;  %v5264_v39 = vld [vmem:[#allocation7 + $0x168] ss:$16 sps:$4 sm:$0xff]  }
 0x21d   :  { %3416 = vmatprep.subr.bf16.mxu0 %v5227_v34  ;;  %3456 = vmatpush2.bf16.msra.mxu1 %v5318_v53  ;;  %v5267_v34 = vld [vmem:[#allocation7 + $0x148] ss:$16 sps:$4 sm:$0xff]  }
 0x21e   :  { %3457 = vmatprep.subr.bf16.mxu1 %v5323_v58 }
 0x220   :  { %3417 = vmatpush2.bf16.msra.mxu0 %v5225_v30  ;;  %v5270_v30 = vld [vmem:[#allocation7 + $0x128] ss:$16 sps:$4 sm:$0xff]  }
 0x221   :  { %3468 = vmatprep.subr.bf16.mxu0 %v5230_v0  ;;  %3458 = vmatpush2.bf16.msra.mxu1 %v5321_v59  ;;  %v5275_v0 = vld [vmem:[#allocation7 + $0x10c] ss:$16 sps:$4 sm:$0xff]  }
 0x222   :  { %3509 = vmatprep.subr.bf16.mxu1 %v5326_v62 }
 0x223   :  { %v2376_v44 = vpop.f32.mrf.mxu0  ;;  %v2417_v47 = vpop.f32.mrf.mxu1 }
 0x224   :  { %v2377_v46 = vadd.f32 %v2376_v44, %v2336_v43  ;;  %v5273_v43 = vld [vmem:[#allocation7 + $0x108] ss:$16 sps:$4 sm:$0xff]  }
 0x225   :  { %v2378_v48 = vpop.f32.mrf.mxu0  ;;  %v2419_v51 = vpop.f32.mrf.mxu1 }
 0x226   :  { %v2418_v49 = vadd.f32 %v2417_v47, %v2377_v46  ;;  %v2379_v50 = vadd.f32 %v2378_v48, %v2338_v45  ;;  %v971_v46 = vrot.slane %v5779_v28, %v5706_v9  ;;  %v975_v47 = vrot.slane %v5779_v28, %v5712_v11  ;;  %v5324_v28 = vld [vmem:[#allocation7 + $0x2e8] ss:$16 sps:$4 sm:$0xff]  }
 0x227   :  { %v2380_v52 = vpop.f32.mrf.mxu0  ;;  %v2421_v33 = vpop.f32.mrf.mxu1 }
 0x228   :  { %v2420_v54 = vadd.f32 %v2419_v51, %v2379_v50  ;;  %v2588_v55 = vmax.f32 %v2418_v49, 0.0 }
 0x229   :  { %v2381_v56 = vpop.f32.mrf.mxu0  ;;  %v2422_v57 = vpop.f32.mrf.mxu1 }
 0x22a   :  { %v2589_v32 = vmax.f32 %v2420_v54, 0.0  ;;  %v5789_v6 = vpack.c.bf16 %v2588_v55, %v2588_v55 }
 0x22c   :  { %v2593_v36 = vpack.c.bf16 %v2589_v32, %v2589_v32 }
 0x22e   :  { %3418 = vmatprep.mubr.bf16.mxu0 %v2593_v36 }
 0x22f   :  { %3419 = vmatmul.mubr.bf16.vlgmr.msra.gmra.mxu0 %v5789_v6 }
 0x230   :  { %3469 = vmatpush1.bf16.msra.mxu0 %v5228_v60  ;;  %3500 = vmatprep.mubr.bf16.mxu0 %v2593_v36 }
 0x231   :  { %3470 = vmatprep.subr.bf16.mxu0 %v5233_v61 }
 0x234   :  { %3471 = vmatpush1.bf16.msra.mxu0 %v5231_v63  ;;  %v5329_v63 = vld [vmem:[#allocation7 + $0x2cc] ss:$16 sps:$4 sm:$0xff]  }
 0x235   :  { %3472 = vmatprep.subr.bf16.mxu0 %v5236_v1  ;;  %v5327_v1 = vld [vmem:[#allocation7 + $0x2c8] ss:$16 sps:$4 sm:$0xff]  }
 0x238   :  { %3473 = vmatpush1.bf16.msra.mxu0 %v5234_v7  ;;  %v5332_v7 = vld [vmem:[#allocation7 + $0x2ac] ss:$16 sps:$4 sm:$0xff]  }
 0x239   :  { %3474 = vmatprep.subr.bf16.mxu0 %v5239_v3  ;;  %v5330_v3 = vld [vmem:[#allocation7 + $0x2a8] ss:$16 sps:$4 sm:$0xff]  }
 0x23c   :  { %3475 = vmatpush1.bf16.msra.mxu0 %v5237_v4  ;;  %v5335_v4 = vld [vmem:[#allocation7 + $0x28c] ss:$16 sps:$4 sm:$0xff]  }
 0x23d   :  { %3476 = vmatprep.subr.bf16.mxu0 %v5242_v13  ;;  %v5372_v13 = vld [vmem:[#allocation8 + $0x70] ss:$8 sps:$4 sm:$0xff]  }
 0x240   :  { %3477 = vmatpush1.bf16.msra.mxu0 %v5240_v5  ;;  %v5374_v5 = vld [vmem:[#allocation8 + $0x74] ss:$8 sps:$4 sm:$0xff]  }
 0x241   :  { %3478 = vmatprep.subr.bf16.mxu0 %v5245_v2  ;;  %v5377_v2 = vld [vmem:[#allocation8 + $0x64] ss:$8 sps:$4 sm:$0xff]  }
 0x244   :  { %3479 = vmatpush1.bf16.msra.mxu0 %v5243_v16  ;;  %v5333_v16 = vld [vmem:[#allocation7 + $0x288] ss:$16 sps:$4 sm:$0xff]  }
 0x245   :  { %3480 = vmatprep.subr.bf16.mxu0 %v5248_v17  ;;  %v5375_v17 = vld [vmem:[#allocation8 + $0x60] ss:$8 sps:$4 sm:$0xff]  }
 0x248   :  { %3481 = vmatpush1.bf16.msra.mxu0 %v5246_v18  ;;  %v5338_v18 = vld [vmem:[#allocation7 + $0x26c] ss:$16 sps:$4 sm:$0xff]  }
 0x249   :  { %3482 = vmatprep.subr.bf16.mxu0 %v5251_v19  ;;  %v5380_v19 = vld [vmem:[#allocation8 + $0x54] ss:$8 sps:$4 sm:$0xff]  }
 0x24c   :  { %3483 = vmatpush1.bf16.msra.mxu0 %v5249_v20  ;;  %v5336_v20 = vld [vmem:[#allocation7 + $0x268] ss:$16 sps:$4 sm:$0xff]  }
 0x24d   :  { %3484 = vmatprep.subr.bf16.mxu0 %v5254_v21  ;;  %v5378_v21 = vld [vmem:[#allocation8 + $0x50] ss:$8 sps:$4 sm:$0xff]  }
 0x250   :  { %3485 = vmatpush2.bf16.msra.mxu0 %v5252_v12  ;;  %v5341_v12 = vld [vmem:[#allocation7 + $0x24c] ss:$16 sps:$4 sm:$0xff]  }
 0x251   :  { %3486 = vmatprep.subr.bf16.mxu0 %v5257_v22  ;;  %v5383_v22 = vld [vmem:[#allocation8 + $0x44] ss:$8 sps:$4 sm:$0xff]  }
 0x254   :  { %3487 = vmatpush2.bf16.msra.mxu0 %v5255_v23  ;;  %v5339_v23 = vld [vmem:[#allocation7 + $0x248] ss:$16 sps:$4 sm:$0xff]  }
 0x255   :  { %3488 = vmatprep.subr.bf16.mxu0 %v5260_v24  ;;  %v5381_v24 = vld [vmem:[#allocation8 + $0x40] ss:$8 sps:$4 sm:$0xff]  }
 0x258   :  { %3489 = vmatpush2.bf16.msra.mxu0 %v5258_v25  ;;  %v5344_v25 = vld [vmem:[#allocation7 + $0x22c] ss:$16 sps:$4 sm:$0xff]  }
 0x259   :  { %3490 = vmatprep.subr.bf16.mxu0 %v5263_v27  ;;  %v5386_v27 = vld [vmem:[#allocation8 + $0x34] ss:$8 sps:$4 sm:$0xff]  }
 0x25c   :  { %3491 = vmatpush2.bf16.msra.mxu0 %v5261_v35  ;;  %v5342_v35 = vld [vmem:[#allocation7 + $0x228] ss:$16 sps:$4 sm:$0xff]  }
 0x25d   :  { %3492 = vmatprep.subr.bf16.mxu0 %v5266_v29  ;;  %v5384_v29 = vld [vmem:[#allocation8 + $0x30] ss:$8 sps:$4 sm:$0xff]  }
 0x260   :  { %3493 = vmatpush2.bf16.msra.mxu0 %v5264_v39  ;;  %v5347_v39 = vld [vmem:[#allocation7 + $0x20c] ss:$16 sps:$4 sm:$0xff]  }
 0x261   :  { %3494 = vmatprep.subr.bf16.mxu0 %v5269_v38  ;;  %v5389_v38 = vld [vmem:[#allocation8 + $0x24] ss:$8 sps:$4 sm:$0xff]  }
 0x263   :  { %v2458_v37 = vpop.f32.mrf.mxu0 }
 0x264   :  { %v2499_v40 = vpop.f32.mrf.mxu1  ;;  %3495 = vmatpush2.bf16.msra.mxu0 %v5267_v34  ;;  %v2459_v48 = vadd.f32 %v2458_v37, %v971_v46  ;;  %v5345_v34 = vld [vmem:[#allocation7 + $0x208] ss:$16 sps:$4 sm:$0xff]   ;;  %v5350_v37 = vld [vmem:[#allocation7 + $0x3ec] ss:$16 sps:$4 sm:$0xff]  }
 0x265   :  { %v2460_v15 = vpop.f32.mrf.mxu0  ;;  %3496 = vmatprep.subr.bf16.mxu0 %v5272_v26  ;;  %v5387_v26 = vld [vmem:[#allocation8 + $0x20] ss:$8 sps:$4 sm:$0xff]   ;;  %v5396_v46 = vld [vmem:[#allocation8 + $0xf0] ss:$8 sps:$4 sm:$0xff]  }
 0x266   :  { %v2501_v14 = vpop.f32.mrf.mxu1  ;;  %v2461_v49 = vadd.f32 %v2460_v15, %v975_v47  ;;  %v2500_v50 = vadd.f32 %v2499_v40, %v2459_v48  ;;  %v5392_v40 = vld [vmem:[#allocation8 + $0x14] ss:$8 sps:$4 sm:$0xff]   ;;  %v5390_v15 = vld [vmem:[#allocation8 + $0x10] ss:$8 sps:$4 sm:$0xff]   ;;  %v5401_v48 = vld [vmem:[#allocation8 + $0xe4] ss:$8 sps:$4 sm:$0xff]  }
 0x267   :  { %v2462_v41 = vpop.f32.mrf.mxu0  ;;  %v5359_v47 = vld [vmem:[#allocation7 + $0x38c] ss:$16 sps:$4 sm:$0xff]  }
 0x268   :  { %v2503_v42 = vpop.f32.mrf.mxu1  ;;  %3497 = vmatpush2.bf16.msra.mxu0 %v5270_v30  ;;  %v2502_v31 = vadd.f32 %v2501_v14, %v2461_v49  ;;  %v5348_v30 = vld [vmem:[#allocation7 + $0x3e8] ss:$16 sps:$4 sm:$0xff]   ;;  %v5395_v14 = vld [vmem:[#allocation8 + $0x4] ss:$8 sps:$4 sm:$0xff]  }
 0x269   :  { %v2463_v44 = vpop.f32.mrf.mxu0  ;;  %3498 = vmatprep.subr.bf16.mxu0 %v5275_v0  ;;  %v5353_v0 = vld [vmem:[#allocation7 + $0x3cc] ss:$16 sps:$4 sm:$0xff]   ;;  %v5351_v41 = vld [vmem:[#allocation7 + $0x3c8] ss:$16 sps:$4 sm:$0xff]  }
 0x26a   :  { %v2504_v45 = vpop.f32.mrf.mxu1  ;;  %v5393_v42 = vld [vmem:[#allocation8] ss:$8 sps:$4 sm:$0xff]   ;;  %v5398_v44 = vld [vmem:[#allocation8 + $0xf4] ss:$8 sps:$4 sm:$0xff]  }
 0x26b   :  { %v5354_v45 = vld [vmem:[#allocation7 + $0x3a8] ss:$16 sps:$4 sm:$0xff]  }
 0x26c   :  { %3499 = vmatpush2.bf16.msra.mxu0 %v5273_v43  ;;  %v5356_v43 = vld [vmem:[#allocation7 + $0x3ac] ss:$16 sps:$4 sm:$0xff]   ;;  %v5357_v49 = vld [vmem:[#allocation7 + $0x388] ss:$16 sps:$4 sm:$0xff]  }
 0x26d   :  { %3954 = vmatprep.subr.bf16.mxu0 %v5374_v5  ;;  %v5417_v5 = vld [vmem:[#allocation8 + $0x80] ss:$8 sps:$4 sm:$0xff]  }
 0x26f   :  { %3501 = vmatmul.mubr.bf16.vlgmr.msra.gmra.mxu0 %v5789_v6 }
 0x270   :  { %3955 = vmatpush1.bf16.msra.mxu0 %v5372_v13  ;;  %v5419_v13 = vld [vmem:[#allocation8 + $0x84] ss:$8 sps:$4 sm:$0xff]  }
 0x271   :  { %3956 = vmatprep.subr.bf16.mxu0 %v5377_v2  ;;  %v5420_v2 = vld [vmem:[#allocation8 + $0x170] ss:$8 sps:$4 sm:$0xff]  }
 0x274   :  { %3957 = vmatpush1.bf16.msra.mxu0 %v5375_v17  ;;  %v5425_v17 = vld [vmem:[#allocation8 + $0x164] ss:$8 sps:$4 sm:$0xff]  }
 0x275   :  { %3958 = vmatprep.subr.bf16.mxu0 %v5380_v19  ;;  %v5426_v19 = vld [vmem:[#allocation8 + $0x150] ss:$8 sps:$4 sm:$0xff]  }
 0x278   :  { %3959 = vmatpush1.bf16.msra.mxu0 %v5378_v21  ;;  %v5429_v21 = vld [vmem:[#allocation8 + $0x140] ss:$8 sps:$4 sm:$0xff]  }
 0x279   :  { %3960 = vmatprep.subr.bf16.mxu0 %v5383_v22  ;;  %v5432_v22 = vld [vmem:[#allocation8 + $0x130] ss:$8 sps:$4 sm:$0xff]  }
 0x27c   :  { %3961 = vmatpush1.bf16.msra.mxu0 %v5381_v24  ;;  %v5435_v24 = vld [vmem:[#allocation8 + $0x120] ss:$8 sps:$4 sm:$0xff]  }
 0x27d   :  { %3962 = vmatprep.subr.bf16.mxu0 %v5386_v27  ;;  %v5438_v27 = vld [vmem:[#allocation8 + $0x110] ss:$8 sps:$4 sm:$0xff]  }
 0x280   :  { %3963 = vmatpush1.bf16.msra.mxu0 %v5384_v29  ;;  %v5441_v29 = vld [vmem:[#allocation8 + $0x100] ss:$8 sps:$4 sm:$0xff]  }
 0x281   :  { %3964 = vmatprep.subr.bf16.mxu0 %v5389_v38  ;;  %v5444_v38 = vld [vmem:[#allocation8 + $0x1f0] ss:$8 sps:$4 sm:$0xff]  }
 0x284   :  { %3965 = vmatpush1.bf16.msra.mxu0 %v5387_v26  ;;  %v5447_v26 = vld [vmem:[#allocation8 + $0x1e0] ss:$8 sps:$4 sm:$0xff]  }
 0x285   :  { %3966 = vmatprep.subr.bf16.mxu0 %v5392_v40  ;;  %v5450_v40 = vld [vmem:[#allocation8 + $0x1d0] ss:$8 sps:$4 sm:$0xff]  }
 0x288   :  { %3967 = vmatpush1.bf16.msra.mxu0 %v5390_v15  ;;  %v5453_v15 = vld [vmem:[#allocation8 + $0x1c0] ss:$8 sps:$4 sm:$0xff]  }
 0x289   :  { %3968 = vmatprep.subr.bf16.mxu0 %v5395_v14  ;;  %v5456_v14 = vld [vmem:[#allocation8 + $0x1b0] ss:$8 sps:$4 sm:$0xff]  }
 0x28c   :  { %3969 = vmatpush1.bf16.msra.mxu0 %v5393_v42  ;;  %v2724_v42 = vld [vmem:[%s5879_s6] sm:$0xf] }
 0x28d   :  { %3970 = vmatprep.subr.bf16.mxu0 %v5398_v44  ;;  %v2737_v44 = vrot.slane %v2724_v42, %v5706_v9  ;;  %v2729_v9 = vrot.slane %v2724_v42, %v5703_v8 }
 0x290   :  { %3971 = vmatpush2.bf16.msra.mxu0 %v5396_v46 }
 0x291   :  { %3972 = vmatprep.subr.bf16.mxu0 %v5401_v48  ;;  %v5464_v48 = vld [vmem:[#allocation8 + $0x194] ss:$8 sps:$4 sm:$0xff]  }
 0x2a3   :  { %v2540_v51 = vpop.f32.mrf.mxu0 }
 0x2a4   :  { %v2541_v52 = vadd.f32 %v2540_v51, %v2500_v50  ;;  %v2581_v53 = vpop.f32.mrf.mxu1  ;;  %v5399_v50 = vld [vmem:[#allocation8 + $0xe0] ss:$8 sps:$4 sm:$0xff]   ;;  %v5362_v51 = vld [vmem:[#allocation7 + $0x36c] ss:$16 sps:$4 sm:$0xff]  }
 0x2a5   :  { %v2542_v54 = vpop.f32.mrf.mxu0  ;;  %3973 = vmatpush2.bf16.msra.mxu0 %v5399_v50  ;;  %v5462_v50 = vld [vmem:[#allocation8 + $0x190] ss:$8 sps:$4 sm:$0xff]  }
 0x2a6   :  { %v2582_v33 = vadd.f32 %v2581_v53, %v2541_v52  ;;  %v2543_v55 = vadd.f32 %v2542_v54, %v2502_v31  ;;  %v2583_v56 = vpop.f32.mrf.mxu1  ;;  %v5404_v31 = vld [vmem:[#allocation8 + $0xd4] ss:$8 sps:$4 sm:$0xff]   ;;  %v5360_v52 = vld [vmem:[#allocation7 + $0x368] ss:$16 sps:$4 sm:$0xff]  }
 0x2a7   :  { %v2544_v32 = vpop.f32.mrf.mxu0  ;;  %v5402_v53 = vld [vmem:[#allocation8 + $0xd0] ss:$8 sps:$4 sm:$0xff]   ;;  %v5365_v54 = vld [vmem:[#allocation7 + $0x34c] ss:$16 sps:$4 sm:$0xff]   ;;  %3974 = vmatprep.subr.bf16.mxu0 %v5404_v31 }
 0x2a8   :  { %v2584_v57 = vadd.f32 %v2583_v56, %v2543_v55  ;;  %v2585_v58 = vpop.f32.mrf.mxu1  ;;  %v2590_v59 = vmax.f32 %v2582_v33, 0.0  ;;  %v5407_v33 = vld [vmem:[#allocation8 + $0xc4] ss:$8 sps:$4 sm:$0xff]   ;;  %v5363_v55 = vld [vmem:[#allocation7 + $0x348] ss:$16 sps:$4 sm:$0xff]  }
 0x2a9   :  { %v2545_v36 = vpop.f32.mrf.mxu0  ;;  %3975 = vmatpush2.bf16.msra.mxu0 %v5402_v53  ;;  %v5405_v56 = vld [vmem:[#allocation8 + $0xc0] ss:$8 sps:$4 sm:$0xff]   ;;  %v5368_v32 = vld [vmem:[#allocation7 + $0x32c] ss:$16 sps:$4 sm:$0xff]  }
 0x2aa   :  { %v2591_v60 = vmax.f32 %v2584_v57, 0.0  ;;  %v2586_v6 = vpop.f32.mrf.mxu1  ;;  %v5797_v62 = vpack.c.bf16 %v2590_v59, %v2590_v59  ;;  %3976 = vmatprep.subr.bf16.mxu0 %v5407_v33  ;;  %v5410_v57 = vld [vmem:[#allocation8 + $0xb4] ss:$8 sps:$4 sm:$0xff]   ;;  %v5366_v58 = vld [vmem:[#allocation7 + $0x328] ss:$16 sps:$4 sm:$0xff]   ;;  %v2733_v33 = vrot.slane %v2724_v42, %v5709_v10 }
 0x2ab   :  { %v5408_v59 = vld [vmem:[#allocation8 + $0xb0] ss:$8 sps:$4 sm:$0xff]   ;;  %v5371_v36 = vld [vmem:[#allocation7 + $0x30c] ss:$16 sps:$4 sm:$0xff]  }
 0x2ac   :  { %v2595_v61 = vpack.c.bf16 %v2591_v60, %v2591_v60  ;;  %v5413_v60 = vld [vmem:[#allocation8 + $0xa4] ss:$8 sps:$4 sm:$0xff]   ;;  %v5369_v6 = vld [vmem:[#allocation7 + $0x308] ss:$16 sps:$4 sm:$0xff]  }
 0x2ad   :  { %3977 = vmatpush2.bf16.msra.mxu0 %v5405_v56 }
 0x2ae   :  { %3459 = vmatprep.mubr.bf16.mxu1 %v2595_v61  ;;  %3978 = vmatprep.subr.bf16.mxu0 %v5410_v57 }
 0x2af   :  { %3460 = vmatmul.mubr.bf16.vlgmr.msra.gmra.mxu1 %v5797_v62 }
 0x2b0   :  { %3510 = vmatpush1.bf16.msra.mxu1 %v5324_v28  ;;  %3541 = vmatprep.mubr.bf16.mxu1 %v2595_v61  ;;  %v5411_v61 = vld [vmem:[#allocation8 + $0xa0] ss:$8 sps:$4 sm:$0xff]  }
 0x2b1   :  { %3511 = vmatprep.subr.bf16.mxu1 %v5329_v63  ;;  %3979 = vmatpush2.bf16.msra.mxu0 %v5408_v59 }
 0x2b2   :  { %3980 = vmatprep.subr.bf16.mxu0 %v5413_v60 }
 0x2b4   :  { %3512 = vmatpush1.bf16.msra.mxu1 %v5327_v1  ;;  %v5416_v1 = vld [vmem:[#allocation8 + $0x94] ss:$8 sps:$4 sm:$0xff]  }
 0x2b5   :  { %3513 = vmatprep.subr.bf16.mxu1 %v5332_v7  ;;  %3981 = vmatpush2.bf16.msra.mxu0 %v5411_v61  ;;  %v5414_v7 = vld [vmem:[#allocation8 + $0x90] ss:$8 sps:$4 sm:$0xff]  }
 0x2b6   :  { %3982 = vmatprep.subr.bf16.mxu0 %v5416_v1 }
 0x2b8   :  { %3514 = vmatpush1.bf16.msra.mxu1 %v5330_v3 }
 0x2b9   :  { %3515 = vmatprep.subr.bf16.mxu1 %v5335_v4  ;;  %3983 = vmatpush2.bf16.msra.mxu0 %v5414_v7 }
 0x2ba   :  { %3984 = vmatprep.subr.bf16.mxu0 %v5419_v13 }
 0x2bc   :  { %3516 = vmatpush1.bf16.msra.mxu1 %v5333_v16  ;;  %v5422_v16 = vld [vmem:[#allocation8 + $0x174] ss:$8 sps:$4 sm:$0xff]  }
 0x2bd   :  { %3517 = vmatprep.subr.bf16.mxu1 %v5338_v18  ;;  %3985 = vmatpush2.bf16.msra.mxu0 %v5417_v5  ;;  %v5428_v18 = vld [vmem:[#allocation8 + $0x154] ss:$8 sps:$4 sm:$0xff]  }
 0x2c0   :  { %3518 = vmatpush1.bf16.msra.mxu1 %v5336_v20  ;;  %v5431_v20 = vld [vmem:[#allocation8 + $0x144] ss:$8 sps:$4 sm:$0xff]  }
 0x2c1   :  { %3519 = vmatprep.subr.bf16.mxu1 %v5341_v12  ;;  %v5434_v12 = vld [vmem:[#allocation8 + $0x134] ss:$8 sps:$4 sm:$0xff]  }
 0x2c4   :  { %3520 = vmatpush1.bf16.msra.mxu1 %v5339_v23  ;;  %v5437_v23 = vld [vmem:[#allocation8 + $0x124] ss:$8 sps:$4 sm:$0xff]  }
 0x2c5   :  { %3521 = vmatprep.subr.bf16.mxu1 %v5344_v25  ;;  %v5440_v25 = vld [vmem:[#allocation8 + $0x114] ss:$8 sps:$4 sm:$0xff]  }
 0x2c8   :  { %3522 = vmatpush1.bf16.msra.mxu1 %v5342_v35  ;;  %v5443_v35 = vld [vmem:[#allocation8 + $0x104] ss:$8 sps:$4 sm:$0xff]  }
 0x2c9   :  { %3523 = vmatprep.subr.bf16.mxu1 %v5347_v39  ;;  %v5446_v39 = vld [vmem:[#allocation8 + $0x1f4] ss:$8 sps:$4 sm:$0xff]  }
 0x2cc   :  { %3524 = vmatpush1.bf16.msra.mxu1 %v5345_v34  ;;  %v5449_v34 = vld [vmem:[#allocation8 + $0x1e4] ss:$8 sps:$4 sm:$0xff]  }
 0x2cd   :  { %3525 = vmatprep.subr.bf16.mxu1 %v5350_v37  ;;  %v5452_v37 = vld [vmem:[#allocation8 + $0x1d4] ss:$8 sps:$4 sm:$0xff]  }
 0x2d0   :  { %3526 = vmatpush2.bf16.msra.mxu1 %v5348_v30  ;;  %v5455_v30 = vld [vmem:[#allocation8 + $0x1c4] ss:$8 sps:$4 sm:$0xff]  }
 0x2d1   :  { %3527 = vmatprep.subr.bf16.mxu1 %v5353_v0  ;;  %v5458_v0 = vld [vmem:[#allocation8 + $0x1b4] ss:$8 sps:$4 sm:$0xff]  }
 0x2d4   :  { %3528 = vmatpush2.bf16.msra.mxu1 %v5351_v41  ;;  %v5461_v41 = vld [vmem:[#allocation8 + $0x1a4] ss:$8 sps:$4 sm:$0xff]  }
 0x2d5   :  { %3529 = vmatprep.subr.bf16.mxu1 %v5356_v43  ;;  %v5459_v43 = vld [vmem:[#allocation8 + $0x1a0] ss:$8 sps:$4 sm:$0xff]  }
 0x2d8   :  { %3530 = vmatpush2.bf16.msra.mxu1 %v5354_v45  ;;  %v2741_v45 = vrot.slane %v2724_v42, %v5712_v11 }
 0x2d9   :  { %3531 = vmatprep.subr.bf16.mxu1 %v5359_v47 }
 0x2dc   :  { %3532 = vmatpush2.bf16.msra.mxu1 %v5357_v49 }
 0x2dd   :  { %3533 = vmatprep.subr.bf16.mxu1 %v5362_v51 }
 0x2e0   :  { %3534 = vmatpush2.bf16.msra.mxu1 %v5360_v52  ;;  %v5467_v52 = vld [vmem:[#allocation8 + $0x184] ss:$8 sps:$4 sm:$0xff]  }
 0x2e1   :  { %3535 = vmatprep.subr.bf16.mxu1 %v5365_v54  ;;  %v5465_v54 = vld [vmem:[#allocation8 + $0x180] ss:$8 sps:$4 sm:$0xff]  }
 0x2e4   :  { %3536 = vmatpush2.bf16.msra.mxu1 %v5363_v55 }
 0x2e5   :  { %3537 = vmatprep.subr.bf16.mxu1 %v5368_v32 }
 0x2e8   :  { %3538 = vmatpush2.bf16.msra.mxu1 %v5366_v58 }
 0x2e9   :  { %3539 = vmatprep.subr.bf16.mxu1 %v5371_v36 }
 0x2ec   :  { %3540 = vmatpush2.bf16.msra.mxu1 %v5369_v6 }
 0x2ed   :  { %3995 = vmatprep.subr.bf16.mxu1 %v5422_v16 }
 0x2ef   :  { %3542 = vmatmul.mubr.bf16.vlgmr.msra.gmra.mxu1 %v5797_v62  ;;  %v5801_v28 = vpop.f32.mrf.mxu0  ;;  %v5423_v62 = vld [vmem:[#allocation8 + $0x160] ss:$8 sps:$4 sm:$0xff]  }
 0x2f0   :  { %3996 = vmatpush1.bf16.msra.mxu1 %v5420_v2  ;;  %v3421_v11 = vadd.f32 %v5801_v28, %v2729_v9 }
 0x2f1   :  { %v5803_v63 = vpop.f32.mrf.mxu0  ;;  %3997 = vmatprep.subr.bf16.mxu1 %v5425_v17 }
 0x2f2   :  { %v3423_v56 = vadd.f32 %v5803_v63, %v2733_v33 }
 0x2f3   :  { %v3424_v3 = vpop.f32.mrf.mxu0 }
 0x2f4   :  { %3998 = vmatpush1.bf16.msra.mxu1 %v5423_v62  ;;  %v5468_v62 = vld [vmem:[%s5882_s9 + $0x78] sm:$0xff]  }
 0x2f5   :  { %v3425_v4 = vpop.f32.mrf.mxu0  ;;  %3999 = vmatprep.subr.bf16.mxu1 %v5428_v18  ;;  %v5469_v18 = vld [vmem:[%s5882_s9 + $0x38] sm:$0xff]   ;;  %4762 = vmatprep.subr.bf16.mxu0 %v5468_v62 }
 0x2f8   :  { %4000 = vmatpush1.bf16.msra.mxu1 %v5426_v19  ;;  %v5470_v19 = vld [vmem:[%s5882_s9 + $0x70] sm:$0xff]  }
 0x2f9   :  { %4001 = vmatprep.subr.bf16.mxu1 %v5431_v20  ;;  %v5471_v20 = vld [vmem:[%s5882_s9 + $0x30] sm:$0xff]  }
 0x2fc   :  { %4002 = vmatpush1.bf16.msra.mxu1 %v5429_v21  ;;  %v5472_v21 = vld [vmem:[%s5882_s9 + $0x68] sm:$0xff]  }
 0x2fd   :  { %4003 = vmatprep.subr.bf16.mxu1 %v5434_v12  ;;  %v5473_v12 = vld [vmem:[%s5882_s9 + $0x28] sm:$0xff]  }
 0x300   :  { %4004 = vmatpush1.bf16.msra.mxu1 %v5432_v22  ;;  %v5474_v22 = vld [vmem:[%s5882_s9 + $0x60] sm:$0xff]  }
 0x301   :  { %4005 = vmatprep.subr.bf16.mxu1 %v5437_v23  ;;  %v5475_v23 = vld [vmem:[%s5882_s9 + $0x20] sm:$0xff]  }
 0x304   :  { %4006 = vmatpush1.bf16.msra.mxu1 %v5435_v24  ;;  %v5476_v24 = vld [vmem:[%s5882_s9 + $0x58] sm:$0xff]  }
 0x305   :  { %4007 = vmatprep.subr.bf16.mxu1 %v5440_v25  ;;  %v5477_v25 = vld [vmem:[%s5882_s9 + $0x18] sm:$0xff]  }
 0x308   :  { %4008 = vmatpush1.bf16.msra.mxu1 %v5438_v27  ;;  %v5478_v27 = vld [vmem:[%s5882_s9 + $0x50] sm:$0xff]  }
 0x309   :  { %4009 = vmatprep.subr.bf16.mxu1 %v5443_v35  ;;  %v5479_v35 = vld [vmem:[%s5882_s9 + $0x10] sm:$0xff]  }
 0x30c   :  { %4010 = vmatpush1.bf16.msra.mxu1 %v5441_v29  ;;  %v5480_v29 = vld [vmem:[%s5882_s9 + $0x48] sm:$0xff]  }
 0x30d   :  { %4011 = vmatprep.subr.bf16.mxu1 %v5446_v39  ;;  %v5481_v39 = vld [vmem:[%s5882_s9 + $0x8] sm:$0xff]  }
 0x310   :  { %4012 = vmatpush2.bf16.msra.mxu1 %v5444_v38  ;;  %v5482_v38 = vld [vmem:[%s5882_s9 + $0x40] sm:$0xff]  }
 0x311   :  { %4013 = vmatprep.subr.bf16.mxu1 %v5449_v34  ;;  %v5483_v34 = vld [vmem:[%s5882_s9] sm:$0xff]  }
 0x314   :  { %4014 = vmatpush2.bf16.msra.mxu1 %v5447_v26 }
 0x315   :  { %4015 = vmatprep.subr.bf16.mxu1 %v5452_v37 }
 0x318   :  { %4016 = vmatpush2.bf16.msra.mxu1 %v5450_v40 }
 0x319   :  { %4017 = vmatprep.subr.bf16.mxu1 %v5455_v30 }
 0x31c   :  { %4018 = vmatpush2.bf16.msra.mxu1 %v5453_v15  ;;  %v3622_v15 = vld [vmem:[%s5881_s8] sm:$0x3] }
 0x31d   :  { %4019 = vmatprep.subr.bf16.mxu1 %v5458_v0  ;;  %v3627_v0 = vrot.slane %v3622_v15, %v5703_v8  ;;  %v4745_v8 = vld [vmem:[%s5883_s10] ss:$0 sm:$0xff] }
 0x320   :  { %4020 = vmatpush2.bf16.msra.mxu1 %v5456_v14  ;;  %v3631_v14 = vrot.slane %v3622_v15, %v5709_v10 }
 0x321   :  { %4021 = vmatprep.subr.bf16.mxu1 %v5461_v41 }
 0x324   :  { %4022 = vmatpush2.bf16.msra.mxu1 %v5459_v43 }
 0x325   :  { %4023 = vmatprep.subr.bf16.mxu1 %v5464_v48 }
 0x328   :  { %4024 = vmatpush2.bf16.msra.mxu1 %v5462_v50 }
 0x329   :  { %4025 = vmatprep.subr.bf16.mxu1 %v5467_v52 }
 0x32c   :  { %4026 = vmatpush2.bf16.msra.mxu1 %v5465_v54 }
 0x32f   :  { %v3502_v46 = vpop.f32.mrf.mxu0 }
 0x330   :  { %v3503_v47 = vadd.f32 %v3502_v46, %v2737_v44 }
 0x331   :  { %v3504_v49 = vpop.f32.mrf.mxu0 }
 0x332   :  { %v3505_v51 = vadd.f32 %v3504_v49, %v2741_v45 }
 0x333   :  { %v3506_v31 = vpop.f32.mrf.mxu0 }
 0x335   :  { %v3507_v53 = vpop.f32.mrf.mxu0 }
 0x36f   :  { %v3461_v55 = vpop.f32.mrf.mxu1 }
 0x370   :  { %v3462_v32 = vadd.f32 %v3461_v55, %v3421_v11 }
 0x371   :  { %v3463_v57 = vpop.f32.mrf.mxu1 }
 0x372   :  { %v3464_v58 = vadd.f32 %v3463_v57, %v3423_v56  ;;  %v3550_v59 = vmax.f32 %v3462_v32, 0.0 }
 0x373   :  { %v3465_v36 = vpop.f32.mrf.mxu1 }
 0x374   :  { %v3551_v60 = vmax.f32 %v3464_v58, 0.0  ;;  %v3554_v1 = vpack.c.bf16 %v3550_v59, %v3550_v59 }
 0x375   :  { %v3466_v6 = vpop.f32.mrf.mxu1 }
 0x376   :  { %v3555_v61 = vpack.c.bf16 %v3551_v60, %v3551_v60 }
 0x378   :  { %3986 = vmatprep.mubr.bf16.mxu0 %v3555_v61 }
 0x379   :  { %3987 = vmatmul.mubr.bf16.vlgmr.msra.gmra.mxu0 %v3554_v1 }
 0x37a   :  { %4763 = vmatpush3.bf16.msra.mxu0 %v5469_v18 }
 0x37b   :  { %4764 = vmatprep.subr.bf16.mxu0 %v5470_v19 }
 0x37e   :  { %4765 = vmatpush3.bf16.msra.mxu0 %v5471_v20 }
 0x37f   :  { %4766 = vmatprep.subr.bf16.mxu0 %v5472_v21 }
 0x382   :  { %4767 = vmatpush3.bf16.msra.mxu0 %v5473_v12 }
 0x383   :  { %4768 = vmatprep.subr.bf16.mxu0 %v5474_v22 }
 0x386   :  { %4769 = vmatpush3.bf16.msra.mxu0 %v5475_v23 }
 0x387   :  { %4770 = vmatprep.subr.bf16.mxu0 %v5476_v24 }
 0x38a   :  { %4771 = vmatpush3.bf16.msra.mxu0 %v5477_v25 }
 0x38b   :  { %4772 = vmatprep.subr.bf16.mxu0 %v5478_v27 }
 0x38e   :  { %4773 = vmatpush3.bf16.msra.mxu0 %v5479_v35 }
 0x38f   :  { %4774 = vmatprep.subr.bf16.mxu0 %v5480_v29 }
 0x392   :  { %4775 = vmatpush3.bf16.msra.mxu0 %v5481_v39 }
 0x393   :  { %4776 = vmatprep.subr.bf16.mxu0 %v5482_v38 }
 0x396   :  { %4777 = vmatpush3.bf16.msra.mxu0 %v5483_v34 }
 0x3af   :  { %v3543_v7 = vpop.f32.mrf.mxu1 }
 0x3b0   :  { %v3544_v3 = vadd.f32 %v3543_v7, %v3503_v47 }
 0x3b1   :  { %v3545_v4 = vpop.f32.mrf.mxu1 }
 0x3b2   :  { %v3546_v13 = vadd.f32 %v3545_v4, %v3505_v51  ;;  %v3552_v5 = vmax.f32 %v3544_v3, 0.0 }
 0x3b3   :  { %v3547_v28 = vpop.f32.mrf.mxu1 }
 0x3b4   :  { %v3553_v2 = vmax.f32 %v3546_v13, 0.0  ;;  %v3556_v17 = vpack.c.bf16 %v3552_v5, %v3552_v5 }
 0x3b5   :  { %v3548_v16 = vpop.f32.mrf.mxu1 }
 0x3b6   :  { %v3557_v63 = vpack.c.bf16 %v3553_v2, %v3553_v2 }
 0x3b8   :  { %4027 = vmatprep.mubr.bf16.mxu1 %v3557_v63 }
 0x3b9   :  { %4028 = vmatmul.mubr.bf16.vlgmr.msra.gmra.mxu1 %v3556_v17 }
 0x439   :  { %v3988_v26 = vpop.f32.mrf.mxu0 }
 0x43a   :  { %v3989_v41 = vadd.f32 %v3988_v26, %v3627_v0 }
 0x43b   :  { %v3990_v37 = vpop.f32.mrf.mxu0 }
 0x43c   :  { %v3991_v43 = vadd.f32 %v3990_v37, %v3631_v14 }
 0x43d   :  { %v3992_v40 = vpop.f32.mrf.mxu0 }
 0x43f   :  { %v3993_v30 = vpop.f32.mrf.mxu0 }
 0x479   :  { %v4029_v42 = vpop.f32.mrf.mxu1 }
 0x47a   :  { %v4030_v44 = vadd.f32 %v4029_v42, %v3989_v41 }
 0x47b   :  { %v4031_v45 = vpop.f32.mrf.mxu1 }
 0x47c   :  { %v4032_v46 = vadd.f32 %v4031_v45, %v3991_v43  ;;  %v4036_v47 = vmax.f32 %v4030_v44, 0.0 }
 0x47d   :  { %v4033_v48 = vpop.f32.mrf.mxu1 }
 0x47e   :  { %v4037_v49 = vmax.f32 %v4032_v46, 0.0  ;;  %v4038_v31 = vpack.c.bf16 %v4036_v47, %v4036_v47 }
 0x47f   :  { %v4034_v50 = vpop.f32.mrf.mxu1 }
 0x480   :  { %v4039_v51 = vpack.c.bf16 %v4037_v49, %v4037_v49 }
 0x482   :  { %4207 = vmatprep.mubr.bf16.mxu0 %v4039_v51 }
 0x483   :  { %4208 = vmatmul.mubr.bf16.vlgmr.msra.gmra.mxu0 %v4038_v31 }
 0x543   :  { %v4778_v52 = vpop.f32.mrf.mxu0 }
 0x545   :  { %v4779_v10 = vpop.f32.mrf.mxu0 }
 0x546   :  { %v4780_v53 = vadd.f32 %v4779_v10, %v4778_v52 }
 0x547   :  { %v4781_v54 = vpop.f32.mrf.mxu0 }
 0x548   :  { %v4210_v9 = vadd.f32 %v4780_v53, %v4745_v8 }
 0x549   :  { %v4782_v33 = vpop.f32.mrf.mxu0 }
 0x54a   :  { %4215 = vst [vmem:[#allocation10] sm:$0xff] %v4210_v9 }
 0x54b   :  { %5575 = shalt.err (!%p5572_p10)
}
 0x54c   :  { %4225 = dma.vmem_to_hbm [thread:$0]  %s4223_s13, 128, %s5884_s11, [#allocation4]  }
 0x54d   :  { %5590 = dma.done.wait [#allocation4], 128  }
 0x54e   :  { %5591 = vsyncadd [#allocation4], 4294967168 }
 0x54f   :  { %4229 = vsyncpa [#allocation3], 1 }
 0x550   :  { %4230 = vsyncpa [#allocation6], 1 }
 0x551   :  { %4231 = vsyncpa [#allocation9], 1 }
 0x552   :  { %4232 = vsyncpa [#allocation4], 1 }

</bundles_post_ra>
